<compile_context>
chip_gen: v5e
topology: v5e:2x2
jax: 0.10.0
libtpu: 0.0.40
codegen_flags: <defaults>
</compile_context>

<pallas_src>
import math

import jax
import jax.numpy as jnp
import numpy as np
from jax.experimental import pallas as pl
from jax.experimental.pallas import tpu as pltpu

_LANES = 128


def _pick_h_tile(h_out, w_out, max_acc_elems=256):
    """Largest divisor of h_out keeping the f32 accumulator ~<= 32 vregs
    (h_tile * w_out * 128 f32 = h_tile*w_out/8 vregs); prefer >= 2 row blocks
    so the output-writeback pipeline has steps to overlap."""
    best = 1
    for d in range(1, h_out + 1):
        if h_out % d == 0 and d * w_out <= max_acc_elems:
            best = d
    if best == h_out and h_out % 2 == 0 and (h_out // 2) * w_out <= max_acc_elems:
        best = h_out // 2
    return best


def _make_mdconv_kernel(kmax, h_tile, w_out, stride, dilate, h, w, pad):
    def kernel(x_ref, w_ref, o_ref, xpad_ref):
        # x_ref   : (h, w, 128)       un-padded rows of one image for one
        #                             128-channel block; resident across the
        #                             whole H grid axis (index_map ignores hb).
        # w_ref   : (kmax*kmax, 128)  lane-dense depthwise tap table.
        # o_ref   : (h_tile, w_out, 128) one output row block (lane-dense).
        # xpad_ref: (hp, wp, 128)     VMEM scratch: spatially padded input,
        #                             filled once per (image, channel block).
        hb = pl.program_id(2)

        @pl.when(hb == 0)
        def _init_padded():
            if pad > 0:
                xpad_ref[...] = jnp.zeros_like(xpad_ref)
                xpad_ref[pl.ds(pad, h), pl.ds(pad, w), :] = x_ref[...]
            else:
                xpad_ref[...] = x_ref[...]

        cb = o_ref.shape[-1]
        row0 = pl.multiple_of(hb * (h_tile * stride), h_tile * stride)

        # One weight load per kernel invocation (not per tap).
        w_all = w_ref[...].astype(jnp.float32)            # (k2, 128)

        acc = jnp.zeros((h_tile, w_out, cb), jnp.float32)
        if stride == 1:
            # One row-window load + one f32 cast per kh; kw shifts are static
            # slices of the already-loaded value.
            for kh in range(kmax):
                xrows = xpad_ref[pl.ds(row0 + kh * dilate, h_tile), :, :]
                xrows = xrows.astype(jnp.float32)          # (h_tile, Wp, 128)
                for kw in range(kmax):
                    patch = xrows[:, kw * dilate: kw * dilate + w_out, :]
                    acc = acc + patch * w_all[kh * kmax + kw]
        else:
            # stride == 2 fallback: per-tap strided reads from the padded
            # VMEM scratch.
            # TODO(synk): lane-friendlier stride-2 path (parity de-interleave
            # of W in the wrapper so all in-kernel reads are contiguous).
            for kh in range(kmax):
                for kw in range(kmax):
                    patch = xpad_ref[
                        pl.ds(row0 + kh * dilate, h_tile, stride=stride),
                        pl.ds(kw * dilate, w_out, stride=stride), :]
                    acc = acc + patch.astype(jnp.float32) * w_all[kh * kmax + kw]

        o_ref[...] = acc.astype(o_ref.dtype)

    return kernel


def mdconv_pallas(x, weights, kernel_sizes, stride=1, dilate=1):
    """MixNet MDConv forward (mixed depthwise conv), NHWC layout.

    x:       (N, H, W, C) channels-last (lane-dense on TPU).
    weights: list of per-group depthwise weights in PyTorch layout
             (sub, 1, k, k), one per kernel size; sub = C // len(kernel_sizes).
    Returns: (N, Ho, Wo, C).
    """
    assert stride in (1, 2)
    dilate = 1 if stride > 1 else dilate
    n, h, w, c = x.shape
    num_groups = len(kernel_sizes)
    assert c % num_groups == 0
    # Centering small kernels inside kmax is only exact for odd kernel sizes
    # (which is all MixNet uses).
    assert all(k % 2 == 1 for k in kernel_sizes), "kernel sizes must be odd"
    sub = c // num_groups
    kmax = max(kernel_sizes)
    pad = (kmax - 1) // 2 * dilate
    eff_k = (kmax - 1) * dilate + 1

    hp, wp = h + 2 * pad, w + 2 * pad
    h_out = (hp - eff_k) // stride + 1
    w_out = (wp - eff_k) // stride + 1
    assert h_out > 0 and w_out > 0

    # Lane-dense channel dim (multiple of 128), blocked at 128 on the grid.
    c_pad = ((c + _LANES - 1) // _LANES) * _LANES
    c_blocks = c_pad // _LANES

    # ---- weights: one lane-dense (kmax*kmax, C_pad) tap table --------------
    w_full = jnp.zeros((kmax, kmax, c), jnp.float32)
    for g, (k, wg) in enumerate(zip(kernel_sizes, weights)):
        off = (kmax - k) // 2
        w_full = w_full.at[off:off + k, off:off + k, g * sub:(g + 1) * sub].set(
            jnp.transpose(wg[:, 0].astype(jnp.float32), (1, 2, 0)))
    w_taps = w_full.reshape(kmax * kmax, c)
    if c_pad != c:
        w_taps = jnp.pad(w_taps, ((0, 0), (0, c_pad - c)))

    # ---- input: NO spatial pre-pad in HBM (halo is built in VMEM inside the
    # kernel).  Only the channel lane pad (when C % 128 != 0) touches HBM.
    x_lp = x if c_pad == c else jnp.pad(
        x, ((0, 0), (0, 0), (0, 0), (0, c_pad - c)))

    h_tile = _pick_h_tile(h_out, w_out)
    h_blocks = h_out // h_tile

    kernel = _make_mdconv_kernel(kmax, h_tile, w_out, stride, dilate, h, w, pad)

    # Advisory cost + VMEM sizing (v7x: 64 MiB physical / 32 MiB scoped).
    bytes_el = jnp.dtype(x.dtype).itemsize
    in_block = h * w * _LANES * bytes_el
    out_block = h_tile * w_out * _LANES * bytes_el
    w_block = kmax * kmax * _LANES * 4
    scratch_block = hp * wp * _LANES * bytes_el
    vmem_need = 2 * (in_block + out_block + w_block) + scratch_block + (1 << 20)
    cp_kwargs = dict(dimension_semantics=("parallel", "parallel", "arbitrary"))
    if vmem_need > (32 << 20):
        # TODO(synk): very large feature maps also want an H-halo-tiled input
        # (manual DMA); full-H-resident channel blocks are fine for MixNet.
        cp_kwargs["vmem_limit_bytes"] = int(min(vmem_need + (4 << 20), 56 << 20))

    cost = pl.CostEstimate(
        flops=int(2 * n * h_out * w_out * c_pad * kmax * kmax),
        transcendentals=0,
        bytes_accessed=int(x_lp.size * bytes_el
                           + n * h_out * w_out * c_pad * bytes_el
                           + w_taps.size * 4),
    )

    out = pl.pallas_call(
        kernel,
        out_shape=jax.ShapeDtypeStruct((n, h_out, w_out, c_pad), x.dtype),
        grid_spec=pltpu.PrefetchScalarGridSpec(
            num_scalar_prefetch=0,
            grid=(n, c_blocks, h_blocks),
            in_specs=[
                # Full (un-padded) rows for this (image, channel-block); the
                # index map ignores the H grid axis so the block stays
                # resident across all H steps.
                pl.BlockSpec((None, h, w, _LANES),
                             lambda ni, ci, hi: (ni, 0, 0, ci)),
                pl.BlockSpec((kmax * kmax, _LANES),
                             lambda ni, ci, hi: (0, ci)),
            ],
            out_specs=pl.BlockSpec((None, h_tile, w_out, _LANES),
                                   lambda ni, ci, hi: (ni, hi, 0, ci)),
            scratch_shapes=[pltpu.VMEM((hp, wp, _LANES), x.dtype)],
        ),
        compiler_params=pltpu.CompilerParams(**cp_kwargs),
        cost_estimate=cost,
    )(x_lp, w_taps)

    return out if c_pad == c else out[..., :c]


def mdconv_pallas_nchw(x_nchw, weights, kernel_sizes, stride=1, dilate=1):
    """PyTorch-layout adapter (NOT the hot path; prefer NHWC end-to-end)."""
    x = jnp.transpose(x_nchw, (0, 2, 3, 1))
    out = mdconv_pallas(x, weights, kernel_sizes, stride=stride, dilate=dilate)
    return jnp.transpose(out, (0, 3, 1, 2))


def mdconv_reference(x_nhwc, weights, kernel_sizes, stride=1, dilate=1):
    """Pure-JAX reference mirroring PyTorch MDConv (chunk -> depthwise -> cat),
    NHWC layout, full-precision."""
    dilate = 1 if stride > 1 else dilate
    c = x_nhwc.shape[-1]
    num_groups = len(kernel_sizes)
    sub = c // num_groups
    outs = []
    for g, (k, wg) in enumerate(zip(kernel_sizes, weights)):
        xg = x_nhwc[..., g * sub:(g + 1) * sub]
        p = (k - 1) // 2 * dilate
        rhs = jnp.transpose(wg[:, 0], (1, 2, 0))[:, :, None, :]   # (k,k,1,sub)
        outs.append(jax.lax.conv_general_dilated(
            xg, rhs,
            window_strides=(stride, stride),
            padding=[(p, p), (p, p)],
            rhs_dilation=(dilate, dilate),
            feature_group_count=sub,
            dimension_numbers=("NHWC", "HWIO", "NHWC"),
            precision=jax.lax.Precision.HIGHEST))
    return jnp.concatenate(outs, axis=-1)


def _run_case(name, key, n, c, hw, kernel_sizes, stride, dilate):
    num_groups = len(kernel_sizes)
    assert c % num_groups == 0
    sub = c // num_groups
    kx, *kws = jax.random.split(key, 1 + num_groups)
    x = jax.random.normal(kx, (n, hw, hw, c), jnp.float32)
    weights = []
    for kk, ksz in zip(kws, kernel_sizes):
        bound = 1.0 / math.sqrt(ksz * ksz)  # depthwise fan_in = k*k
        weights.append(jax.random.uniform(
            kk, (sub, 1, ksz, ksz), jnp.float32, -bound, bound))

    out = mdconv_pallas(x, weights, kernel_sizes, stride=stride, dilate=dilate)
    out = jax.block_until_ready(out)

    ref = mdconv_reference(x, weights, kernel_sizes, stride=stride,
                           dilate=dilate)
    assert out.shape == ref.shape, (name, out.shape, ref.shape)
    np.testing.assert_allclose(np.asarray(out), np.asarray(ref),
                               rtol=1e-5, atol=1e-5, err_msg=name)


if __name__ == "__main__":
    key = jax.random.PRNGKey(0)
    k1, k2, k3 = jax.random.split(key, 3)

    # MDConv(in_planes=8, kernel_sizes=[3, 5], stride=1): canonical small case.
    _run_case("c8_k35", k1, n=2, c=8, hw=16,
              kernel_sizes=[3, 5], stride=1, dilate=1)

    # Wider case: exercises the 128-lane channel grid axis (C=192 -> 2 blocks
    # with channel lane-pad), kmax=7, dilation, non-multiple-of-8 spatial.
    _run_case("c192_k357", k2, n=1, c=192, hw=13,
              kernel_sizes=[3, 5, 7], stride=1, dilate=2)

    # Multi-H-block case: C multiple of 128 (no HBM pad at all), kmax=9,
    # h_blocks > 1 so the resident input / persistent padded scratch path
    # across the "arbitrary" H axis is exercised.
    _run_case("c256_k3579", k3, n=1, c=256, hw=32,
              kernel_sizes=[3, 5, 7, 9], stride=1, dilate=1)

    print("KERNEL_OK")
</pallas_src>

<mosaic_0001>
module attributes {stable_mosaic.version = 11 : i64} {
  func.func @kernel(%arg0: i32, %arg1: i32, %arg2: i32, %arg3: memref<1x16x16x128xf32, #tpu.memory_space<vmem>>, %arg4: memref<25x128xf32, #tpu.memory_space<vmem>>, %arg5: memref<1x8x16x128xf32, #tpu.memory_space<vmem>>, %arg6: memref<20x20x128xf32, #tpu.memory_space<vmem>>) attributes {dimension_semantics = [#tpu.dimension_semantics<parallel>, #tpu.dimension_semantics<parallel>, #tpu.dimension_semantics<arbitrary>], iteration_bounds = array<i64: 2, 1, 2>, scalar_prefetch = 0 : i64, scratch_operands = 1 : i64, tpu.core_type = #tpu.core_type<tc>, window_params = [{transform_indices = @transform_0, window_bounds = array<i64: 1, 16, 16, 128>}, {transform_indices = @transform_1, window_bounds = array<i64: 25, 128>}, {transform_indices = @transform_2, window_bounds = array<i64: 1, 8, 16, 128>}]} {
    %c0_i32 = arith.constant 0 : i32
    %0 = arith.cmpi eq, %arg2, %c0_i32 : i32
    %1 = arith.extui %0 : i1 to i32
    %c0_i32_0 = arith.constant 0 : i32
    %2 = arith.cmpi ne, %1, %c0_i32_0 : i32
    scf.if %2 {
      %cst_17 = arith.constant 0.000000e+00 : f32
      %200 = vector.broadcast %cst_17 : f32 to vector<20x20x128xf32>
      %c0_18 = arith.constant 0 : index
      %c0_19 = arith.constant 0 : index
      %c0_20 = arith.constant 0 : index
      %201 = vector.load %arg6[%c0_18, %c0_19, %c0_20] : memref<20x20x128xf32, #tpu.memory_space<vmem>>, vector<20x20x128xf32>
      tpu.vector_store %arg6[%c0_18, %c0_19, %c0_20], %200 {strides = array<i32>} : memref<20x20x128xf32, #tpu.memory_space<vmem>>, vector<20x20x128xf32>,
      %c0_21 = arith.constant 0 : index
      %c0_22 = arith.constant 0 : index
      %c0_23 = arith.constant 0 : index
      %c0_24 = arith.constant 0 : index
      %202 = vector.load %arg3[%c0_21, %c0_22, %c0_23, %c0_24] : memref<1x16x16x128xf32, #tpu.memory_space<vmem>>, vector<1x16x16x128xf32>
      %203 = vector.shape_cast %202 : vector<1x16x16x128xf32> to vector<16x16x128xf32>
      %c2 = arith.constant 2 : index
      %c2_25 = arith.constant 2 : index
      %c0_26 = arith.constant 0 : index
      %204 = vector.load %arg6[%c2, %c2_25, %c0_26] : memref<20x20x128xf32, #tpu.memory_space<vmem>>, vector<16x16x128xf32>
      tpu.vector_store %arg6[%c2, %c2_25, %c0_26], %203 {strides = array<i32>} : memref<20x20x128xf32, #tpu.memory_space<vmem>>, vector<16x16x128xf32>,
    } else {
    }
    %c8_i32 = arith.constant 8 : i32
    %3 = arith.muli %arg2, %c8_i32 : i32
    %4 = tpu.assume_multiple %3, 8 : i32
    %c0 = arith.constant 0 : index
    %c0_1 = arith.constant 0 : index
    %5 = vector.load %arg4[%c0, %c0_1] : memref<25x128xf32, #tpu.memory_space<vmem>>, vector<25x128xf32>
    %cst = arith.constant 0.000000e+00 : f32
    %6 = vector.broadcast %cst : f32 to vector<8x16x128xf32>
    %c0_i32_2 = arith.constant 0 : i32
    %7 = arith.addi %4, %c0_i32_2 : i32
    %8 = arith.index_cast %7 : i32 to index
    %c0_3 = arith.constant 0 : index
    %c0_4 = arith.constant 0 : index
    %9 = vector.load %arg6[%8, %c0_3, %c0_4] : memref<20x20x128xf32, #tpu.memory_space<vmem>>, vector<8x20x128xf32>
    %10 = vector.extract_strided_slice %9 {offsets = [0, 0, 0], sizes = [8, 16, 128], strides = [1, 1, 1]} : vector<8x20x128xf32> to vector<8x16x128xf32>
    %11 = vector.extract_strided_slice %5 {offsets = [0, 0], sizes = [1, 128], strides = [1, 1]} : vector<25x128xf32> to vector<1x128xf32>
    %12 = vector.shape_cast %11 : vector<1x128xf32> to vector<128xf32>
    %13 = vector.shape_cast %12 : vector<128xf32> to vector<1x1x128xf32>
    %14 = vector.broadcast %13 : vector<1x1x128xf32> to vector<8x16x128xf32>
    %15 = arith.mulf %10, %14 : vector<8x16x128xf32>
    %16 = arith.addf %6, %15 : vector<8x16x128xf32>
    %17 = vector.extract_strided_slice %9 {offsets = [0, 1, 0], sizes = [8, 16, 128], strides = [1, 1, 1]} : vector<8x20x128xf32> to vector<8x16x128xf32>
    %18 = vector.extract_strided_slice %5 {offsets = [1, 0], sizes = [1, 128], strides = [1, 1]} : vector<25x128xf32> to vector<1x128xf32>
    %19 = vector.shape_cast %18 : vector<1x128xf32> to vector<128xf32>
    %20 = vector.shape_cast %19 : vector<128xf32> to vector<1x1x128xf32>
    %21 = vector.broadcast %20 : vector<1x1x128xf32> to vector<8x16x128xf32>
    %22 = arith.mulf %17, %21 : vector<8x16x128xf32>
    %23 = arith.addf %16, %22 : vector<8x16x128xf32>
    %24 = vector.extract_strided_slice %9 {offsets = [0, 2, 0], sizes = [8, 16, 128], strides = [1, 1, 1]} : vector<8x20x128xf32> to vector<8x16x128xf32>
    %25 = vector.extract_strided_slice %5 {offsets = [2, 0], sizes = [1, 128], strides = [1, 1]} : vector<25x128xf32> to vector<1x128xf32>
    %26 = vector.shape_cast %25 : vector<1x128xf32> to vector<128xf32>
    %27 = vector.shape_cast %26 : vector<128xf32> to vector<1x1x128xf32>
    %28 = vector.broadcast %27 : vector<1x1x128xf32> to vector<8x16x128xf32>
    %29 = arith.mulf %24, %28 : vector<8x16x128xf32>
    %30 = arith.addf %23, %29 : vector<8x16x128xf32>
    %31 = vector.extract_strided_slice %9 {offsets = [0, 3, 0], sizes = [8, 16, 128], strides = [1, 1, 1]} : vector<8x20x128xf32> to vector<8x16x128xf32>
    %32 = vector.extract_strided_slice %5 {offsets = [3, 0], sizes = [1, 128], strides = [1, 1]} : vector<25x128xf32> to vector<1x128xf32>
    %33 = vector.shape_cast %32 : vector<1x128xf32> to vector<128xf32>
    %34 = vector.shape_cast %33 : vector<128xf32> to vector<1x1x128xf32>
    %35 = vector.broadcast %34 : vector<1x1x128xf32> to vector<8x16x128xf32>
    %36 = arith.mulf %31, %35 : vector<8x16x128xf32>
    %37 = arith.addf %30, %36 : vector<8x16x128xf32>
    %38 = vector.extract_strided_slice %9 {offsets = [0, 4, 0], sizes = [8, 16, 128], strides = [1, 1, 1]} : vector<8x20x128xf32> to vector<8x16x128xf32>
    %39 = vector.extract_strided_slice %5 {offsets = [4, 0], sizes = [1, 128], strides = [1, 1]} : vector<25x128xf32> to vector<1x128xf32>
    %40 = vector.shape_cast %39 : vector<1x128xf32> to vector<128xf32>
    %41 = vector.shape_cast %40 : vector<128xf32> to vector<1x1x128xf32>
    %42 = vector.broadcast %41 : vector<1x1x128xf32> to vector<8x16x128xf32>
    %43 = arith.mulf %38, %42 : vector<8x16x128xf32>
    %44 = arith.addf %37, %43 : vector<8x16x128xf32>
    %c1_i32 = arith.constant 1 : i32
    %45 = arith.addi %4, %c1_i32 : i32
    %46 = arith.index_cast %45 : i32 to index
    %c0_5 = arith.constant 0 : index
    %c0_6 = arith.constant 0 : index
    %47 = vector.load %arg6[%46, %c0_5, %c0_6] : memref<20x20x128xf32, #tpu.memory_space<vmem>>, vector<8x20x128xf32>
    %48 = vector.extract_strided_slice %47 {offsets = [0, 0, 0], sizes = [8, 16, 128], strides = [1, 1, 1]} : vector<8x20x128xf32> to vector<8x16x128xf32>
    %49 = vector.extract_strided_slice %5 {offsets = [5, 0], sizes = [1, 128], strides = [1, 1]} : vector<25x128xf32> to vector<1x128xf32>
    %50 = vector.shape_cast %49 : vector<1x128xf32> to vector<128xf32>
    %51 = vector.shape_cast %50 : vector<128xf32> to vector<1x1x128xf32>
    %52 = vector.broadcast %51 : vector<1x1x128xf32> to vector<8x16x128xf32>
    %53 = arith.mulf %48, %52 : vector<8x16x128xf32>
    %54 = arith.addf %44, %53 : vector<8x16x128xf32>
    %55 = vector.extract_strided_slice %47 {offsets = [0, 1, 0], sizes = [8, 16, 128], strides = [1, 1, 1]} : vector<8x20x128xf32> to vector<8x16x128xf32>
    %56 = vector.extract_strided_slice %5 {offsets = [6, 0], sizes = [1, 128], strides = [1, 1]} : vector<25x128xf32> to vector<1x128xf32>
    %57 = vector.shape_cast %56 : vector<1x128xf32> to vector<128xf32>
    %58 = vector.shape_cast %57 : vector<128xf32> to vector<1x1x128xf32>
    %59 = vector.broadcast %58 : vector<1x1x128xf32> to vector<8x16x128xf32>
    %60 = arith.mulf %55, %59 : vector<8x16x128xf32>
    %61 = arith.addf %54, %60 : vector<8x16x128xf32>
    %62 = vector.extract_strided_slice %47 {offsets = [0, 2, 0], sizes = [8, 16, 128], strides = [1, 1, 1]} : vector<8x20x128xf32> to vector<8x16x128xf32>
    %63 = vector.extract_strided_slice %5 {offsets = [7, 0], sizes = [1, 128], strides = [1, 1]} : vector<25x128xf32> to vector<1x128xf32>
    %64 = vector.shape_cast %63 : vector<1x128xf32> to vector<128xf32>
    %65 = vector.shape_cast %64 : vector<128xf32> to vector<1x1x128xf32>
    %66 = vector.broadcast %65 : vector<1x1x128xf32> to vector<8x16x128xf32>
    %67 = arith.mulf %62, %66 : vector<8x16x128xf32>
    %68 = arith.addf %61, %67 : vector<8x16x128xf32>
    %69 = vector.extract_strided_slice %47 {offsets = [0, 3, 0], sizes = [8, 16, 128], strides = [1, 1, 1]} : vector<8x20x128xf32> to vector<8x16x128xf32>
    %70 = vector.extract_strided_slice %5 {offsets = [8, 0], sizes = [1, 128], strides = [1, 1]} : vector<25x128xf32> to vector<1x128xf32>
    %71 = vector.shape_cast %70 : vector<1x128xf32> to vector<128xf32>
    %72 = vector.shape_cast %71 : vector<128xf32> to vector<1x1x128xf32>
    %73 = vector.broadcast %72 : vector<1x1x128xf32> to vector<8x16x128xf32>
    %74 = arith.mulf %69, %73 : vector<8x16x128xf32>
    %75 = arith.addf %68, %74 : vector<8x16x128xf32>
    %76 = vector.extract_strided_slice %47 {offsets = [0, 4, 0], sizes = [8, 16, 128], strides = [1, 1, 1]} : vector<8x20x128xf32> to vector<8x16x128xf32>
    %77 = vector.extract_strided_slice %5 {offsets = [9, 0], sizes = [1, 128], strides = [1, 1]} : vector<25x128xf32> to vector<1x128xf32>
    %78 = vector.shape_cast %77 : vector<1x128xf32> to vector<128xf32>
    %79 = vector.shape_cast %78 : vector<128xf32> to vector<1x1x128xf32>
    %80 = vector.broadcast %79 : vector<1x1x128xf32> to vector<8x16x128xf32>
    %81 = arith.mulf %76, %80 : vector<8x16x128xf32>
    %82 = arith.addf %75, %81 : vector<8x16x128xf32>
    %c2_i32 = arith.constant 2 : i32
    %83 = arith.addi %4, %c2_i32 : i32
    %84 = arith.index_cast %83 : i32 to index
    %c0_7 = arith.constant 0 : index
    %c0_8 = arith.constant 0 : index
    %85 = vector.load %arg6[%84, %c0_7, %c0_8] : memref<20x20x128xf32, #tpu.memory_space<vmem>>, vector<8x20x128xf32>
    %86 = vector.extract_strided_slice %85 {offsets = [0, 0, 0], sizes = [8, 16, 128], strides = [1, 1, 1]} : vector<8x20x128xf32> to vector<8x16x128xf32>
    %87 = vector.extract_strided_slice %5 {offsets = [10, 0], sizes = [1, 128], strides = [1, 1]} : vector<25x128xf32> to vector<1x128xf32>
    %88 = vector.shape_cast %87 : vector<1x128xf32> to vector<128xf32>
    %89 = vector.shape_cast %88 : vector<128xf32> to vector<1x1x128xf32>
    %90 = vector.broadcast %89 : vector<1x1x128xf32> to vector<8x16x128xf32>
    %91 = arith.mulf %86, %90 : vector<8x16x128xf32>
    %92 = arith.addf %82, %91 : vector<8x16x128xf32>
    %93 = vector.extract_strided_slice %85 {offsets = [0, 1, 0], sizes = [8, 16, 128], strides = [1, 1, 1]} : vector<8x20x128xf32> to vector<8x16x128xf32>
    %94 = vector.extract_strided_slice %5 {offsets = [11, 0], sizes = [1, 128], strides = [1, 1]} : vector<25x128xf32> to vector<1x128xf32>
    %95 = vector.shape_cast %94 : vector<1x128xf32> to vector<128xf32>
    %96 = vector.shape_cast %95 : vector<128xf32> to vector<1x1x128xf32>
    %97 = vector.broadcast %96 : vector<1x1x128xf32> to vector<8x16x128xf32>
    %98 = arith.mulf %93, %97 : vector<8x16x128xf32>
    %99 = arith.addf %92, %98 : vector<8x16x128xf32>
    %100 = vector.extract_strided_slice %85 {offsets = [0, 2, 0], sizes = [8, 16, 128], strides = [1, 1, 1]} : vector<8x20x128xf32> to vector<8x16x128xf32>
    %101 = vector.extract_strided_slice %5 {offsets = [12, 0], sizes = [1, 128], strides = [1, 1]} : vector<25x128xf32> to vector<1x128xf32>
    %102 = vector.shape_cast %101 : vector<1x128xf32> to vector<128xf32>
    %103 = vector.shape_cast %102 : vector<128xf32> to vector<1x1x128xf32>
    %104 = vector.broadcast %103 : vector<1x1x128xf32> to vector<8x16x128xf32>
    %105 = arith.mulf %100, %104 : vector<8x16x128xf32>
    %106 = arith.addf %99, %105 : vector<8x16x128xf32>
    %107 = vector.extract_strided_slice %85 {offsets = [0, 3, 0], sizes = [8, 16, 128], strides = [1, 1, 1]} : vector<8x20x128xf32> to vector<8x16x128xf32>
    %108 = vector.extract_strided_slice %5 {offsets = [13, 0], sizes = [1, 128], strides = [1, 1]} : vector<25x128xf32> to vector<1x128xf32>
    %109 = vector.shape_cast %108 : vector<1x128xf32> to vector<128xf32>
    %110 = vector.shape_cast %109 : vector<128xf32> to vector<1x1x128xf32>
    %111 = vector.broadcast %110 : vector<1x1x128xf32> to vector<8x16x128xf32>
    %112 = arith.mulf %107, %111 : vector<8x16x128xf32>
    %113 = arith.addf %106, %112 : vector<8x16x128xf32>
    %114 = vector.extract_strided_slice %85 {offsets = [0, 4, 0], sizes = [8, 16, 128], strides = [1, 1, 1]} : vector<8x20x128xf32> to vector<8x16x128xf32>
    %115 = vector.extract_strided_slice %5 {offsets = [14, 0], sizes = [1, 128], strides = [1, 1]} : vector<25x128xf32> to vector<1x128xf32>
    %116 = vector.shape_cast %115 : vector<1x128xf32> to vector<128xf32>
    %117 = vector.shape_cast %116 : vector<128xf32> to vector<1x1x128xf32>
    %118 = vector.broadcast %117 : vector<1x1x128xf32> to vector<8x16x128xf32>
    %119 = arith.mulf %114, %118 : vector<8x16x128xf32>
    %120 = arith.addf %113, %119 : vector<8x16x128xf32>
    %c3_i32 = arith.constant 3 : i32
    %121 = arith.addi %4, %c3_i32 : i32
    %122 = arith.index_cast %121 : i32 to index
    %c0_9 = arith.constant 0 : index
    %c0_10 = arith.constant 0 : index
    %123 = vector.load %arg6[%122, %c0_9, %c0_10] : memref<20x20x128xf32, #tpu.memory_space<vmem>>, vector<8x20x128xf32>
    %124 = vector.extract_strided_slice %123 {offsets = [0, 0, 0], sizes = [8, 16, 128], strides = [1, 1, 1]} : vector<8x20x128xf32> to vector<8x16x128xf32>
    %125 = vector.extract_strided_slice %5 {offsets = [15, 0], sizes = [1, 128], strides = [1, 1]} : vector<25x128xf32> to vector<1x128xf32>
    %126 = vector.shape_cast %125 : vector<1x128xf32> to vector<128xf32>
    %127 = vector.shape_cast %126 : vector<128xf32> to vector<1x1x128xf32>
    %128 = vector.broadcast %127 : vector<1x1x128xf32> to vector<8x16x128xf32>
    %129 = arith.mulf %124, %128 : vector<8x16x128xf32>
    %130 = arith.addf %120, %129 : vector<8x16x128xf32>
    %131 = vector.extract_strided_slice %123 {offsets = [0, 1, 0], sizes = [8, 16, 128], strides = [1, 1, 1]} : vector<8x20x128xf32> to vector<8x16x128xf32>
    %132 = vector.extract_strided_slice %5 {offsets = [16, 0], sizes = [1, 128], strides = [1, 1]} : vector<25x128xf32> to vector<1x128xf32>
    %133 = vector.shape_cast %132 : vector<1x128xf32> to vector<128xf32>
    %134 = vector.shape_cast %133 : vector<128xf32> to vector<1x1x128xf32>
    %135 = vector.broadcast %134 : vector<1x1x128xf32> to vector<8x16x128xf32>
    %136 = arith.mulf %131, %135 : vector<8x16x128xf32>
    %137 = arith.addf %130, %136 : vector<8x16x128xf32>
    %138 = vector.extract_strided_slice %123 {offsets = [0, 2, 0], sizes = [8, 16, 128], strides = [1, 1, 1]} : vector<8x20x128xf32> to vector<8x16x128xf32>
    %139 = vector.extract_strided_slice %5 {offsets = [17, 0], sizes = [1, 128], strides = [1, 1]} : vector<25x128xf32> to vector<1x128xf32>
    %140 = vector.shape_cast %139 : vector<1x128xf32> to vector<128xf32>
    %141 = vector.shape_cast %140 : vector<128xf32> to vector<1x1x128xf32>
    %142 = vector.broadcast %141 : vector<1x1x128xf32> to vector<8x16x128xf32>
    %143 = arith.mulf %138, %142 : vector<8x16x128xf32>
    %144 = arith.addf %137, %143 : vector<8x16x128xf32>
    %145 = vector.extract_strided_slice %123 {offsets = [0, 3, 0], sizes = [8, 16, 128], strides = [1, 1, 1]} : vector<8x20x128xf32> to vector<8x16x128xf32>
    %146 = vector.extract_strided_slice %5 {offsets = [18, 0], sizes = [1, 128], strides = [1, 1]} : vector<25x128xf32> to vector<1x128xf32>
    %147 = vector.shape_cast %146 : vector<1x128xf32> to vector<128xf32>
    %148 = vector.shape_cast %147 : vector<128xf32> to vector<1x1x128xf32>
    %149 = vector.broadcast %148 : vector<1x1x128xf32> to vector<8x16x128xf32>
    %150 = arith.mulf %145, %149 : vector<8x16x128xf32>
    %151 = arith.addf %144, %150 : vector<8x16x128xf32>
    %152 = vector.extract_strided_slice %123 {offsets = [0, 4, 0], sizes = [8, 16, 128], strides = [1, 1, 1]} : vector<8x20x128xf32> to vector<8x16x128xf32>
    %153 = vector.extract_strided_slice %5 {offsets = [19, 0], sizes = [1, 128], strides = [1, 1]} : vector<25x128xf32> to vector<1x128xf32>
    %154 = vector.shape_cast %153 : vector<1x128xf32> to vector<128xf32>
    %155 = vector.shape_cast %154 : vector<128xf32> to vector<1x1x128xf32>
    %156 = vector.broadcast %155 : vector<1x1x128xf32> to vector<8x16x128xf32>
    %157 = arith.mulf %152, %156 : vector<8x16x128xf32>
    %158 = arith.addf %151, %157 : vector<8x16x128xf32>
    %c4_i32 = arith.constant 4 : i32
    %159 = arith.addi %4, %c4_i32 : i32
    %160 = arith.index_cast %159 : i32 to index
    %c0_11 = arith.constant 0 : index
    %c0_12 = arith.constant 0 : index
    %161 = vector.load %arg6[%160, %c0_11, %c0_12] : memref<20x20x128xf32, #tpu.memory_space<vmem>>, vector<8x20x128xf32>
    %162 = vector.extract_strided_slice %161 {offsets = [0, 0, 0], sizes = [8, 16, 128], strides = [1, 1, 1]} : vector<8x20x128xf32> to vector<8x16x128xf32>
    %163 = vector.extract_strided_slice %5 {offsets = [20, 0], sizes = [1, 128], strides = [1, 1]} : vector<25x128xf32> to vector<1x128xf32>
    %164 = vector.shape_cast %163 : vector<1x128xf32> to vector<128xf32>
    %165 = vector.shape_cast %164 : vector<128xf32> to vector<1x1x128xf32>
    %166 = vector.broadcast %165 : vector<1x1x128xf32> to vector<8x16x128xf32>
    %167 = arith.mulf %162, %166 : vector<8x16x128xf32>
    %168 = arith.addf %158, %167 : vector<8x16x128xf32>
    %169 = vector.extract_strided_slice %161 {offsets = [0, 1, 0], sizes = [8, 16, 128], strides = [1, 1, 1]} : vector<8x20x128xf32> to vector<8x16x128xf32>
    %170 = vector.extract_strided_slice %5 {offsets = [21, 0], sizes = [1, 128], strides = [1, 1]} : vector<25x128xf32> to vector<1x128xf32>
    %171 = vector.shape_cast %170 : vector<1x128xf32> to vector<128xf32>
    %172 = vector.shape_cast %171 : vector<128xf32> to vector<1x1x128xf32>
    %173 = vector.broadcast %172 : vector<1x1x128xf32> to vector<8x16x128xf32>
    %174 = arith.mulf %169, %173 : vector<8x16x128xf32>
    %175 = arith.addf %168, %174 : vector<8x16x128xf32>
    %176 = vector.extract_strided_slice %161 {offsets = [0, 2, 0], sizes = [8, 16, 128], strides = [1, 1, 1]} : vector<8x20x128xf32> to vector<8x16x128xf32>
    %177 = vector.extract_strided_slice %5 {offsets = [22, 0], sizes = [1, 128], strides = [1, 1]} : vector<25x128xf32> to vector<1x128xf32>
    %178 = vector.shape_cast %177 : vector<1x128xf32> to vector<128xf32>
    %179 = vector.shape_cast %178 : vector<128xf32> to vector<1x1x128xf32>
    %180 = vector.broadcast %179 : vector<1x1x128xf32> to vector<8x16x128xf32>
    %181 = arith.mulf %176, %180 : vector<8x16x128xf32>
    %182 = arith.addf %175, %181 : vector<8x16x128xf32>
    %183 = vector.extract_strided_slice %161 {offsets = [0, 3, 0], sizes = [8, 16, 128], strides = [1, 1, 1]} : vector<8x20x128xf32> to vector<8x16x128xf32>
    %184 = vector.extract_strided_slice %5 {offsets = [23, 0], sizes = [1, 128], strides = [1, 1]} : vector<25x128xf32> to vector<1x128xf32>
    %185 = vector.shape_cast %184 : vector<1x128xf32> to vector<128xf32>
    %186 = vector.shape_cast %185 : vector<128xf32> to vector<1x1x128xf32>
    %187 = vector.broadcast %186 : vector<1x1x128xf32> to vector<8x16x128xf32>
    %188 = arith.mulf %183, %187 : vector<8x16x128xf32>
    %189 = arith.addf %182, %188 : vector<8x16x128xf32>
    %190 = vector.extract_strided_slice %161 {offsets = [0, 4, 0], sizes = [8, 16, 128], strides = [1, 1, 1]} : vector<8x20x128xf32> to vector<8x16x128xf32>
    %191 = vector.extract_strided_slice %5 {offsets = [24, 0], sizes = [1, 128], strides = [1, 1]} : vector<25x128xf32> to vector<1x128xf32>
    %192 = vector.shape_cast %191 : vector<1x128xf32> to vector<128xf32>
    %193 = vector.shape_cast %192 : vector<128xf32> to vector<1x1x128xf32>
    %194 = vector.broadcast %193 : vector<1x1x128xf32> to vector<8x16x128xf32>
    %195 = arith.mulf %190, %194 : vector<8x16x128xf32>
    %196 = arith.addf %189, %195 : vector<8x16x128xf32>
    %c0_13 = arith.constant 0 : index
    %c0_14 = arith.constant 0 : index
    %c0_15 = arith.constant 0 : index
    %c0_16 = arith.constant 0 : index
    %197 = vector.load %arg5[%c0_13, %c0_14, %c0_15, %c0_16] : memref<1x8x16x128xf32, #tpu.memory_space<vmem>>, vector<1x8x16x128xf32>
    %198 = vector.shape_cast %197 : vector<1x8x16x128xf32> to vector<8x16x128xf32>
    %199 = vector.shape_cast %196 : vector<8x16x128xf32> to vector<1x8x16x128xf32>
    tpu.vector_store %arg5[%c0_13, %c0_14, %c0_15, %c0_16], %199 {strides = array<i32>} : memref<1x8x16x128xf32, #tpu.memory_space<vmem>>, vector<1x8x16x128xf32>,
    return
  }
  func.func @transform_0(%arg0: i32, %arg1: i32, %arg2: i32) -> (i32, i32, i32, i32) {
    %c0_i32 = arith.constant 0 : i32
    %c0_i32_0 = arith.constant 0 : i32
    %c0_i32_1 = arith.constant 0 : i32
    return %arg0, %c0_i32, %c0_i32_0, %arg1 : i32, i32, i32, i32
  }
  func.func @transform_1(%arg0: i32, %arg1: i32, %arg2: i32) -> (i32, i32) {
    %c0_i32 = arith.constant 0 : i32
    %c0_i32_0 = arith.constant 0 : i32
    return %c0_i32, %arg1 : i32, i32
  }
  func.func @transform_2(%arg0: i32, %arg1: i32, %arg2: i32) -> (i32, i32, i32, i32) {
    %c0_i32 = arith.constant 0 : i32
    %c0_i32_0 = arith.constant 0 : i32
    return %arg0, %arg2, %c0_i32, %arg1 : i32, i32, i32, i32
  }
}

</mosaic_0001>

<bundles_post_ra>
// kernel: tpu_custom_call.1
= control target key start
LH: loop header
LB: loop body
LE: loop exit
PB: predicated region body
PF: predicated region fallthrough
CT: control target
= control target key end

     0   :  { %s6624_s0 = inlined_call_operand.hbm [shape: f32[2,16,16,128], index: 0, kind: input, shape index: {}]   ;;  %s6625_s1 = inlined_call_operand.hbm [shape: f32[25,128], index: 1, kind: input, shape index: {}]   ;;  %s6626_s2 = inlined_call_operand.hbm [shape: f32[2,16,16,128], index: 2, kind: output, shape index: {}]  }
   0x1   :  { %6851 = sst [smem:[#allocation47_spill]] %s6625_s1 }
   0x2   :  { %7 = vsyncpa [#allocation4], 0 }
   0x3   :  { %9 = vsyncpa [#allocation4 + $0x1], 0 }
   0x4   :  { %10 = vsyncpa [#allocation7], 0 }
   0x5   :  { %11 = vsyncpa [#allocation5], 0 }
   0x6   :  { %13 = vsyncpa [#allocation5 + $0x1], 0  ;;  %s3721_s9 = smov 0   ;;  %s3723_s10 = smov 0  }
   0x7   :  { %s3725_s11 = smov 0   ;;  %s3727_s12 = smov 0  }
   0x8   :  { %s3729_s13 = smov 0   ;;  %s3731_s14 = smov 0  }
   0x9   :  { %s3733_s15 = smov 0   ;;  %s3735_s16 = smov 0  }
   0xa   :  { %s3737_s17 = smov 0   ;;  %s3739_s18 = smov 0  }
   0xb   :  { %s3741_s19 = smov 0  }
   0xc LB: > { %6852 = sst [smem:[#allocation12_spill]] %s3658_s9  ;;  %s3231_s20 = sadd.s32 4294967295, %s3698_s19   ;;  %s3698_s19 = sphi %s3741_s19, %s19_s19   ;;  %s3694_s18 = sphi %s3739_s18, %s7277_s18   ;;  %s3690_s17 = sphi %s3737_s17, %s7268_s17   ;;  %s3686_s16 = sphi %s3735_s16, %s7276_s16   ;;  %s3682_s15 = sphi %s3733_s15, %s7267_s15   ;;  %s3678_s14 = sphi %s3731_s14, %s7275_s14   ;;  %s3674_s13 = sphi %s3729_s13, %s7274_s13   ;;  %s3670_s12 = sphi %s3727_s12, %s7273_s12   ;;  %s3666_s11 = sphi %s3725_s11, %s7272_s11   ;;  %s3662_s10 = sphi %s3723_s10, %s7271_s10   ;;  %s3658_s9 = sphi %s3721_s9, %s7270_s9  }
   0xd   : > { %6853 = sst [smem:[#allocation13_spill]] %s3690_s17  ;;  %s3232_s21 = sadd.s32 4294967294, %s3698_s19  }
   0xe   : > { %p60_p0 = scmp.ne.s32.totalorder %s3674_s13, %s3670_s12  ;;  %p3777_p1 = scmp.eq.s32.totalorder %s3231_s20, 0 }
   0xf   : > { %p113_p2 = scmp.ne.s32.totalorder %s3666_s11, %s3662_s10  ;;  %p114_p3 = scmp.eq.s32.totalorder %s3231_s20, 3 }
  0x10   : > { %p3785_p4 = por %p3777_p1, %p60_p0  ;;  %p119_p5 = scmp.ne.s32.totalorder %s3662_s10, %s3658_s9 }
  0x11   : > { %p3791_p6 = por %p114_p3, %p113_p2  ;;  %p120_p7 = scmp.eq.s32.totalorder %s3232_s21, 3 }
  0x12   : > { %p3233_p8 = scmp.ge.s32.totalorder %s3698_s19, 1  ;;  %p127_p9 = scmp.lt.s32.totalorder %s3698_s19, 5 }
  0x13   : > { %s6856_s24 = scalar_select %p3791_p6, 1, 0 }
  0x14   : > { %p3797_p10 = por %p120_p7, %p119_p5  ;;  %p3801_p11 = pnand %p3233_p8, %p127_p9 }
  0x15   : > { %6857 = sst [smem:[#allocation14_spill]] %s6856_s24  ;;  %s3700_s30 = smov [#allocation6]  }
  0x16   : > { %s6858_s25 = scalar_select %p3797_p10, 1, 0 }
  0x17   : > { %s6861_s1 = sld [smem:[#allocation47_spill]]  ;;  %p3367_p12 = pneg %p3801_p11 }
  0x18   : > { %6859 = sst [smem:[#allocation15_spill]] %s6858_s25  ;;  %s142_s3 = sshll.u32 %s3700_s30, 4  ;;  %s143_s3 = int_to_ptr.vmem [resolvable:$true] %s142_s3 }
  0x19   : > { %p3368_p13 = pnand %p3367_p12, %p3777_p1  ;;  %s6627_s4 = smov 128  }
  0x1a   : > { %s6628_s5 = smov 8   ;;  %s31_s6 = sadd.s32 1, %s3690_s17 }
  0x1b   : > { %s38_s7 = sadd.s32 1, %s3694_s18  ;;  %p32_p0 = scmp.ge.s32.totalorder %s31_s6, 2 }
  0x1c   : > { %s47_s8 = sadd.s32 1, %s3678_s14  ;;  %p54_p2 = scmp.ne.s32.totalorder %s3678_s14, %s3674_s13 }
  0x1d   : > { %s140_s29 = sshll.u32 %s6861_s1, 4  ;;  %p55_p3 = scmp.eq.s32.totalorder %s3698_s19, 0  ;;  %s141_s29 = int_to_ptr.hbm [resolvable:$true] %s140_s29 }
  0x1e   : > { %3370 = dma.hbm_to_vmem [thread:$0]  (!%p3368_p13), %s141_s29, 512, %s143_s3, [#allocation7], %s6627_s4, %s6627_s4, %s6628_s5  }
  0x1f   : > { %s7279_s6 = smov (%p32_p0, %s31_s6), 0  ;;  %s7281_s7 = smov (!%p32_p0, %s38_s7), %s3694_s18 }
  0x20   : > { %6862 = sst [smem:[#allocation16_spill]] %s7279_s6  ;;  %p3824_p5 = por %p55_p3, %p54_p2 }
  0x21   : > { %s97_s20 = ssub.s32 %s3690_s17, %s7279_s6  ;;  %p40_p7 = scmp.ge.s32.totalorder %s7281_s7, 2 }
  0x22   : > { %s103_s21 = sadd.s32 1, %s3666_s11  ;;  %p3380_p8 = scmp.lt.s32.totalorder %s3698_s19, 4 }
  0x23   : > { %s156_s27 = sand.u32 1, %s3678_s14   ;;  %s7283_s7 = smov (%p40_p7, %s7281_s7), 0 }
  0x24   : > { %6864 = sst [smem:[#allocation17_spill]] %s7283_s7  ;;  %s3236_s28 = sshll.u32 %s156_s27, 8 }
  0x25   : > { %s42_s29 = ssub.s32 %s3694_s18, %s7283_s7  ;;  %s3357_s3 = sshll.u32 %s3694_s18, 8 }
  0x26   : > { %p45_p9 = scmp.eq.s32.totalorder %s42_s29, 0  ;;  %s98_s30 = sor.u32 %s97_s20, %s42_s29 }
  0x27   : > { %p101_p12 = scmp.eq.s32.totalorder %s98_s30, 0  ;;  %s166_s17 = scalar_lea.hbm %s6624_s0, %s3357_s3 }
  0x28   : > { %s3839_s4 = scalar_select %p45_p9, %s3678_s14, %s47_s8  }
  0x29   : > { %s3842_s5 = scalar_select %p101_p12, %s3666_s11, %s103_s21  }
  0x2a   : > { %s160_s25 = scalar_lea.vmem [#allocation3], %s3236_s28  ;;  %s167_s24 = sshll.u32 %s166_s17, 4  ;;  %s168_s24 = int_to_ptr.hbm [resolvable:$true] %s167_s24 }
  0x2b   : > { %s169_s9 = sshll.u32 %s160_s25, 4  ;;  %p3372_p13 = pnand %p3380_p8, %p3824_p5  ;;  %s170_s9 = int_to_ptr.vmem [resolvable:$true] %s169_s9 }
  0x2c   : > { %s157_s7 = scalar_lea.sflag [#allocation4], %s156_s27  ;;  %s6865_s20 = smov 8  }
  0x2d   : > { %s6866_s29 = smov 128   ;;  %181 = sbr.rel (%p3801_p11) target bundleno = 617 (0x269), region = 28 }
  0x2e   : > { %3374 = dma.hbm_to_vmem [thread:$0]  (!%p3372_p13), %s168_s24, 4096, %s170_s9, %s157_s7, %s6866_s29, %s6866_s29, %s6865_s20  }
  0x32   : > { %s183_s1 = sand.u32 1, %s3674_s13  }
  0x33   : > { %s3240_s6 = sshll.u32 %s183_s1, 8  ;;  %s184_s8 = scalar_lea.sflag [#allocation4], %s183_s1 }
  0x34   : > { %s3857_s25 = scalar_lea.vmem [#allocation3], %s3240_s6 }
  0x35   : > { %3645 = dma.done.wait (%p3785_p4), %s184_s8, 4096  }
  0x36   : > { %3647 = vsyncadd (%p3785_p4), %s184_s8, 4294963200 }
  0x37   : > { %3649 = dma.done.wait (%p3777_p1), [#allocation7], 512  }
  0x38   : > { %3651 = vsyncadd (%p3777_p1), [#allocation7], 4294966784  ;;  %s211_s9 = sand.u32 1, %s3662_s10   ;;  %p3243_p11 = scmp.ne.s32.totalorder %s3682_s15, 0 }
  0x39   : > { %s3242_s17 = sshll.u32 %s211_s9, 7 }
  0x3a   : > { %s3870_s24 = scalar_lea.vmem [#allocation8], %s3242_s17  ;;  %218 = sbr.rel (%p3243_p11) target bundleno = 156 (0x9c), region = 40 }
  0x3f   : > { %v3703_v0 = vmov 0.0   ;;  %v279_v1 = vld [vmem:[%s3857_s25] sm:$0xff]  ;;  %v280_v2 = vld [vmem:[%s3857_s25 + $0x8] sm:$0xff]  ;;  %v281_v3 = vld [vmem:[%s3857_s25 + $0x10] sm:$0xff] }
  0x40   : > { %225 = vst [vmem:[#allocation2 + $0x30] sm:$0xff] %v3703_v0  ;;  %v282_v4 = vld [vmem:[%s3857_s25 + $0x18] sm:$0xff]  ;;  %v283_v5 = vld [vmem:[%s3857_s25 + $0x20] sm:$0xff]  ;;  %v284_v6 = vld [vmem:[%s3857_s25 + $0x28] sm:$0xff] }
  0x41   : > { %219 = vst [vmem:[#allocation2] sm:$0xff] %v3703_v0  ;;  %v285_v7 = vld [vmem:[%s3857_s25 + $0x30] sm:$0xff]  ;;  %v286_v8 = vld [vmem:[%s3857_s25 + $0x38] sm:$0xff]  ;;  %v287_v9 = vld [vmem:[%s3857_s25 + $0x40] sm:$0xff] }
  0x42   : > { %220 = vst [vmem:[#allocation2 + $0x8] sm:$0xff] %v3703_v0  ;;  %v288_v10 = vld [vmem:[%s3857_s25 + $0x48] sm:$0xff]  ;;  %v289_v11 = vld [vmem:[%s3857_s25 + $0x50] sm:$0xff]  ;;  %v290_v12 = vld [vmem:[%s3857_s25 + $0x58] sm:$0xff] }
  0x43   : > { %221 = vst [vmem:[#allocation2 + $0x10] sm:$0xf] %v3703_v0  ;;  %v291_v13 = vld [vmem:[%s3857_s25 + $0x60] sm:$0xff]  ;;  %v292_v14 = vld [vmem:[%s3857_s25 + $0x68] sm:$0xff]  ;;  %v293_v15 = vld [vmem:[%s3857_s25 + $0x70] sm:$0xff] }
  0x44   : > { %222 = vst [vmem:[#allocation2 + $0x18] sm:$0xff] %v3703_v0  ;;  %v294_v16 = vld [vmem:[%s3857_s25 + $0x78] sm:$0xff]  ;;  %v295_v17 = vld [vmem:[%s3857_s25 + $0x80] sm:$0xff]  ;;  %v296_v18 = vld [vmem:[%s3857_s25 + $0x88] sm:$0xff] }
  0x45   : > { %223 = vst [vmem:[#allocation2 + $0x20] sm:$0xff] %v3703_v0  ;;  %v297_v19 = vld [vmem:[%s3857_s25 + $0x90] sm:$0xff]  ;;  %v298_v20 = vld [vmem:[%s3857_s25 + $0x98] sm:$0xff]  ;;  %v299_v21 = vld [vmem:[%s3857_s25 + $0xa0] sm:$0xff] }
  0x46   : > { %224 = vst [vmem:[#allocation2 + $0x28] sm:$0xf] %v3703_v0  ;;  %v300_v22 = vld [vmem:[%s3857_s25 + $0xa8] sm:$0xff]  ;;  %v301_v23 = vld [vmem:[%s3857_s25 + $0xb0] sm:$0xff]  ;;  %v302_v24 = vld [vmem:[%s3857_s25 + $0xb8] sm:$0xff] }
  0x47   : > { %226 = vst [vmem:[#allocation2 + $0x38] sm:$0xff] %v3703_v0  ;;  %v303_v25 = vld [vmem:[%s3857_s25 + $0xc0] sm:$0xff]  ;;  %v304_v26 = vld [vmem:[%s3857_s25 + $0xc8] sm:$0xff]  ;;  %v305_v27 = vld [vmem:[%s3857_s25 + $0xd0] sm:$0xff] }
  0x48   : > { %227 = vst [vmem:[#allocation2 + $0x40] sm:$0xf] %v3703_v0  ;;  %v306_v28 = vld [vmem:[%s3857_s25 + $0xd8] sm:$0xff]  ;;  %v307_v29 = vld [vmem:[%s3857_s25 + $0xe0] sm:$0xff]  ;;  %v308_v30 = vld [vmem:[%s3857_s25 + $0xe8] sm:$0xff] }
  0x49   : > { %228 = vst [vmem:[#allocation2 + $0x48] sm:$0xff] %v3703_v0  ;;  %v309_v31 = vld [vmem:[%s3857_s25 + $0xf0] sm:$0xff]  ;;  %v310_v32 = vld [vmem:[%s3857_s25 + $0xf8] sm:$0xff] }
  0x4a   : > { %229 = vst [vmem:[#allocation2 + $0x50] sm:$0xff] %v3703_v0 }
  0x4b   : > { %230 = vst [vmem:[#allocation2 + $0x58] sm:$0xf] %v3703_v0 }
  0x4c   : > { %231 = vst [vmem:[#allocation2 + $0x60] sm:$0xff] %v3703_v0 }
  0x4d   : > { %232 = vst [vmem:[#allocation2 + $0x68] sm:$0xff] %v3703_v0 }
  0x4e   : > { %233 = vst [vmem:[#allocation2 + $0x70] sm:$0xf] %v3703_v0 }
  0x4f   : > { %234 = vst [vmem:[#allocation2 + $0x78] sm:$0xff] %v3703_v0 }
  0x50   : > { %235 = vst [vmem:[#allocation2 + $0x80] sm:$0xff] %v3703_v0 }
  0x51   : > { %236 = vst [vmem:[#allocation2 + $0x88] sm:$0xf] %v3703_v0 }
  0x52   : > { %237 = vst [vmem:[#allocation2 + $0x90] sm:$0xff] %v3703_v0 }
  0x53   : > { %238 = vst [vmem:[#allocation2 + $0x98] sm:$0xff] %v3703_v0 }
  0x54   : > { %239 = vst [vmem:[#allocation2 + $0xa0] sm:$0xf] %v3703_v0 }
  0x55   : > { %240 = vst [vmem:[#allocation2 + $0xa8] sm:$0xff] %v3703_v0 }
  0x56   : > { %241 = vst [vmem:[#allocation2 + $0xb0] sm:$0xff] %v3703_v0 }
  0x57   : > { %242 = vst [vmem:[#allocation2 + $0xb8] sm:$0xf] %v3703_v0 }
  0x58   : > { %243 = vst [vmem:[#allocation2 + $0xc0] sm:$0xff] %v3703_v0 }
  0x59   : > { %244 = vst [vmem:[#allocation2 + $0xc8] sm:$0xff] %v3703_v0 }
  0x5a   : > { %245 = vst [vmem:[#allocation2 + $0xd0] sm:$0xf] %v3703_v0 }
  0x5b   : > { %246 = vst [vmem:[#allocation2 + $0xd8] sm:$0xff] %v3703_v0 }
  0x5c   : > { %247 = vst [vmem:[#allocation2 + $0xe0] sm:$0xff] %v3703_v0 }
  0x5d   : > { %248 = vst [vmem:[#allocation2 + $0xe8] sm:$0xf] %v3703_v0 }
  0x5e   : > { %249 = vst [vmem:[#allocation2 + $0xf0] sm:$0xff] %v3703_v0 }
  0x5f   : > { %250 = vst [vmem:[#allocation2 + $0xf8] sm:$0xff] %v3703_v0 }
  0x60   : > { %251 = vst [vmem:[#allocation2 + $0x100] sm:$0xf] %v3703_v0 }
  0x61   : > { %252 = vst [vmem:[#allocation2 + $0x108] sm:$0xff] %v3703_v0 }
  0x62   : > { %253 = vst [vmem:[#allocation2 + $0x110] sm:$0xff] %v3703_v0 }
  0x63   : > { %254 = vst [vmem:[#allocation2 + $0x118] sm:$0xf] %v3703_v0 }
  0x64   : > { %255 = vst [vmem:[#allocation2 + $0x120] sm:$0xff] %v3703_v0 }
  0x65   : > { %256 = vst [vmem:[#allocation2 + $0x128] sm:$0xff] %v3703_v0 }
  0x66   : > { %257 = vst [vmem:[#allocation2 + $0x130] sm:$0xf] %v3703_v0 }
  0x67   : > { %258 = vst [vmem:[#allocation2 + $0x138] sm:$0xff] %v3703_v0 }
  0x68   : > { %259 = vst [vmem:[#allocation2 + $0x140] sm:$0xff] %v3703_v0 }
  0x69   : > { %260 = vst [vmem:[#allocation2 + $0x148] sm:$0xf] %v3703_v0 }
  0x6a   : > { %261 = vst [vmem:[#allocation2 + $0x150] sm:$0xff] %v3703_v0 }
  0x6b   : > { %262 = vst [vmem:[#allocation2 + $0x158] sm:$0xff] %v3703_v0 }
  0x6c   : > { %263 = vst [vmem:[#allocation2 + $0x160] sm:$0xf] %v3703_v0 }
  0x6d   : > { %264 = vst [vmem:[#allocation2 + $0x168] sm:$0xff] %v3703_v0 }
  0x6e   : > { %265 = vst [vmem:[#allocation2 + $0x170] sm:$0xff] %v3703_v0 }
  0x6f   : > { %266 = vst [vmem:[#allocation2 + $0x178] sm:$0xf] %v3703_v0 }
  0x70   : > { %267 = vst [vmem:[#allocation2 + $0x180] sm:$0xff] %v3703_v0 }
  0x71   : > { %268 = vst [vmem:[#allocation2 + $0x188] sm:$0xff] %v3703_v0 }
  0x72   : > { %269 = vst [vmem:[#allocation2 + $0x190] sm:$0xf] %v3703_v0 }
  0x73   : > { %270 = vst [vmem:[#allocation2 + $0x198] sm:$0xff] %v3703_v0 }
  0x74   : > { %271 = vst [vmem:[#allocation2 + $0x1a0] sm:$0xff] %v3703_v0 }
  0x75   : > { %272 = vst [vmem:[#allocation2 + $0x1a8] sm:$0xf] %v3703_v0 }
  0x76   : > { %273 = vst [vmem:[#allocation2 + $0x1b0] sm:$0xff] %v3703_v0 }
  0x77   : > { %274 = vst [vmem:[#allocation2 + $0x1b8] sm:$0xff] %v3703_v0 }
  0x78   : > { %275 = vst [vmem:[#allocation2 + $0x1c0] sm:$0xf] %v3703_v0 }
  0x79   : > { %276 = vst [vmem:[#allocation2 + $0x1c8] sm:$0xff] %v3703_v0 }
  0x7a   : > { %277 = vst [vmem:[#allocation2 + $0x1d0] sm:$0xff] %v3703_v0 }
  0x7b   : > { %278 = vst [vmem:[#allocation2 + $0x1d8] sm:$0xf] %v3703_v0 }
  0x7c   : > { %312 = vst [vmem:[#allocation2 + $0x32] sm:$0xff] %v279_v1 }
  0x7d   : > { %313 = vst [vmem:[#allocation2 + $0x3a] sm:$0xff] %v280_v2 }
  0x7e   : > { %314 = vst [vmem:[#allocation2 + $0x4a] sm:$0xff] %v281_v3 }
  0x7f   : > { %315 = vst [vmem:[#allocation2 + $0x52] sm:$0xff] %v282_v4 }
  0x80   : > { %316 = vst [vmem:[#allocation2 + $0x62] sm:$0xff] %v283_v5 }
  0x81   : > { %317 = vst [vmem:[#allocation2 + $0x6a] sm:$0xff] %v284_v6 }
  0x82   : > { %318 = vst [vmem:[#allocation2 + $0x7a] sm:$0xff] %v285_v7 }
  0x83   : > { %319 = vst [vmem:[#allocation2 + $0x82] sm:$0xff] %v286_v8 }
  0x84   : > { %320 = vst [vmem:[#allocation2 + $0x92] sm:$0xff] %v287_v9 }
  0x85   : > { %321 = vst [vmem:[#allocation2 + $0x9a] sm:$0xff] %v288_v10 }
  0x86   : > { %322 = vst [vmem:[#allocation2 + $0xaa] sm:$0xff] %v289_v11 }
  0x87   : > { %323 = vst [vmem:[#allocation2 + $0xb2] sm:$0xff] %v290_v12 }
  0x88   : > { %324 = vst [vmem:[#allocation2 + $0xc2] sm:$0xff] %v291_v13 }
  0x89   : > { %325 = vst [vmem:[#allocation2 + $0xca] sm:$0xff] %v292_v14 }
  0x8a   : > { %326 = vst [vmem:[#allocation2 + $0xda] sm:$0xff] %v293_v15 }
  0x8b   : > { %327 = vst [vmem:[#allocation2 + $0xe2] sm:$0xff] %v294_v16 }
  0x8c   : > { %328 = vst [vmem:[#allocation2 + $0xf2] sm:$0xff] %v295_v17 }
  0x8d   : > { %329 = vst [vmem:[#allocation2 + $0xfa] sm:$0xff] %v296_v18 }
  0x8e   : > { %330 = vst [vmem:[#allocation2 + $0x10a] sm:$0xff] %v297_v19 }
  0x8f   : > { %331 = vst [vmem:[#allocation2 + $0x112] sm:$0xff] %v298_v20 }
  0x90   : > { %332 = vst [vmem:[#allocation2 + $0x122] sm:$0xff] %v299_v21 }
  0x91   : > { %333 = vst [vmem:[#allocation2 + $0x12a] sm:$0xff] %v300_v22 }
  0x92   : > { %334 = vst [vmem:[#allocation2 + $0x13a] sm:$0xff] %v301_v23 }
  0x93   : > { %335 = vst [vmem:[#allocation2 + $0x142] sm:$0xff] %v302_v24 }
  0x94   : > { %336 = vst [vmem:[#allocation2 + $0x152] sm:$0xff] %v303_v25 }
  0x95   : > { %337 = vst [vmem:[#allocation2 + $0x15a] sm:$0xff] %v304_v26 }
  0x96   : > { %338 = vst [vmem:[#allocation2 + $0x16a] sm:$0xff] %v305_v27 }
  0x97   : > { %339 = vst [vmem:[#allocation2 + $0x172] sm:$0xff] %v306_v28 }
  0x98   : > { %340 = vst [vmem:[#allocation2 + $0x182] sm:$0xff] %v307_v29 }
  0x99   : > { %341 = vst [vmem:[#allocation2 + $0x18a] sm:$0xff] %v308_v30 }
  0x9a   : > { %342 = vst [vmem:[#allocation2 + $0x19a] sm:$0xff] %v309_v31 }
  0x9b   : > { %343 = vst [vmem:[#allocation2 + $0x1a2] sm:$0xff] %v310_v32 }
  0x9c PF: > { %s3245_s22 = smul.u32 192, %s3682_s15  ;;  %v3906_v33 = vld [vmem:[#allocation6] sm:$0xff]  ;;  %vm457_vm0 = vcmask 1046528   ;;  %vm579_vm1 = vcmask 1045504   ;;  %vm701_vm2 = vcmask 1044480   ;;  %vm823_vm3 = vcmask 1043456  }
  0x9d   : > { %6867 = vst [vmem:[#allocation18_spill] sm:$0xff] %v3906_v33  ;;  %v375_v34 = vperm.slane %v3906_v33, 0  ;;  %v3910_v35 = vperm.slane %v3906_v33, 1  ;;  %v3933_v42 = vperm.slane %v3906_v33, 2  ;;  %s3358_s26 = sshll.u32 %s3682_s15, 4  ;;  %s3353_s7 = sshll.u32 %s3686_s16, 5 }
  0x9e   : > { %s3912_s23 = scalar_lea.vmem [#allocation2], %s3245_s22  ;;  %s6532_s15 = sadd.s32 %s3358_s26, %s3353_s7 }
  0x9f   : > { %s3354_s16 = sshll.u32 %s6532_s15, 3  ;;  %s3105_s28 = sshll.u32 %s3870_s24, 4  ;;  %s3106_s28 = int_to_ptr.vmem [resolvable:$true] %s3105_s28 }
  0xa0   : > { %s3104_s27 = scalar_lea.hbm %s6626_s2, %s3354_s16  ;;  %s3089_s20 = scalar_lea.sflag [#allocation5], %s211_s9 }
  0xa1   : > { %s3107_s3 = sshll.u32 %s3104_s27, 4  ;;  %s3592_s25 = scalar_lea.hbm %s6626_s2, 512  ;;  %s3108_s3 = int_to_ptr.hbm [resolvable:$true] %s3107_s3 }
  0xa2   : > { %v3915_v36 = vld [vmem:[%s3912_s23] sm:$0xff]  ;;  %v3918_v37 = vld [vmem:[%s3912_s23 + $0x8] sm:$0xff]  ;;  %v3921_v38 = vld [vmem:[%s3912_s23 + $0x10] sm:$0xf]  ;;  %s3586_s29 = sshra.s32 %s3108_s3, 4  ;;  %s3587_s29 = int_to_ptr.hbm [resolvable:$true] %s3586_s29 }
  0xa3   : > { %v3924_v39 = vld [vmem:[%s3912_s23 + $0x18] sm:$0xff]  ;;  %v3927_v40 = vld [vmem:[%s3912_s23 + $0x20] sm:$0xff]  ;;  %v3930_v41 = vld [vmem:[%s3912_s23 + $0x28] sm:$0xf]  ;;  %v3942_v45 = vmul.f32 %v375_v34, %v3915_v36  ;;  %v3945_v46 = vmul.f32 %v375_v34, %v3918_v37  ;;  %v3949_v47 = vmul.f32 %v3910_v35, %v3915_v36  ;;  %v3953_v48 = vmul.f32 %v3910_v35, %v3918_v37  ;;  %s3588_s1 = scalar_lea.hbm %s3587_s29, 128  ;;  %p3593_p2 = scmp.lt.s32.totalorder %s3587_s29, %s6626_s2 }
  0xa4   : > { %6868 = vst [vmem:[#allocation19_spill] sm:$0xff] %v3924_v39  ;;  %v3936_v43 = vld [vmem:[%s3912_s23 + $0x30] sm:$0xff]  ;;  %v3939_v44 = vld [vmem:[%s3912_s23 + $0x38] sm:$0xff]  ;;  %v3956_v49 = vld [vmem:[%s3912_s23 + $0x40] sm:$0xf]  ;;  %v3962_v51 = vmul.f32 %v375_v34, %v3924_v39  ;;  %v3965_v52 = vmul.f32 %v375_v34, %v3927_v40  ;;  %v411_v53 = vmul.f32 %v3910_v35, %v3921_v38  ;;  %v3971_v54 = vmul.f32 %v3910_v35, %v3924_v39  ;;  %p3589_p1 = scmp.ne.s32.totalorder %s3587_s29, %s3588_s1  ;;  %p3594_p3 = scmp.lt.s32.totalorder %s3592_s25, %s3588_s1 }
  0xa5   : > { %6869 = vst [vmem:[#allocation20_spill] sm:$0xff] %v3927_v40  ;;  %v3959_v50 = vld [vmem:[%s3912_s23 + $0x48] sm:$0xff]  ;;  %v3974_v55 = vld [vmem:[%s3912_s23 + $0x50] sm:$0xff]  ;;  %v3977_v56 = vld [vmem:[%s3912_s23 + $0x58] sm:$0xf]  ;;  %v3980_v57 = vmul.f32 %v375_v34, %v3936_v43  ;;  %v3983_v58 = vmul.f32 %v375_v34, %v3939_v44  ;;  %v3987_v59 = vmul.f32 %v3910_v35, %v3927_v40  ;;  %v3991_v60 = vmul.f32 %v3910_v35, %v3930_v41 }
  0xa6   : > { %6870 = vst [vmem:[#allocation21_spill] sm:$0xff] %v3930_v41  ;;  %v3994_v61 = vld [vmem:[%s3912_s23 + $0x60] sm:$0xff]  ;;  %v3997_v62 = vld [vmem:[%s3912_s23 + $0x68] sm:$0xff]  ;;  %v4000_v63 = vmul.f32 %v375_v34, %v3959_v50  ;;  %v4003_v0 = vmul.f32 %v375_v34, %v3974_v55  ;;  %v4007_v1 = vmul.f32 %v3910_v35, %v3936_v43  ;;  %v4011_v2 = vmul.f32 %v3910_v35, %v3939_v44  ;;  %v4014_v3 = vld [vmem:[%s3912_s23 + $0x70] sm:$0xf]  ;;  %p3590_p4 = pnand %p3589_p1, %p3791_p6  ;;  %p3595_p5 = por %p3594_p3, %p3593_p2 }
  0xa7   : > { %6871 = vst [vmem:[#allocation22_spill] sm:$0xff] %v3936_v43  ;;  %v4017_v4 = vld [vmem:[%s3912_s23 + $0x78] sm:$0xff]  ;;  %v4020_v5 = vld [vmem:[%s3912_s23 + $0x80] sm:$0xff]  ;;  %v4023_v6 = vmul.f32 %v375_v34, %v3994_v61  ;;  %v4026_v7 = vmul.f32 %v375_v34, %v3997_v62  ;;  %v417_v8 = vmul.f32 %v3910_v35, %v3956_v49  ;;  %v418_v9 = vmul.f32 %v3910_v35, %v3959_v50  ;;  %v4033_v10 = vld [vmem:[%s3912_s23 + $0x88] sm:$0xf] }
  0xa8   : > { %6872 = vst [vmem:[#allocation23_spill] sm:$0xff] %v3939_v44  ;;  %v4036_v11 = vld [vmem:[%s3912_s23 + $0x90] sm:$0xff]  ;;  %v4039_v12 = vld [vmem:[%s3912_s23 + $0x98] sm:$0xff]  ;;  %v4042_v13 = vmul.f32 %v375_v34, %v4017_v4  ;;  %v4045_v14 = vmul.f32 %v375_v34, %v4020_v5  ;;  %v419_v15 = vmul.f32 %v3910_v35, %v3974_v55  ;;  %v420_v16 = vmul.f32 %v3910_v35, %v3977_v56  ;;  %v4052_v17 = vld [vmem:[%s3912_s23 + $0xa0] sm:$0xf]  ;;  %p3591_p0 = pneg %p3590_p4 }
  0xa9   : > { %6873 = vst [vmem:[#allocation24_spill] sm:$0xff] %v3956_v49  ;;  %v4055_v18 = vld [vmem:[%s3912_s23 + $0xa8] sm:$0xff]  ;;  %v4058_v19 = vld [vmem:[%s3912_s23 + $0xb0] sm:$0xff]  ;;  %v4061_v20 = vmul.f32 %v375_v34, %v4036_v11  ;;  %v4064_v21 = vmul.f32 %v375_v34, %v4039_v12  ;;  %v421_v22 = vmul.f32 %v3910_v35, %v3994_v61  ;;  %v422_v23 = vmul.f32 %v3910_v35, %v3997_v62  ;;  %v4071_v24 = vld [vmem:[%s3912_s23 + $0xb8] sm:$0xf] }
  0xaa   : > { %6874 = vst [vmem:[#allocation25_spill] sm:$0xff] %v3959_v50  ;;  %v4074_v25 = vmul.f32 %v375_v34, %v4055_v18  ;;  %v4077_v26 = vmul.f32 %v375_v34, %v4058_v19  ;;  %v423_v27 = vmul.f32 %v3910_v35, %v4014_v3  ;;  %v424_v28 = vmul.f32 %v3910_v35, %v4017_v4  ;;  %p3596_p7 = pnand %p3595_p5, %p3591_p0 }
  0xab   : > { %6875 = vst [vmem:[#allocation26_spill] sm:$0xff] %v3974_v55  ;;  %v425_v29 = vmul.f32 %v3910_v35, %v4020_v5  ;;  %v458_v30 = vrot.slane %v3949_v47, 1  ;;  %v459_v31 = vrot.slane %v3953_v48, 1  ;;  %v461_v32 = vrot.slane %v411_v53, 1 }
  0xac   : > { %6876 = vst [vmem:[#allocation27_spill] sm:$0xff] %v3977_v56  ;;  %v426_v33 = vmul.f32 %v3910_v35, %v4033_v10  ;;  %v427_v34 = vmul.f32 %v3910_v35, %v4036_v11  ;;  %v431_v47 = vmul.f32 %v3910_v35, %v4058_v19  ;;  %v432_v48 = vmul.f32 %v3910_v35, %v4071_v24 }
  0xad   : > { %6877 = vst [vmem:[#allocation28_spill] sm:$0xff] %v3994_v61  ;;  %v463_v53 = vrot.slane %v3971_v54, 1  ;;  %v471_v61 = vrot.slane %v417_v8, 1  ;;  %v473_v56 = vrot.slane %v418_v9, 1  ;;  %v476_v55 = vrot.slane %v420_v16, 1 }
  0xae   : > { %6878 = vst [vmem:[#allocation29_spill] sm:$0xff] %v3997_v62  ;;  %v469_v62 = vrot.slane %v4011_v2, 1  ;;  %v478_v50 = vrot.slane %v421_v22, 1  ;;  %v483_v54 = vrot.slane %v424_v28, 1  ;;  %v484_v49 = vrot.slane %v425_v29, 1 }
  0xaf   : > { %6879 = vst [vmem:[#allocation30_spill] sm:$0xff] %v4014_v3  ;;  %v428_v3 = vmul.f32 %v3910_v35, %v4039_v12  ;;  %v488_v44 = vrot.slane %v427_v34, 1  ;;  %v494_v41 = vrot.slane %v431_v47, 1 }
  0xb0   : > { %6880 = vst [vmem:[#allocation31_spill] sm:$0xff] %v4017_v4  ;;  %v429_v4 = vmul.f32 %v3910_v35, %v4052_v17  ;;  %v472_v9 = vsel %vm457_vm0, %v469_v62, %v471_v61 }
  0xb1   : > { %6881 = vst [vmem:[#allocation32_spill] sm:$0xff] %v4020_v5  ;;  %v430_v5 = vmul.f32 %v3910_v35, %v4055_v18  ;;  %v479_v35 = vrot.slane %v422_v23, 1 }
  0xb2   : > { %6882 = vst [vmem:[#allocation33_spill] sm:$0xff] %v4033_v10  ;;  %v464_v10 = vrot.slane %v3987_v59, 1  ;;  %v486_v59 = vrot.slane %v426_v33, 1  ;;  %v491_v43 = vrot.slane %v429_v4, 1  ;;  %v6894_v28 = vld [vmem:[#allocation26_spill] sm:$0xff] }
  0xb3   : > { %6883 = vst [vmem:[#allocation34_spill] sm:$0xff] %v4036_v11  ;;  %v466_v11 = vrot.slane %v3991_v60, 1  ;;  %v480_v33 = vsel %vm457_vm0, %v478_v50, %v479_v35  ;;  %v541_v29 = vmul.f32 %v3933_v42, %v6894_v28 }
  0xb4   : > { %6884 = vst [vmem:[#allocation35_spill] sm:$0xff] %v4039_v12  ;;  %v468_v12 = vrot.slane %v4007_v1, 1  ;;  %v465_v60 = vsel %vm457_vm0, %v463_v53, %v464_v10  ;;  %v489_v1 = vrot.slane %v428_v3, 1  ;;  %v485_v3 = vsel %vm457_vm0, %v483_v54, %v484_v49  ;;  %v6896_v47 = vld [vmem:[#allocation28_spill] sm:$0xff] }
  0xb5   : > { %6885 = vst [vmem:[#allocation36_spill] sm:$0xff] %v4052_v17  ;;  %v460_v17 = vsel %vm457_vm0, %v458_v30, %v459_v31  ;;  %v467_v2 = vsel %vm457_vm0, %v464_v10, %v466_v11  ;;  %v493_v30 = vrot.slane %v430_v5, 1  ;;  %v487_v4 = vsel %vm457_vm0, %v484_v49, %v486_v59  ;;  %v6897_v53 = vld [vmem:[#allocation29_spill] sm:$0xff] }
  0xb6   : > { %6886 = vst [vmem:[#allocation37_spill] sm:$0xff] %v4055_v18  ;;  %v462_v18 = vsel %vm457_vm0, %v459_v31, %v461_v32  ;;  %v496_v31 = vrot.slane %v432_v48, 1  ;;  %v470_v8 = vsel %vm457_vm0, %v468_v12, %v469_v62  ;;  %v490_v5 = vsel %vm457_vm0, %v488_v44, %v489_v1  ;;  %v6895_v32 = vld [vmem:[#allocation27_spill] sm:$0xff]  ;;  %v6898_v54 = vld [vmem:[#allocation30_spill] sm:$0xff] }
  0xb7   : > { %6887 = vst [vmem:[#allocation38_spill] sm:$0xff] %v4058_v19  ;;  %v474_v19 = vrot.slane %v419_v15, 1  ;;  %v492_v10 = vsel %vm457_vm0, %v489_v1, %v491_v43  ;;  %v4121_v11 = vadd.f32 %v460_v17, %v3942_v45  ;;  %v4124_v61 = vadd.f32 %v462_v18, %v3945_v46  ;;  %v6889_v17 = vld [vmem:[#allocation21_spill] sm:$0xff] }
  0xb8   : > { %6888 = vst [vmem:[#allocation39_spill] sm:$0xff] %v4071_v24  ;;  %v481_v24 = vrot.slane %v423_v27, 1  ;;  %v497_v50 = vsel %vm457_vm0, %v494_v41, %v496_v31  ;;  %v4132_v62 = vadd.f32 %v467_v2, %v3965_v52  ;;  %v4135_v44 = vadd.f32 %v470_v8, %v3980_v57  ;;  %v6900_v2 = vld [vmem:[#allocation32_spill] sm:$0xff] }
  0xb9   : > { %v475_v15 = vsel %vm457_vm0, %v473_v56, %v474_v19  ;;  %v477_v16 = vsel %vm457_vm0, %v474_v19, %v476_v55  ;;  %v495_v55 = vsel %vm457_vm0, %v493_v30, %v494_v41  ;;  %v4129_v56 = vadd.f32 %v465_v60, %v3962_v51  ;;  %v6890_v19 = vld [vmem:[#allocation22_spill] sm:$0xff]  ;;  %v6899_v60 = vld [vmem:[#allocation31_spill] sm:$0xff] }
  0xba   : > { %v482_v22 = vsel %vm457_vm0, %v479_v35, %v481_v24  ;;  %v4138_v43 = vadd.f32 %v472_v9, %v3983_v58  ;;  %v4141_v45 = vadd.f32 %v475_v15, %v4000_v63  ;;  %v4144_v46 = vadd.f32 %v477_v16, %v4003_v0  ;;  %v6892_v24 = vld [vmem:[#allocation24_spill] sm:$0xff]  ;;  %v6901_v15 = vld [vmem:[#allocation33_spill] sm:$0xff] }
  0xbb   : > { %v4147_v41 = vadd.f32 %v480_v33, %v4023_v6  ;;  %v4150_v49 = vadd.f32 %v482_v22, %v4026_v7  ;;  %v4153_v51 = vadd.f32 %v485_v3, %v4042_v13  ;;  %v4156_v52 = vadd.f32 %v487_v4, %v4045_v14  ;;  %v6902_v33 = vld [vmem:[#allocation34_spill] sm:$0xff]  ;;  %v6903_v3 = vld [vmem:[#allocation35_spill] sm:$0xff] }
  0xbc   : > { %v4159_v57 = vadd.f32 %v490_v5, %v4061_v20  ;;  %v4162_v58 = vadd.f32 %v492_v10, %v4064_v21  ;;  %v4165_v63 = vadd.f32 %v495_v55, %v4074_v25  ;;  %v4168_v0 = vadd.f32 %v497_v50, %v4077_v26  ;;  %v6891_v21 = vld [vmem:[#allocation23_spill] sm:$0xff]  ;;  %v6893_v26 = vld [vmem:[#allocation25_spill] sm:$0xff]  ;;  %v6904_v5 = vld [vmem:[#allocation36_spill] sm:$0xff] }
  0xbd   : > { %v531_v6 = vmul.f32 %v3933_v42, %v3915_v36  ;;  %v532_v7 = vmul.f32 %v3933_v42, %v3918_v37  ;;  %v533_v12 = vmul.f32 %v3933_v42, %v3921_v38  ;;  %v534_v13 = vmul.f32 %v3933_v42, %v3924_v39  ;;  %v6905_v55 = vld [vmem:[#allocation37_spill] sm:$0xff] }
  0xbe   : > { %v535_v14 = vmul.f32 %v3933_v42, %v3927_v40  ;;  %v536_v18 = vmul.f32 %v3933_v42, %v6889_v17  ;;  %v537_v20 = vmul.f32 %v3933_v42, %v6890_v19  ;;  %v538_v23 = vmul.f32 %v3933_v42, %v6891_v21 }
  0xbf   : > { %v539_v25 = vmul.f32 %v3933_v42, %v6892_v24  ;;  %v540_v27 = vmul.f32 %v3933_v42, %v6893_v26  ;;  %v542_v34 = vmul.f32 %v3933_v42, %v6895_v32  ;;  %v543_v48 = vmul.f32 %v3933_v42, %v6896_v47 }
  0xc0   : > { %v544_v35 = vmul.f32 %v3933_v42, %v6897_v53  ;;  %v545_v59 = vmul.f32 %v3933_v42, %v6898_v54  ;;  %v546_v1 = vmul.f32 %v3933_v42, %v6899_v60  ;;  %v547_v30 = vmul.f32 %v3933_v42, %v6900_v2  ;;  %v6906_v60 = vld [vmem:[#allocation38_spill] sm:$0xff] }
  0xc1   : > { %v580_v31 = vrot.slane %v531_v6, 2  ;;  %v581_v8 = vrot.slane %v532_v7, 2  ;;  %v583_v9 = vrot.slane %v533_v12, 2  ;;  %v548_v16 = vmul.f32 %v3933_v42, %v6901_v15  ;;  %v6907_v7 = vld [vmem:[#allocation39_spill] sm:$0xff] }
  0xc2   : > { %v549_v22 = vmul.f32 %v3933_v42, %v6902_v33  ;;  %v550_v4 = vmul.f32 %v3933_v42, %v6903_v3  ;;  %v551_v10 = vmul.f32 %v3933_v42, %v6904_v5  ;;  %v552_v50 = vmul.f32 %v3933_v42, %v6905_v55 }
  0xc3   : > { %v553_v6 = vmul.f32 %v3933_v42, %v6906_v60  ;;  %v554_v12 = vmul.f32 %v3933_v42, %v6907_v7  ;;  %v585_v2 = vrot.slane %v534_v13, 2  ;;  %v586_v15 = vrot.slane %v535_v14, 2 }
  0xc4   : > { %v588_v54 = vrot.slane %v536_v18, 2  ;;  %v590_v53 = vrot.slane %v537_v20, 2  ;;  %v591_v33 = vrot.slane %v538_v23, 2  ;;  %v582_v47 = vsel %vm579_vm1, %v580_v31, %v581_v8 }
  0xc5   : > { %v584_v3 = vsel %vm579_vm1, %v581_v8, %v583_v9  ;;  %v593_v32 = vrot.slane %v539_v25, 2  ;;  %v595_v5 = vrot.slane %v540_v27, 2  ;;  %v596_v28 = vrot.slane %v541_v29, 2 }
  0xc6   : > { %v598_v26 = vrot.slane %v542_v34, 2  ;;  %v600_v55 = vrot.slane %v543_v48, 2  ;;  %v601_v24 = vrot.slane %v544_v35, 2  ;;  %v603_v21 = vrot.slane %v545_v59, 2 }
  0xc7   : > { %v605_v60 = vrot.slane %v546_v1, 2  ;;  %v606_v19 = vrot.slane %v547_v30, 2  ;;  %v608_v17 = vrot.slane %v548_v16, 2  ;;  %v587_v42 = vsel %vm579_vm1, %v585_v2, %v586_v15  ;;  %v6910_v16 = vld [vmem:[#allocation22_spill] sm:$0xff] }
  0xc8   : > { %v610_v13 = vrot.slane %v549_v22, 2  ;;  %v611_v14 = vrot.slane %v550_v4, 2  ;;  %v613_v18 = vrot.slane %v551_v10, 2  ;;  %v589_v20 = vsel %vm579_vm1, %v586_v15, %v588_v54  ;;  %v6909_v15 = vld [vmem:[#allocation21_spill] sm:$0xff] }
  0xc9   : > { %v615_v23 = vrot.slane %v552_v50, 2  ;;  %v616_v31 = vrot.slane %v553_v6, 2  ;;  %v618_v8 = vrot.slane %v554_v12, 2  ;;  %v592_v25 = vsel %vm579_vm1, %v590_v53, %v591_v33  ;;  %v6915_v6 = vld [vmem:[#allocation27_spill] sm:$0xff] }
  0xca   : > { %v594_v27 = vsel %vm579_vm1, %v591_v33, %v593_v32  ;;  %v597_v29 = vsel %vm579_vm1, %v595_v5, %v596_v28  ;;  %v599_v34 = vsel %vm579_vm1, %v596_v28, %v598_v26  ;;  %v602_v48 = vsel %vm579_vm1, %v600_v55, %v601_v24  ;;  %v6913_v5 = vld [vmem:[#allocation25_spill] sm:$0xff]  ;;  %v6914_v55 = vld [vmem:[#allocation26_spill] sm:$0xff] }
  0xcb   : > { %v604_v35 = vsel %vm579_vm1, %v601_v24, %v603_v21  ;;  %v607_v59 = vsel %vm579_vm1, %v605_v60, %v606_v19  ;;  %v609_v1 = vsel %vm579_vm1, %v606_v19, %v608_v17  ;;  %v612_v54 = vsel %vm579_vm1, %v610_v13, %v611_v14  ;;  %v6908_v24 = vld [vmem:[#allocation18_spill] sm:$0xff] }
  0xcc   : > { %v614_v2 = vsel %vm579_vm1, %v611_v14, %v613_v18  ;;  %v4233_v53 = vadd.f32 %v582_v47, %v4121_v11  ;;  %v4236_v32 = vadd.f32 %v584_v3, %v4124_v61  ;;  %v617_v26 = vsel %vm579_vm1, %v615_v23, %v616_v31  ;;  %v6912_v3 = vld [vmem:[#allocation24_spill] sm:$0xff]  ;;  %v6917_v14 = vld [vmem:[#allocation29_spill] sm:$0xff] }
  0xcd   : > { %v619_v28 = vsel %vm579_vm1, %v616_v31, %v618_v8  ;;  %v4241_v21 = vadd.f32 %v587_v42, %v4129_v56  ;;  %v652_v60 = vperm.slane %v6908_v24, 3  ;;  %v4245_v17 = vadd.f32 %v589_v20, %v4132_v62  ;;  %v6916_v42 = vld [vmem:[#allocation28_spill] sm:$0xff]  ;;  %v6918_v20 = vld [vmem:[#allocation30_spill] sm:$0xff] }
  0xce   : > { %v4248_v19 = vadd.f32 %v592_v25, %v4135_v44  ;;  %v4251_v11 = vadd.f32 %v594_v27, %v4138_v43  ;;  %v4254_v61 = vadd.f32 %v597_v29, %v4141_v45  ;;  %v4257_v47 = vadd.f32 %v599_v34, %v4144_v46  ;;  %v6919_v25 = vld [vmem:[#allocation31_spill] sm:$0xff]  ;;  %v6920_v29 = vld [vmem:[#allocation32_spill] sm:$0xff] }
  0xcf   : > { %v4260_v56 = vadd.f32 %v602_v48, %v4147_v41  ;;  %v4263_v30 = vadd.f32 %v604_v35, %v4150_v49  ;;  %v4266_v62 = vadd.f32 %v607_v59, %v4153_v51  ;;  %v4269_v44 = vadd.f32 %v609_v1, %v4156_v52  ;;  %v6921_v48 = vld [vmem:[#allocation33_spill] sm:$0xff]  ;;  %v6922_v59 = vld [vmem:[#allocation34_spill] sm:$0xff] }
  0xd0   : > { %v4272_v43 = vadd.f32 %v612_v54, %v4159_v57  ;;  %v4275_v45 = vadd.f32 %v614_v2, %v4162_v58  ;;  %v4278_v46 = vadd.f32 %v617_v26, %v4165_v63  ;;  %v4281_v41 = vadd.f32 %v619_v28, %v4168_v0  ;;  %v6911_v0 = vld [vmem:[#allocation23_spill] sm:$0xff]  ;;  %v6924_v26 = vld [vmem:[#allocation36_spill] sm:$0xff] }
  0xd1   : > { %v653_v49 = vmul.f32 %v652_v60, %v3915_v36  ;;  %v654_v51 = vmul.f32 %v652_v60, %v3918_v37  ;;  %v655_v52 = vmul.f32 %v652_v60, %v3921_v38  ;;  %v656_v9 = vmul.f32 %v652_v60, %v3924_v39  ;;  %v6923_v54 = vld [vmem:[#allocation35_spill] sm:$0xff] }
  0xd2   : > { %v657_v57 = vmul.f32 %v652_v60, %v3927_v40  ;;  %v4289_v58 = vperm.slane %v6908_v24, 4  ;;  %v658_v63 = vmul.f32 %v652_v60, %v6909_v15  ;;  %v659_v33 = vmul.f32 %v652_v60, %v6910_v16  ;;  %v6925_v24 = vld [vmem:[#allocation37_spill] sm:$0xff] }
  0xd3   : > { %v660_v22 = vmul.f32 %v652_v60, %v6911_v0  ;;  %v661_v4 = vmul.f32 %v652_v60, %v6912_v3  ;;  %v662_v10 = vmul.f32 %v652_v60, %v6913_v5  ;;  %v663_v50 = vmul.f32 %v652_v60, %v6914_v55 }
  0xd4   : > { %v664_v12 = vmul.f32 %v652_v60, %v6915_v6  ;;  %v665_v13 = vmul.f32 %v652_v60, %v6916_v42  ;;  %v666_v18 = vmul.f32 %v652_v60, %v6917_v14  ;;  %v667_v23 = vmul.f32 %v652_v60, %v6918_v20  ;;  %v6926_v6 = vld [vmem:[#allocation38_spill] sm:$0xff] }
  0xd5   : > { %v702_v31 = vrot.slane %v653_v49, 3  ;;  %v703_v8 = vrot.slane %v654_v51, 3  ;;  %v668_v27 = vmul.f32 %v652_v60, %v6919_v25  ;;  %v669_v34 = vmul.f32 %v652_v60, %v6920_v29 }
  0xd6   : > { %v670_v35 = vmul.f32 %v652_v60, %v6921_v48  ;;  %v671_v1 = vmul.f32 %v652_v60, %v6922_v59  ;;  %v672_v2 = vmul.f32 %v652_v60, %v6923_v54  ;;  %v673_v28 = vmul.f32 %v652_v60, %v6924_v26 }
  0xd7   : > { %v674_v42 = vmul.f32 %v652_v60, %v6925_v24  ;;  %v675_v14 = vmul.f32 %v652_v60, %v6926_v6  ;;  %v676_v20 = vmul.f32 %v652_v60, %v6907_v7  ;;  %v705_v49 = vrot.slane %v655_v52, 3 }
  0xd8   : > { %v707_v51 = vrot.slane %v656_v9, 3  ;;  %v708_v55 = vrot.slane %v657_v57, 3  ;;  %v704_v25 = vsel %vm701_vm2, %v702_v31, %v703_v8  ;;  %v710_v29 = vrot.slane %v658_v63, 3 }
  0xd9   : > { %v712_v5 = vrot.slane %v659_v33, 3  ;;  %v713_v48 = vrot.slane %v660_v22, 3  ;;  %v715_v3 = vrot.slane %v661_v4, 3  ;;  %v717_v59 = vrot.slane %v662_v10, 3 }
  0xda   : > { %v718_v0 = vrot.slane %v663_v50, 3  ;;  %v720_v54 = vrot.slane %v664_v12, 3  ;;  %v722_v16 = vrot.slane %v665_v13, 3  ;;  %v723_v26 = vrot.slane %v666_v18, 3 }
  0xdb   : > { %v725_v15 = vrot.slane %v667_v23, 3  ;;  %v727_v24 = vrot.slane %v668_v27, 3  ;;  %v728_v40 = vrot.slane %v669_v34, 3  ;;  %v730_v6 = vrot.slane %v670_v35, 3  ;;  %v6930_v27 = vld [vmem:[#allocation22_spill] sm:$0xff] }
  0xdc   : > { %v732_v39 = vrot.slane %v671_v1, 3  ;;  %v733_v60 = vrot.slane %v672_v2, 3  ;;  %v706_v52 = vsel %vm701_vm2, %v703_v8, %v705_v49  ;;  %v735_v9 = vrot.slane %v673_v28, 3  ;;  %v6934_v35 = vld [vmem:[#allocation26_spill] sm:$0xff]  ;;  %v6935_v1 = vld [vmem:[#allocation27_spill] sm:$0xff]  ;;  %v6936_v2 = vld [vmem:[#allocation28_spill] sm:$0xff] }
  0xdd   : > { %v737_v57 = vrot.slane %v674_v42, 3  ;;  %v738_v31 = vrot.slane %v675_v14, 3  ;;  %v709_v63 = vsel %vm701_vm2, %v707_v51, %v708_v55  ;;  %v711_v33 = vsel %vm701_vm2, %v708_v55, %v710_v29  ;;  %v6931_v29 = vld [vmem:[#allocation23_spill] sm:$0xff]  ;;  %v6937_v28 = vld [vmem:[#allocation29_spill] sm:$0xff]  ;;  %v6938_v51 = vld [vmem:[#allocation30_spill] sm:$0xff] }
  0xde   : > { %v714_v22 = vsel %vm701_vm2, %v712_v5, %v713_v48  ;;  %v740_v4 = vrot.slane %v676_v20, 3  ;;  %v716_v10 = vsel %vm701_vm2, %v713_v48, %v715_v3  ;;  %v719_v50 = vsel %vm701_vm2, %v717_v59, %v718_v0  ;;  %v6933_v48 = vld [vmem:[#allocation25_spill] sm:$0xff] }
  0xdf   : > { %v721_v12 = vsel %vm701_vm2, %v718_v0, %v720_v54  ;;  %v724_v13 = vsel %vm701_vm2, %v722_v16, %v723_v26  ;;  %v726_v18 = vsel %vm701_vm2, %v723_v26, %v725_v15  ;;  %v729_v42 = vsel %vm701_vm2, %v727_v24, %v728_v40 }
  0xe0   : > { %v731_v14 = vsel %vm701_vm2, %v728_v40, %v730_v6  ;;  %v734_v23 = vsel %vm701_vm2, %v732_v39, %v733_v60  ;;  %v736_v55 = vsel %vm701_vm2, %v733_v60, %v735_v9  ;;  %v739_v5 = vsel %vm701_vm2, %v737_v57, %v738_v31  ;;  %v6939_v57 = vld [vmem:[#allocation31_spill] sm:$0xff] }
  0xe1   : > { %v4326_v3 = vadd.f32 %v704_v25, %v4233_v53  ;;  %v4329_v20 = vadd.f32 %v706_v52, %v4236_v32  ;;  %v741_v16 = vsel %vm701_vm2, %v738_v31, %v740_v4  ;;  %v4333_v15 = vadd.f32 %v709_v63, %v4241_v21  ;;  %v6940_v63 = vld [vmem:[#allocation32_spill] sm:$0xff] }
  0xe2   : > { %v4336_v24 = vadd.f32 %v711_v33, %v4245_v17  ;;  %v4339_v39 = vadd.f32 %v714_v22, %v4248_v19  ;;  %v4342_v40 = vadd.f32 %v716_v10, %v4251_v11  ;;  %v4345_v53 = vadd.f32 %v719_v50, %v4254_v61  ;;  %v6941_v22 = vld [vmem:[#allocation33_spill] sm:$0xff]  ;;  %v6942_v10 = vld [vmem:[#allocation34_spill] sm:$0xff] }
  0xe3   : > { %v4348_v32 = vadd.f32 %v721_v12, %v4257_v47  ;;  %v4351_v0 = vadd.f32 %v724_v13, %v4260_v56  ;;  %v4354_v21 = vadd.f32 %v726_v18, %v4263_v30  ;;  %v4357_v17 = vadd.f32 %v729_v42, %v4266_v62  ;;  %v6943_v12 = vld [vmem:[#allocation35_spill] sm:$0xff]  ;;  %v6944_v18 = vld [vmem:[#allocation36_spill] sm:$0xff] }
  0xe4   : > { %v4360_v19 = vadd.f32 %v731_v14, %v4269_v44  ;;  %v4363_v11 = vadd.f32 %v734_v23, %v4272_v43  ;;  %v4366_v61 = vadd.f32 %v736_v55, %v4275_v45  ;;  %v4369_v47 = vadd.f32 %v739_v5, %v4278_v46  ;;  %v6927_v43 = vld [vmem:[#allocation19_spill] sm:$0xff]  ;;  %v6928_v45 = vld [vmem:[#allocation20_spill] sm:$0xff]  ;;  %v6929_v46 = vld [vmem:[#allocation21_spill] sm:$0xff] }
  0xe5   : > { %v775_v56 = vmul.f32 %v4289_v58, %v3915_v36  ;;  %v776_v30 = vmul.f32 %v4289_v58, %v3918_v37  ;;  %v4376_v62 = vadd.f32 %v741_v16, %v4281_v41  ;;  %v777_v44 = vmul.f32 %v4289_v58, %v3921_v38  ;;  %v6932_v41 = vld [vmem:[#allocation24_spill] sm:$0xff]  ;;  %v6945_v14 = vld [vmem:[#allocation37_spill] sm:$0xff]  ;;  %v6946_v55 = vld [vmem:[#allocation38_spill] sm:$0xff] }
  0xe6   : > { %v778_v6 = vmul.f32 %v4289_v58, %v6927_v43  ;;  %v779_v8 = vmul.f32 %v4289_v58, %v6928_v45  ;;  %v780_v25 = vmul.f32 %v4289_v58, %v6929_v46  ;;  %v781_v36 = vmul.f32 %v4289_v58, %v6930_v27 }
  0xe7   : > { %v782_v37 = vmul.f32 %v4289_v58, %v6931_v29  ;;  %v783_v34 = vmul.f32 %v4289_v58, %v6932_v41  ;;  %v784_v38 = vmul.f32 %v4289_v58, %v6933_v48  ;;  %v785_v59 = vmul.f32 %v4289_v58, %v6934_v35 }
  0xe8   : > { %v786_v54 = vmul.f32 %v4289_v58, %v6935_v1  ;;  %v787_v26 = vmul.f32 %v4289_v58, %v6936_v2  ;;  %v788_v49 = vmul.f32 %v4289_v58, %v6937_v28  ;;  %v789_v60 = vmul.f32 %v4289_v58, %v6938_v51 }
  0xe9   : > { %v824_v52 = vrot.slane %v775_v56, 4  ;;  %v825_v9 = vrot.slane %v776_v30, 4  ;;  %v790_v31 = vmul.f32 %v4289_v58, %v6939_v57  ;;  %v791_v33 = vmul.f32 %v4289_v58, %v6940_v63 }
  0xea   : > { %v792_v4 = vmul.f32 %v4289_v58, %v6941_v22  ;;  %v793_v50 = vmul.f32 %v4289_v58, %v6942_v10  ;;  %v794_v13 = vmul.f32 %v4289_v58, %v6943_v12  ;;  %v795_v42 = vmul.f32 %v4289_v58, %v6944_v18 }
  0xeb   : > { %v796_v23 = vmul.f32 %v4289_v58, %v6945_v14  ;;  %v797_v5 = vmul.f32 %v4289_v58, %v6946_v55  ;;  %v798_v16 = vmul.f32 %v4289_v58, %v6907_v7  ;;  %v827_v56 = vrot.slane %v777_v44, 4 }
  0xec   : > { %v829_v30 = vrot.slane %v778_v6, 4  ;;  %v830_v46 = vrot.slane %v779_v8, 4  ;;  %v826_v41 = vsel %vm823_vm3, %v824_v52, %v825_v9  ;;  %v832_v1 = vrot.slane %v780_v25, 4 }
  0xed   : > { %v834_v51 = vrot.slane %v781_v36, 4  ;;  %v835_v22 = vrot.slane %v782_v37, 4  ;;  %v837_v12 = vrot.slane %v783_v34, 4  ;;  %v839_v10 = vrot.slane %v784_v38, 4 }
  0xee   : > { %v840_v18 = vrot.slane %v785_v59, 4  ;;  %v842_v63 = vrot.slane %v786_v54, 4  ;;  %v844_v57 = vrot.slane %v787_v26, 4  ;;  %v845_v14 = vrot.slane %v788_v49, 4 }
  0xef   : > { %v847_v28 = vrot.slane %v789_v60, 4  ;;  %v849_v2 = vrot.slane %v790_v31, 4  ;;  %v850_v55 = vrot.slane %v791_v33, 4  ;;  %v852_v35 = vrot.slane %v792_v4, 4 }
  0xf0   : > { %v854_v48 = vrot.slane %v793_v50, 4  ;;  %v855_v7 = vrot.slane %v794_v13, 4  ;;  %v828_v58 = vsel %vm823_vm3, %v825_v9, %v827_v56  ;;  %v857_v44 = vrot.slane %v795_v42, 4  ;;  %v6947_v50 = vld [vmem:[#allocation18_spill] sm:$0xff]  ;;  %v6953_v56 = vld [vmem:[#allocation29_spill] sm:$0xff] }
  0xf1   : > { %v859_v6 = vrot.slane %v796_v23, 4  ;;  %v860_v8 = vrot.slane %v797_v5, 4  ;;  %v831_v25 = vsel %vm823_vm3, %v829_v30, %v830_v46  ;;  %v833_v36 = vsel %vm823_vm3, %v830_v46, %v832_v1  ;;  %v6951_v23 = vld [vmem:[#allocation26_spill] sm:$0xff]  ;;  %v6952_v5 = vld [vmem:[#allocation28_spill] sm:$0xff]  ;;  %v6954_v46 = vld [vmem:[#allocation31_spill] sm:$0xff] }
  0xf2   : > { %v836_v37 = vsel %vm823_vm3, %v834_v51, %v835_v22  ;;  %v862_v34 = vrot.slane %v798_v16, 4  ;;  %v838_v38 = vsel %vm823_vm3, %v835_v22, %v837_v12  ;;  %v841_v59 = vsel %vm823_vm3, %v839_v10, %v840_v18  ;;  %v6955_v1 = vld [vmem:[#allocation32_spill] sm:$0xff]  ;;  %v6956_v22 = vld [vmem:[#allocation34_spill] sm:$0xff] }
  0xf3   : > { %v843_v54 = vsel %vm823_vm3, %v840_v18, %v842_v63  ;;  %v846_v26 = vsel %vm823_vm3, %v844_v57, %v845_v14  ;;  %v848_v49 = vsel %vm823_vm3, %v845_v14, %v847_v28  ;;  %v851_v60 = vsel %vm823_vm3, %v849_v2, %v850_v55 }
  0xf4   : > { %v853_v52 = vsel %vm823_vm3, %v850_v55, %v852_v35  ;;  %v856_v9 = vsel %vm823_vm3, %v854_v48, %v855_v7  ;;  %v858_v31 = vsel %vm823_vm3, %v855_v7, %v857_v44  ;;  %v861_v33 = vsel %vm823_vm3, %v859_v6, %v860_v8  ;;  %v6957_v7 = vld [vmem:[#allocation35_spill] sm:$0xff]  ;;  %v6958_v44 = vld [vmem:[#allocation37_spill] sm:$0xff] }
  0xf5   : > { %v880_v4 = vadd.f32 %v826_v41, %v4326_v3  ;;  %v881_v10 = vadd.f32 %v828_v58, %v4329_v20  ;;  %v863_v63 = vsel %vm823_vm3, %v860_v8, %v862_v34  ;;  %v882_v57 = vadd.f32 %v831_v25, %v4333_v15  ;;  %v6959_v8 = vld [vmem:[#allocation38_spill] sm:$0xff] }
  0xf6   : > { %v883_v28 = vadd.f32 %v833_v36, %v4336_v24  ;;  %v923_v2 = vperm.slane %v6947_v50, 5  ;;  %v884_v35 = vadd.f32 %v836_v37, %v4339_v39  ;;  %v885_v48 = vadd.f32 %v838_v38, %v4342_v40 }
  0xf7   : > { %v886_v12 = vadd.f32 %v841_v59, %v4345_v53  ;;  %v887_v3 = vadd.f32 %v843_v54, %v4348_v32  ;;  %v888_v20 = vadd.f32 %v846_v26, %v4351_v0  ;;  %v889_v13 = vadd.f32 %v848_v49, %v4354_v21 }
  0xf8   : > { %v890_v15 = vadd.f32 %v851_v60, %v4357_v17  ;;  %v891_v24 = vadd.f32 %v853_v52, %v4360_v19  ;;  %v892_v42 = vadd.f32 %v856_v9, %v4363_v11  ;;  %v893_v39 = vadd.f32 %v858_v31, %v4366_v61  ;;  %v4464_v17 = vld [vmem:[%s3912_s23 + $0xc0] sm:$0xff]  ;;  %v4467_v19 = vld [vmem:[%s3912_s23 + $0xc8] sm:$0xff] }
  0xf9   : > { %v894_v14 = vadd.f32 %v861_v33, %v4369_v47  ;;  %v895_v40 = vadd.f32 %v863_v63, %v4376_v62  ;;  %v924_v53 = vmul.f32 %v923_v2, %v6927_v43  ;;  %v925_v32 = vmul.f32 %v923_v2, %v6928_v45  ;;  %6948 = vst [vmem:[#allocation39_spill] sm:$0xff] %v4464_v17  ;;  %v6950_v47 = vld [vmem:[#allocation25_spill] sm:$0xff]  ;;  %v4496_v60 = vld [vmem:[%s3912_s23 + $0x28] sm:$0xf]  ;;  %v4499_v52 = vld [vmem:[%s3912_s23 + $0x40] sm:$0xf] }
  0xfa   : > { %v4458_v0 = vperm.slane %v6947_v50, 6  ;;  %v4461_v21 = vperm.slane %v6947_v50, 7  ;;  %6949 = vst [vmem:[#allocation19_spill] sm:$0xff] %v4467_v19  ;;  %v926_v11 = vmul.f32 %v923_v2, %v6930_v27  ;;  %v927_v61 = vmul.f32 %v923_v2, %v6931_v29 }
  0xfb   : > { %v928_v62 = vmul.f32 %v923_v2, %v6950_v47  ;;  %v929_v55 = vmul.f32 %v923_v2, %v6951_v23  ;;  %v930_v16 = vmul.f32 %v923_v2, %v6952_v5  ;;  %v931_v30 = vmul.f32 %v923_v2, %v6953_v56  ;;  %6960 = vst [vmem:[#allocation20_spill] sm:$0xff] %v4499_v52 }
  0xfc   : > { %v932_v41 = vmul.f32 %v923_v2, %v6954_v46  ;;  %v933_v51 = vmul.f32 %v923_v2, %v6955_v1  ;;  %v934_v18 = vmul.f32 %v923_v2, %v6956_v22  ;;  %v935_v58 = vmul.f32 %v923_v2, %v6957_v7 }
  0xfd   : > { %v936_v6 = vmul.f32 %v923_v2, %v6958_v44  ;;  %v937_v25 = vmul.f32 %v923_v2, %v6959_v8  ;;  %v938_v36 = vmul.f32 %v4464_v17, %v923_v2  ;;  %v939_v37 = vmul.f32 %v4467_v19, %v923_v2  ;;  %v4521_v2 = vld [vmem:[%s3912_s23 + $0x70] sm:$0xf] }
  0xfe   : > { %v4483_v34 = vadd.f32 %v924_v53, %v880_v4  ;;  %v4485_v38 = vadd.f32 %v925_v32, %v881_v10  ;;  %v4487_v59 = vadd.f32 %v926_v11, %v882_v57  ;;  %v4489_v54 = vadd.f32 %v927_v61, %v883_v28  ;;  %v4510_v10 = vld [vmem:[%s3912_s23 + $0x58] sm:$0xf]  ;;  %6962 = vst [vmem:[#allocation24_spill] sm:$0xff] %v4521_v2  ;;  %v4557_v61 = vld [vmem:[%s3912_s23 + $0xd0] sm:$0xf] }
  0xff   : > { %v4491_v26 = vadd.f32 %v928_v62, %v884_v35  ;;  %v4493_v49 = vadd.f32 %v929_v55, %v885_v48  ;;  %v4501_v9 = vadd.f32 %v930_v16, %v886_v12  ;;  %v4503_v31 = vadd.f32 %v931_v30, %v887_v3  ;;  %6961 = vst [vmem:[#allocation21_spill] sm:$0xff] %v4510_v10  ;;  %v4554_v11 = vld [vmem:[%s3912_s23 + $0xb8] sm:$0xf] }
 0x100   : > { %v4505_v33 = vadd.f32 %v932_v41, %v888_v20  ;;  %v4507_v4 = vadd.f32 %v933_v51, %v889_v13  ;;  %v4512_v63 = vadd.f32 %v934_v18, %v890_v15  ;;  %v4514_v57 = vadd.f32 %v935_v58, %v891_v24  ;;  %v4532_v20 = vld [vmem:[%s3912_s23 + $0x88] sm:$0xf]  ;;  %6965 = vst [vmem:[#allocation33_spill] sm:$0xff] %v4554_v11 }
 0x101   : > { %v4516_v28 = vadd.f32 %v936_v6, %v892_v42  ;;  %v4518_v50 = vadd.f32 %v937_v25, %v893_v39  ;;  %v4523_v35 = vadd.f32 %v938_v36, %v894_v14  ;;  %v4525_v48 = vadd.f32 %v939_v37, %v895_v40  ;;  %6963 = vst [vmem:[#allocation27_spill] sm:$0xff] %v4532_v20  ;;  %v4543_v39 = vld [vmem:[%s3912_s23 + $0xa0] sm:$0xf] }
 0x102   : > { %v957_v12 = vmul.f32 %v4458_v0, %v6927_v43  ;;  %v958_v3 = vmul.f32 %v4458_v0, %v6928_v45  ;;  %v959_v13 = vmul.f32 %v4496_v60, %v4458_v0  ;;  %v960_v15 = vmul.f32 %v4458_v0, %v6930_v27  ;;  %6964 = vst [vmem:[#allocation30_spill] sm:$0xff] %v4543_v39 }
 0x103   : > { %v961_v24 = vmul.f32 %v4458_v0, %v6931_v29  ;;  %v962_v42 = vmul.f32 %v4499_v52, %v4458_v0  ;;  %v963_v14 = vmul.f32 %v4458_v0, %v6950_v47  ;;  %v964_v40 = vmul.f32 %v4458_v0, %v6951_v23 }
 0x104   : > { %v965_v53 = vmul.f32 %v4510_v10, %v4458_v0  ;;  %v966_v32 = vmul.f32 %v4458_v0, %v6952_v5  ;;  %v967_v62 = vmul.f32 %v4458_v0, %v6953_v56  ;;  %v968_v55 = vmul.f32 %v4521_v2, %v4458_v0 }
 0x105   : > { %v969_v16 = vmul.f32 %v4458_v0, %v6954_v46  ;;  %v970_v30 = vmul.f32 %v4458_v0, %v6955_v1  ;;  %v971_v41 = vmul.f32 %v4532_v20, %v4458_v0  ;;  %v972_v51 = vmul.f32 %v4458_v0, %v6956_v22 }
 0x106   : > { %v1005_v18 = vrot.slane %v957_v12, 1  ;;  %v1006_v58 = vrot.slane %v958_v3, 1  ;;  %v973_v6 = vmul.f32 %v4458_v0, %v6957_v7  ;;  %v974_v25 = vmul.f32 %v4543_v39, %v4458_v0 }
 0x107   : > { %v975_v36 = vmul.f32 %v4458_v0, %v6958_v44  ;;  %v976_v37 = vmul.f32 %v4458_v0, %v6959_v8  ;;  %v977_v20 = vmul.f32 %v4554_v11, %v4458_v0  ;;  %v978_v22 = vmul.f32 %v4464_v17, %v4458_v0 }
 0x108   : > { %v979_v12 = vmul.f32 %v4467_v19, %v4458_v0  ;;  %v980_v3 = vmul.f32 %v4557_v61, %v4458_v0  ;;  %v1008_v7 = vrot.slane %v959_v13, 1  ;;  %v1010_v39 = vrot.slane %v960_v15, 1 }
 0x109   : > { %v1011_v1 = vrot.slane %v961_v24, 1  ;;  %v1013_v46 = vrot.slane %v962_v42, 1  ;;  %v1007_v44 = vsel %vm457_vm0, %v1005_v18, %v1006_v58  ;;  %v1015_v2 = vrot.slane %v963_v14, 1 }
 0x10a   : > { %v1016_v8 = vrot.slane %v964_v40, 1  ;;  %v1018_v56 = vrot.slane %v965_v53, 1  ;;  %v1020_v5 = vrot.slane %v966_v32, 1  ;;  %v1021_v11 = vrot.slane %v967_v62, 1 }
 0x10b   : > { %v1023_v10 = vrot.slane %v968_v55, 1  ;;  %v1025_v23 = vrot.slane %v969_v16, 1  ;;  %v1026_v17 = vrot.slane %v970_v30, 1  ;;  %v1028_v47 = vrot.slane %v971_v41, 1  ;;  %v6972_v30 = vld [vmem:[#allocation28_spill] sm:$0xff] }
 0x10c   : > { %v1030_v52 = vrot.slane %v972_v51, 1  ;;  %v1031_v19 = vrot.slane %v973_v6, 1  ;;  %v1033_v29 = vrot.slane %v974_v25, 1  ;;  %v1035_v27 = vrot.slane %v975_v36, 1  ;;  %v6973_v51 = vld [vmem:[#allocation29_spill] sm:$0xff]  ;;  %v6974_v6 = vld [vmem:[#allocation24_spill] sm:$0xff] }
 0x10d   : > { %v1036_v0 = vrot.slane %v976_v37, 1  ;;  %v1038_v13 = vrot.slane %v977_v20, 1  ;;  %v1009_v15 = vsel %vm457_vm0, %v1006_v58, %v1008_v7  ;;  %v1040_v24 = vrot.slane %v978_v22, 1  ;;  %v6975_v36 = vld [vmem:[#allocation31_spill] sm:$0xff] }
 0x10e   : > { %v1041_v42 = vrot.slane %v979_v12, 1  ;;  %v1043_v18 = vrot.slane %v980_v3, 1  ;;  %v1012_v14 = vsel %vm457_vm0, %v1010_v39, %v1011_v1  ;;  %v1014_v40 = vsel %vm457_vm0, %v1011_v1, %v1013_v46  ;;  %v6976_v12 = vld [vmem:[#allocation32_spill] sm:$0xff] }
 0x10f   : > { %v1017_v53 = vsel %vm457_vm0, %v1015_v2, %v1016_v8  ;;  %v1019_v32 = vsel %vm457_vm0, %v1016_v8, %v1018_v56  ;;  %v1022_v62 = vsel %vm457_vm0, %v1020_v5, %v1021_v11  ;;  %v1024_v55 = vsel %vm457_vm0, %v1021_v11, %v1023_v10  ;;  %v6969_v2 = vld [vmem:[#allocation25_spill] sm:$0xff] }
 0x110   : > { %v1027_v16 = vsel %vm457_vm0, %v1025_v23, %v1026_v17  ;;  %v1029_v20 = vsel %vm457_vm0, %v1026_v17, %v1028_v47  ;;  %v1032_v22 = vsel %vm457_vm0, %v1030_v52, %v1031_v19  ;;  %v1034_v7 = vsel %vm457_vm0, %v1031_v19, %v1033_v29 }
 0x111   : > { %v1037_v39 = vsel %vm457_vm0, %v1035_v27, %v1036_v0  ;;  %v1039_v46 = vsel %vm457_vm0, %v1036_v0, %v1038_v13  ;;  %v1042_v1 = vsel %vm457_vm0, %v1040_v24, %v1041_v42  ;;  %v1044_v56 = vsel %vm457_vm0, %v1041_v42, %v1043_v18  ;;  %v6977_v0 = vld [vmem:[#allocation27_spill] sm:$0xff] }
 0x112   : > { %v4604_v5 = vadd.f32 %v1007_v44, %v4483_v34  ;;  %v4607_v8 = vadd.f32 %v1009_v15, %v4485_v38  ;;  %v4610_v17 = vadd.f32 %v1012_v14, %v4487_v59  ;;  %v4613_v47 = vadd.f32 %v1014_v40, %v4489_v54  ;;  %v6978_v15 = vld [vmem:[#allocation34_spill] sm:$0xff]  ;;  %v6979_v14 = vld [vmem:[#allocation35_spill] sm:$0xff] }
 0x113   : > { %v4616_v27 = vadd.f32 %v1017_v53, %v4491_v26  ;;  %v4619_v29 = vadd.f32 %v1019_v32, %v4493_v49  ;;  %v4622_v19 = vadd.f32 %v1022_v62, %v4501_v9  ;;  %v4625_v23 = vadd.f32 %v1024_v55, %v4503_v31  ;;  %v6980_v53 = vld [vmem:[#allocation30_spill] sm:$0xff]  ;;  %v6981_v62 = vld [vmem:[#allocation37_spill] sm:$0xff] }
 0x114   : > { %v4628_v44 = vadd.f32 %v1027_v16, %v4505_v33  ;;  %v4631_v34 = vadd.f32 %v1029_v20, %v4507_v4  ;;  %v4634_v38 = vadd.f32 %v1032_v22, %v4512_v63  ;;  %v4637_v59 = vadd.f32 %v1034_v7, %v4514_v57  ;;  %v6966_v4 = vld [vmem:[#allocation22_spill] sm:$0xff]  ;;  %v6967_v63 = vld [vmem:[#allocation23_spill] sm:$0xff]  ;;  %v6983_v22 = vld [vmem:[#allocation33_spill] sm:$0xff] }
 0x115   : > { %v4640_v54 = vadd.f32 %v1037_v39, %v4516_v28  ;;  %v4643_v26 = vadd.f32 %v1039_v46, %v4518_v50  ;;  %v4646_v49 = vadd.f32 %v1042_v1, %v4523_v35  ;;  %v4649_v52 = vadd.f32 %v1044_v56, %v4525_v48  ;;  %v6968_v28 = vld [vmem:[#allocation20_spill] sm:$0xff]  ;;  %v6970_v48 = vld [vmem:[#allocation26_spill] sm:$0xff]  ;;  %v6984_v39 = vld [vmem:[#allocation39_spill] sm:$0xff] }
 0x116   : > { %v1078_v9 = vmul.f32 %v4461_v21, %v6927_v43  ;;  %v1079_v31 = vmul.f32 %v4461_v21, %v6928_v45  ;;  %v1080_v33 = vmul.f32 %v4496_v60, %v4461_v21  ;;  %v1081_v10 = vmul.f32 %v4461_v21, %v6966_v4  ;;  %v6971_v45 = vld [vmem:[#allocation21_spill] sm:$0xff]  ;;  %v6982_v16 = vld [vmem:[#allocation38_spill] sm:$0xff]  ;;  %v6985_v1 = vld [vmem:[#allocation19_spill] sm:$0xff] }
 0x117   : > { %v1082_v57 = vmul.f32 %v4461_v21, %v6967_v63  ;;  %v1083_v50 = vmul.f32 %v6968_v28, %v4461_v21  ;;  %v1084_v35 = vmul.f32 %v4461_v21, %v6969_v2  ;;  %v1085_v43 = vmul.f32 %v4461_v21, %v6970_v48 }
 0x118   : > { %v1086_v11 = vmul.f32 %v6971_v45, %v4461_v21  ;;  %v1087_v41 = vmul.f32 %v4461_v21, %v6972_v30  ;;  %v1088_v58 = vmul.f32 %v4461_v21, %v6973_v51  ;;  %v1089_v25 = vmul.f32 %v6974_v6, %v4461_v21 }
 0x119   : > { %v1090_v37 = vmul.f32 %v4461_v21, %v6975_v36  ;;  %v1091_v3 = vmul.f32 %v4461_v21, %v6976_v12  ;;  %v1092_v13 = vmul.f32 %v6977_v0, %v4461_v21  ;;  %v1093_v24 = vmul.f32 %v4461_v21, %v6978_v15 }
 0x11a   : > { %v1126_v42 = vrot.slane %v1078_v9, 2  ;;  %v1127_v18 = vrot.slane %v1079_v31, 2  ;;  %v1094_v40 = vmul.f32 %v4461_v21, %v6979_v14  ;;  %v1095_v32 = vmul.f32 %v6980_v53, %v4461_v21 }
 0x11b   : > { %v1096_v55 = vmul.f32 %v4461_v21, %v6981_v62  ;;  %v1097_v20 = vmul.f32 %v4461_v21, %v6982_v16  ;;  %v1098_v7 = vmul.f32 %v6983_v22, %v4461_v21  ;;  %v1099_v46 = vmul.f32 %v6984_v39, %v4461_v21 }
 0x11c   : > { %v1100_v56 = vmul.f32 %v6985_v1, %v4461_v21  ;;  %v1101_v9 = vmul.f32 %v4557_v61, %v4461_v21  ;;  %v1129_v31 = vrot.slane %v1080_v33, 2  ;;  %v1131_v4 = vrot.slane %v1081_v10, 2 }
 0x11d   : > { %v1132_v63 = vrot.slane %v1082_v57, 2  ;;  %v1134_v2 = vrot.slane %v1083_v50, 2  ;;  %v1128_v48 = vsel %vm579_vm1, %v1126_v42, %v1127_v18  ;;  %v1136_v30 = vrot.slane %v1084_v35, 2 }
 0x11e   : > { %v1137_v51 = vrot.slane %v1085_v43, 2  ;;  %v1139_v36 = vrot.slane %v1086_v11, 2  ;;  %v1141_v12 = vrot.slane %v1087_v41, 2  ;;  %v1142_v15 = vrot.slane %v1088_v58, 2  ;;  %v4705_v58 = vld [vmem:[#allocation6 + $0x8] sm:$0xff] }
 0x11f   : > { %v1144_v14 = vrot.slane %v1089_v25, 2  ;;  %v1146_v62 = vrot.slane %v1090_v37, 2  ;;  %v1147_v16 = vrot.slane %v1091_v3, 2  ;;  %v1149_v39 = vrot.slane %v1092_v13, 2  ;;  %6986 = vst [vmem:[#allocation36_spill] sm:$0xff] %v4705_v58 }
 0x120   : > { %v1151_v22 = vrot.slane %v1093_v24, 2  ;;  %v1152_v1 = vrot.slane %v1094_v40, 2  ;;  %v1154_v53 = vrot.slane %v1095_v32, 2  ;;  %v1156_v0 = vrot.slane %v1096_v55, 2 }
 0x121   : > { %v1157_v21 = vrot.slane %v1097_v20, 2  ;;  %v1159_v33 = vrot.slane %v1098_v7, 2  ;;  %v1130_v10 = vsel %vm579_vm1, %v1127_v18, %v1129_v31  ;;  %v1161_v57 = vrot.slane %v1099_v46, 2  ;;  %v4783_v31 = vld [vmem:[%s3912_s23 + $0x38] sm:$0xff] }
 0x122   : > { %v1162_v50 = vrot.slane %v1100_v56, 2  ;;  %v1164_v42 = vrot.slane %v1101_v9, 2  ;;  %v1133_v35 = vsel %vm579_vm1, %v1131_v4, %v1132_v63  ;;  %v1135_v43 = vsel %vm579_vm1, %v1132_v63, %v1134_v2  ;;  %6987 = vst [vmem:[#allocation18_spill] sm:$0xff] %v4783_v31  ;;  %v4788_v2 = vld [vmem:[%s3912_s23 + $0x48] sm:$0xff] }
 0x123   : > { %v1138_v11 = vsel %vm579_vm1, %v1136_v30, %v1137_v51  ;;  %v1140_v41 = vsel %vm579_vm1, %v1137_v51, %v1139_v36  ;;  %v1143_v25 = vsel %vm579_vm1, %v1141_v12, %v1142_v15  ;;  %v1145_v37 = vsel %vm579_vm1, %v1142_v15, %v1144_v14  ;;  %6988 = vst [vmem:[#allocation22_spill] sm:$0xff] %v4788_v2  ;;  %v4792_v30 = vld [vmem:[%s3912_s23 + $0x50] sm:$0xff]  ;;  %v4797_v12 = vld [vmem:[%s3912_s23 + $0x60] sm:$0xff]  ;;  %v4801_v14 = vld [vmem:[%s3912_s23 + $0x68] sm:$0xff] }
 0x124   : > { %v1148_v3 = vsel %vm579_vm1, %v1146_v62, %v1147_v16  ;;  %v1150_v13 = vsel %vm579_vm1, %v1147_v16, %v1149_v39  ;;  %v1153_v24 = vsel %vm579_vm1, %v1151_v22, %v1152_v1  ;;  %v1155_v18 = vsel %vm579_vm1, %v1152_v1, %v1154_v53  ;;  %6989 = vst [vmem:[#allocation23_spill] sm:$0xff] %v4792_v30 }
 0x125   : > { %v1158_v40 = vsel %vm579_vm1, %v1156_v0, %v1157_v21  ;;  %v1160_v32 = vsel %vm579_vm1, %v1157_v21, %v1159_v33  ;;  %v1163_v55 = vsel %vm579_vm1, %v1161_v57, %v1162_v50  ;;  %v1165_v20 = vsel %vm579_vm1, %v1162_v50, %v1164_v42  ;;  %6990 = vst [vmem:[#allocation25_spill] sm:$0xff] %v4797_v12  ;;  %v4806_v21 = vld [vmem:[%s3912_s23 + $0x78] sm:$0xff]  ;;  %v6994_v50 = vld [vmem:[#allocation27_spill] sm:$0xff] }
 0x126   : > { %v4718_v7 = vadd.f32 %v1128_v48, %v4604_v5  ;;  %v4721_v46 = vadd.f32 %v1130_v10, %v4607_v8  ;;  %v4724_v39 = vadd.f32 %v1133_v35, %v4610_v17  ;;  %v4727_v53 = vadd.f32 %v1135_v43, %v4613_v47  ;;  %6991 = vst [vmem:[#allocation26_spill] sm:$0xff] %v4801_v14  ;;  %v4810_v10 = vld [vmem:[%s3912_s23 + $0x80] sm:$0xff]  ;;  %v4815_v35 = vld [vmem:[%s3912_s23 + $0x90] sm:$0xff] }
 0x127   : > { %v4730_v0 = vadd.f32 %v1138_v11, %v4616_v27  ;;  %v1198_v22 = vperm.slane %v4705_v58, 0  ;;  %v4734_v1 = vadd.f32 %v1140_v41, %v4619_v29  ;;  %v4737_v5 = vadd.f32 %v1143_v25, %v4622_v19  ;;  %6992 = vst [vmem:[#allocation28_spill] sm:$0xff] %v4806_v21  ;;  %v4819_v11 = vld [vmem:[%s3912_s23 + $0x98] sm:$0xff] }
 0x128   : > { %v4740_v8 = vadd.f32 %v1145_v37, %v4625_v23  ;;  %v4743_v17 = vadd.f32 %v1148_v3, %v4628_v44  ;;  %v4746_v47 = vadd.f32 %v1150_v13, %v4631_v34  ;;  %v4749_v27 = vadd.f32 %v1153_v24, %v4634_v38  ;;  %6993 = vst [vmem:[#allocation29_spill] sm:$0xff] %v4810_v10  ;;  %v6997_v13 = vld [vmem:[#allocation30_spill] sm:$0xff] }
 0x129   : > { %v4752_v29 = vadd.f32 %v1155_v18, %v4637_v59  ;;  %v4755_v19 = vadd.f32 %v1158_v40, %v4640_v54  ;;  %v4758_v23 = vadd.f32 %v1160_v32, %v4643_v26  ;;  %v4761_v44 = vadd.f32 %v1163_v55, %v4646_v49  ;;  %v4770_v59 = vld [vmem:[%s3912_s23 + $0x18] sm:$0xff]  ;;  %v4774_v54 = vld [vmem:[%s3912_s23 + $0x20] sm:$0xff]  ;;  %v4779_v49 = vld [vmem:[%s3912_s23 + $0x30] sm:$0xff]  ;;  %6995 = vst [vmem:[#allocation31_spill] sm:$0xff] %v4815_v35 }
 0x12a   : > { %v4764_v34 = vadd.f32 %v1165_v20, %v4649_v52  ;;  %v4767_v38 = vperm.slane %v4705_v58, 1  ;;  %v1199_v56 = vmul.f32 %v4770_v59, %v1198_v22  ;;  %v1200_v26 = vmul.f32 %v4774_v54, %v1198_v22  ;;  %6996 = vst [vmem:[#allocation32_spill] sm:$0xff] %v4819_v11  ;;  %v4824_v18 = vld [vmem:[%s3912_s23 + $0xa8] sm:$0xff]  ;;  %v4828_v32 = vld [vmem:[%s3912_s23 + $0xb0] sm:$0xff]  ;;  %v7000_v20 = vld [vmem:[#allocation33_spill] sm:$0xff] }
 0x12b   : > { %v1201_v9 = vmul.f32 %v4496_v60, %v1198_v22  ;;  %v1202_v52 = vmul.f32 %v4779_v49, %v1198_v22  ;;  %v1203_v4 = vmul.f32 %v4783_v31, %v1198_v22  ;;  %v1204_v63 = vmul.f32 %v6968_v28, %v1198_v22  ;;  %6998 = vst [vmem:[#allocation34_spill] sm:$0xff] %v4824_v18 }
 0x12c   : > { %v1205_v48 = vmul.f32 %v4788_v2, %v1198_v22  ;;  %v1206_v51 = vmul.f32 %v4792_v30, %v1198_v22  ;;  %v1207_v36 = vmul.f32 %v6971_v45, %v1198_v22  ;;  %v1208_v15 = vmul.f32 %v4797_v12, %v1198_v22  ;;  %6999 = vst [vmem:[#allocation35_spill] sm:$0xff] %v4828_v32 }
 0x12d   : > { %v1209_v62 = vmul.f32 %v4801_v14, %v1198_v22  ;;  %v1210_v16 = vmul.f32 %v6974_v6, %v1198_v22  ;;  %v1211_v33 = vmul.f32 %v4806_v21, %v1198_v22  ;;  %v1212_v57 = vmul.f32 %v4810_v10, %v1198_v22  ;;  %v7002_v10 = vld [vmem:[#allocation19_spill] sm:$0xff] }
 0x12e   : > { %v1213_v42 = vmul.f32 %v6994_v50, %v1198_v22  ;;  %v1214_v43 = vmul.f32 %v4815_v35, %v1198_v22  ;;  %v1215_v41 = vmul.f32 %v4819_v11, %v1198_v22  ;;  %v1247_v25 = vrot.slane %v1199_v56, 3  ;;  %v7001_v35 = vld [vmem:[#allocation39_spill] sm:$0xff] }
 0x12f   : > { %v1248_v37 = vrot.slane %v1200_v26, 3  ;;  %v1250_v3 = vrot.slane %v1201_v9, 3  ;;  %v1216_v24 = vmul.f32 %v6997_v13, %v1198_v22  ;;  %v1217_v40 = vmul.f32 %v4824_v18, %v1198_v22 }
 0x130   : > { %v1218_v55 = vmul.f32 %v4828_v32, %v1198_v22  ;;  %v1219_v58 = vmul.f32 %v7000_v20, %v1198_v22  ;;  %v1220_v50 = vmul.f32 %v7001_v35, %v1198_v22  ;;  %v1221_v21 = vmul.f32 %v7002_v10, %v1198_v22 }
 0x131   : > { %v1222_v56 = vmul.f32 %v4557_v61, %v1198_v22  ;;  %v1252_v26 = vrot.slane %v1202_v52, 3  ;;  %v1253_v9 = vrot.slane %v1203_v4, 3  ;;  %v1255_v11 = vrot.slane %v1204_v63, 3 }
 0x132   : > { %v1257_v13 = vrot.slane %v1205_v48, 3  ;;  %v1258_v6 = vrot.slane %v1206_v51, 3  ;;  %v1249_v14 = vsel %vm701_vm2, %v1247_v25, %v1248_v37  ;;  %v1251_v18 = vsel %vm701_vm2, %v1248_v37, %v1250_v3 }
 0x133   : > { %v1260_v12 = vrot.slane %v1207_v36, 3  ;;  %v1262_v45 = vrot.slane %v1208_v15, 3  ;;  %v1263_v32 = vrot.slane %v1209_v62, 3  ;;  %v1265_v30 = vrot.slane %v1210_v16, 3 }
 0x134   : > { %v1267_v20 = vrot.slane %v1211_v33, 3  ;;  %v1268_v2 = vrot.slane %v1212_v57, 3  ;;  %v1270_v35 = vrot.slane %v1213_v42, 3  ;;  %v1272_v28 = vrot.slane %v1214_v43, 3 }
 0x135   : > { %v1273_v10 = vrot.slane %v1215_v41, 3  ;;  %v1275_v31 = vrot.slane %v1216_v24, 3  ;;  %v1254_v22 = vsel %vm701_vm2, %v1252_v26, %v1253_v9  ;;  %v1277_v52 = vrot.slane %v1217_v40, 3  ;;  %v7013_v26 = vld [vmem:[#allocation27_spill] sm:$0xff] }
 0x136   : > { %v1278_v4 = vrot.slane %v1218_v55, 3  ;;  %v1280_v63 = vrot.slane %v1219_v58, 3  ;;  %v1256_v48 = vsel %vm701_vm2, %v1253_v9, %v1255_v11  ;;  %v1282_v51 = vrot.slane %v1220_v50, 3 }
 0x137   : > { %v1283_v25 = vrot.slane %v1221_v21, 3  ;;  %v1285_v37 = vrot.slane %v1222_v56, 3  ;;  %v1259_v36 = vsel %vm701_vm2, %v1257_v13, %v1258_v6  ;;  %v1261_v15 = vsel %vm701_vm2, %v1258_v6, %v1260_v12 }
 0x138   : > { %v1264_v62 = vsel %vm701_vm2, %v1262_v45, %v1263_v32  ;;  %v1266_v16 = vsel %vm701_vm2, %v1263_v32, %v1265_v30  ;;  %v1269_v33 = vsel %vm701_vm2, %v1267_v20, %v1268_v2  ;;  %v1271_v57 = vsel %vm701_vm2, %v1268_v2, %v1270_v35  ;;  %v7011_v32 = vld [vmem:[#allocation28_spill] sm:$0xff]  ;;  %v7012_v20 = vld [vmem:[#allocation29_spill] sm:$0xff] }
 0x139   : > { %v1274_v42 = vsel %vm701_vm2, %v1272_v28, %v1273_v10  ;;  %v1276_v58 = vsel %vm701_vm2, %v1273_v10, %v1275_v31  ;;  %v1279_v50 = vsel %vm701_vm2, %v1277_v52, %v1278_v4  ;;  %v1281_v21 = vsel %vm701_vm2, %v1278_v4, %v1280_v63  ;;  %v7015_v4 = vld [vmem:[#allocation32_spill] sm:$0xff] }
 0x13a   : > { %v4850_v43 = vadd.f32 %v1249_v14, %v4718_v7  ;;  %v4853_v6 = vadd.f32 %v1251_v18, %v4721_v46  ;;  %v1284_v45 = vsel %vm701_vm2, %v1282_v51, %v1283_v25  ;;  %v1286_v30 = vsel %vm701_vm2, %v1283_v25, %v1285_v37  ;;  %v7010_v18 = vld [vmem:[#allocation24_spill] sm:$0xff]  ;;  %v7016_v37 = vld [vmem:[#allocation30_spill] sm:$0xff] }
 0x13b   : > { %v4858_v2 = vadd.f32 %v1254_v22, %v4724_v39  ;;  %v4861_v28 = vadd.f32 %v1256_v48, %v4727_v53  ;;  %v4864_v31 = vadd.f32 %v1259_v36, %v4730_v0  ;;  %v4867_v12 = vadd.f32 %v1261_v15, %v4734_v1  ;;  %v7014_v22 = vld [vmem:[#allocation31_spill] sm:$0xff]  ;;  %v7017_v15 = vld [vmem:[#allocation34_spill] sm:$0xff] }
 0x13c   : > { %v4870_v7 = vadd.f32 %v1264_v62, %v4737_v5  ;;  %v4873_v46 = vadd.f32 %v1266_v16, %v4740_v8  ;;  %v4876_v14 = vadd.f32 %v1269_v33, %v4743_v17  ;;  %v4879_v39 = vadd.f32 %v1271_v57, %v4746_v47  ;;  %v7018_v16 = vld [vmem:[#allocation35_spill] sm:$0xff]  ;;  %v7019_v57 = vld [vmem:[#allocation33_spill] sm:$0xff] }
 0x13d   : > { %v4882_v53 = vadd.f32 %v1274_v42, %v4749_v27  ;;  %v4885_v0 = vadd.f32 %v1276_v58, %v4752_v29  ;;  %v4888_v1 = vadd.f32 %v1279_v50, %v4755_v19  ;;  %v4891_v5 = vadd.f32 %v1281_v21, %v4758_v23  ;;  %v7003_v23 = vld [vmem:[#allocation18_spill] sm:$0xff]  ;;  %v7020_v58 = vld [vmem:[#allocation39_spill] sm:$0xff] }
 0x13e   : > { %v4894_v8 = vadd.f32 %v1284_v45, %v4761_v44  ;;  %v4897_v17 = vadd.f32 %v1286_v30, %v4764_v34  ;;  %v1320_v47 = vmul.f32 %v4770_v59, %v4767_v38  ;;  %v1321_v27 = vmul.f32 %v4774_v54, %v4767_v38  ;;  %v7004_v44 = vld [vmem:[#allocation20_spill] sm:$0xff]  ;;  %v7005_v34 = vld [vmem:[#allocation22_spill] sm:$0xff]  ;;  %v7006_v59 = vld [vmem:[#allocation23_spill] sm:$0xff] }
 0x13f   : > { %v1322_v29 = vmul.f32 %v4496_v60, %v4767_v38  ;;  %v1323_v19 = vmul.f32 %v4779_v49, %v4767_v38  ;;  %v1324_v10 = vmul.f32 %v7003_v23, %v4767_v38  ;;  %v1325_v35 = vmul.f32 %v7004_v44, %v4767_v38  ;;  %v7007_v54 = vld [vmem:[#allocation21_spill] sm:$0xff]  ;;  %v7009_v49 = vld [vmem:[#allocation26_spill] sm:$0xff]  ;;  %v7021_v21 = vld [vmem:[#allocation19_spill] sm:$0xff] }
 0x140   : > { %v1326_v11 = vmul.f32 %v7005_v34, %v4767_v38  ;;  %v1327_v41 = vmul.f32 %v7006_v59, %v4767_v38  ;;  %v1328_v3 = vmul.f32 %v7007_v54, %v4767_v38  ;;  %v7008_v60 = vld [vmem:[#allocation25_spill] sm:$0xff]  ;;  %v1330_v24 = vmul.f32 %v7009_v49, %v4767_v38 }
 0x141   : > { %v1329_v13 = vmul.f32 %v7008_v60, %v4767_v38  ;;  %v1331_v40 = vmul.f32 %v7010_v18, %v4767_v38  ;;  %v1332_v55 = vmul.f32 %v7011_v32, %v4767_v38  ;;  %v1333_v56 = vmul.f32 %v7012_v20, %v4767_v38 }
 0x142   : > { %v1334_v9 = vmul.f32 %v7013_v26, %v4767_v38  ;;  %v1335_v52 = vmul.f32 %v7014_v22, %v4767_v38  ;;  %v1336_v63 = vmul.f32 %v7015_v4, %v4767_v38  ;;  %v1368_v48 = vrot.slane %v1320_v47, 4 }
 0x143   : > { %v1369_v51 = vrot.slane %v1321_v27, 4  ;;  %v1371_v25 = vrot.slane %v1322_v29, 4  ;;  %v1337_v36 = vmul.f32 %v7016_v37, %v4767_v38  ;;  %v1338_v62 = vmul.f32 %v7017_v15, %v4767_v38 }
 0x144   : > { %v1339_v33 = vmul.f32 %v7018_v16, %v4767_v38  ;;  %v1340_v42 = vmul.f32 %v7019_v57, %v4767_v38  ;;  %v1341_v50 = vmul.f32 %v7020_v58, %v4767_v38  ;;  %v1342_v45 = vmul.f32 %v7021_v21, %v4767_v38 }
 0x145   : > { %v1343_v30 = vmul.f32 %v4557_v61, %v4767_v38  ;;  %v1373_v47 = vrot.slane %v1323_v19, 4  ;;  %v1374_v27 = vrot.slane %v1324_v10, 4  ;;  %v1376_v29 = vrot.slane %v1325_v35, 4 }
 0x146   : > { %v1378_v23 = vrot.slane %v1326_v11, 4  ;;  %v1379_v44 = vrot.slane %v1327_v41, 4  ;;  %v1370_v34 = vsel %vm823_vm3, %v1368_v48, %v1369_v51  ;;  %v1372_v59 = vsel %vm823_vm3, %v1369_v51, %v1371_v25 }
 0x147   : > { %v1381_v54 = vrot.slane %v1328_v3, 4  ;;  %v1383_v60 = vrot.slane %v1329_v13, 4  ;;  %v1384_v49 = vrot.slane %v1330_v24, 4  ;;  %v1386_v18 = vrot.slane %v1331_v40, 4 }
 0x148   : > { %v1388_v32 = vrot.slane %v1332_v55, 4  ;;  %v1389_v20 = vrot.slane %v1333_v56, 4  ;;  %v1391_v26 = vrot.slane %v1334_v9, 4  ;;  %v1393_v22 = vrot.slane %v1335_v52, 4 }
 0x149   : > { %v1394_v4 = vrot.slane %v1336_v63, 4  ;;  %v1396_v37 = vrot.slane %v1337_v36, 4  ;;  %v1375_v61 = vsel %vm823_vm3, %v1373_v47, %v1374_v27  ;;  %v1398_v38 = vrot.slane %v1338_v62, 4  ;;  %v4978_v47 = vld [vmem:[%s3912_s23 + $0x48] sm:$0xff] }
 0x14a   : > { %v1399_v19 = vrot.slane %v1339_v33, 4  ;;  %v1401_v10 = vrot.slane %v1340_v42, 4  ;;  %v1377_v35 = vsel %vm823_vm3, %v1374_v27, %v1376_v29  ;;  %v1403_v11 = vrot.slane %v1341_v50, 4  ;;  %v7022_v33 = vld [vmem:[#allocation36_spill] sm:$0xff]  ;;  %7023 = vst [vmem:[#allocation37_spill] sm:$0xff] %v4978_v47  ;;  %v4988_v27 = vld [vmem:[%s3912_s23 + $0x60] sm:$0xff] }
 0x14b   : > { %v1404_v41 = vrot.slane %v1342_v45, 4  ;;  %v1406_v48 = vrot.slane %v1343_v30, 4  ;;  %v1380_v3 = vsel %vm823_vm3, %v1378_v23, %v1379_v44  ;;  %v1382_v13 = vsel %vm823_vm3, %v1379_v44, %v1381_v54  ;;  %v4975_v30 = vld [vmem:[%s3912_s23 + $0x38] sm:$0xff]  ;;  %7025 = vst [vmem:[#allocation18_spill] sm:$0xff] %v4988_v27  ;;  %v4991_v29 = vld [vmem:[%s3912_s23 + $0x68] sm:$0xff] }
 0x14c   : > { %v1385_v24 = vsel %vm823_vm3, %v1383_v60, %v1384_v49  ;;  %v1387_v40 = vsel %vm823_vm3, %v1384_v49, %v1386_v18  ;;  %v1390_v55 = vsel %vm823_vm3, %v1388_v32, %v1389_v20  ;;  %v1392_v56 = vsel %vm823_vm3, %v1389_v20, %v1391_v26  ;;  %7026 = vst [vmem:[#allocation20_spill] sm:$0xff] %v4991_v29  ;;  %v5008_v54 = vld [vmem:[%s3912_s23 + $0x98] sm:$0xff]  ;;  %v5011_v60 = vld [vmem:[%s3912_s23 + $0xa8] sm:$0xff]  ;;  %v5014_v49 = vld [vmem:[%s3912_s23 + $0xb0] sm:$0xff] }
 0x14d   : > { %v1395_v9 = vsel %vm823_vm3, %v1393_v22, %v1394_v4  ;;  %v1397_v52 = vsel %vm823_vm3, %v1394_v4, %v1396_v37  ;;  %v1400_v63 = vsel %vm823_vm3, %v1398_v38, %v1399_v19  ;;  %v1402_v51 = vsel %vm823_vm3, %v1399_v19, %v1401_v10  ;;  %7030 = vst [vmem:[#allocation25_spill] sm:$0xff] %v5008_v54  ;;  %v5027_v18 = vld [vmem:[%s3912_s23 + $0xe0] sm:$0xff] }
 0x14e   : > { %v1424_v25 = vadd.f32 %v1370_v34, %v4850_v43  ;;  %v1425_v36 = vadd.f32 %v1372_v59, %v4853_v6  ;;  %v1405_v15 = vsel %vm823_vm3, %v1403_v11, %v1404_v41  ;;  %v1407_v62 = vsel %vm823_vm3, %v1404_v41, %v1406_v48  ;;  %v4972_v6 = vld [vmem:[%s3912_s23 + $0x30] sm:$0xff]  ;;  %v4998_v34 = vld [vmem:[%s3912_s23 + $0x78] sm:$0xff]  ;;  %7031 = vst [vmem:[#allocation26_spill] sm:$0xff] %v5011_v60 }
 0x14f   : > { %v1426_v16 = vadd.f32 %v1375_v61, %v4858_v2  ;;  %v1467_v57 = vperm.slane %v7022_v33, 2  ;;  %v1427_v42 = vadd.f32 %v1377_v35, %v4861_v28  ;;  %v1428_v50 = vadd.f32 %v1380_v3, %v4864_v31  ;;  %7027 = vst [vmem:[#allocation22_spill] sm:$0xff] %v4998_v34 }
 0x150   : > { %v1429_v45 = vadd.f32 %v1382_v13, %v4867_v12  ;;  %v1430_v43 = vadd.f32 %v1385_v24, %v4870_v7  ;;  %v1431_v2 = vadd.f32 %v1387_v40, %v4873_v46  ;;  %v1432_v28 = vadd.f32 %v1390_v55, %v4876_v14  ;;  %v4985_v7 = vld [vmem:[%s3912_s23 + $0x50] sm:$0xff]  ;;  %7032 = vst [vmem:[#allocation24_spill] sm:$0xff] %v5014_v49 }
 0x151   : > { %v1433_v31 = vadd.f32 %v1392_v56, %v4879_v39  ;;  %v1434_v12 = vadd.f32 %v1395_v9, %v4882_v53  ;;  %7024 = vst [vmem:[#allocation38_spill] sm:$0xff] %v4985_v7  ;;  %v1435_v23 = vadd.f32 %v1397_v52, %v4885_v0  ;;  %v1436_v46 = vadd.f32 %v1400_v63, %v4888_v1  ;;  %v5001_v39 = vld [vmem:[%s3912_s23 + $0x80] sm:$0xff]  ;;  %v5004_v53 = vld [vmem:[%s3912_s23 + $0x90] sm:$0xff] }
 0x152   : > { %v1437_v44 = vadd.f32 %v1402_v51, %v4891_v5  ;;  %v1438_v14 = vadd.f32 %v1405_v15, %v4894_v8  ;;  %7028 = vst [vmem:[#allocation23_spill] sm:$0xff] %v5001_v39  ;;  %v1439_v59 = vadd.f32 %v1407_v62, %v4897_v17  ;;  %v1468_v0 = vmul.f32 %v4972_v6, %v1467_v57  ;;  %v5024_v8 = vld [vmem:[%s3912_s23 + $0xd8] sm:$0xff]  ;;  %v5055_v56 = vld [vmem:[%s3912_s23 + $0x40] sm:$0xf] }
 0x153   : > { %7029 = vst [vmem:[#allocation21_spill] sm:$0xff] %v5004_v53  ;;  %v5018_v1 = vperm.slane %v7022_v33, 3  ;;  %v5021_v5 = vperm.slane %v7022_v33, 4  ;;  %v1469_v17 = vmul.f32 %v4975_v30, %v1467_v57  ;;  %v1470_v32 = vmul.f32 %v4978_v47, %v1467_v57 }
 0x154   : > { %7033 = vst [vmem:[#allocation28_spill] sm:$0xff] %v5024_v8  ;;  %v1471_v20 = vmul.f32 %v4985_v7, %v1467_v57  ;;  %v1472_v26 = vmul.f32 %v4988_v27, %v1467_v57  ;;  %v1473_v22 = vmul.f32 %v4991_v29, %v1467_v57  ;;  %v1474_v4 = vmul.f32 %v4998_v34, %v1467_v57 }
 0x155   : > { %7034 = vst [vmem:[#allocation29_spill] sm:$0xff] %v5027_v18  ;;  %v1475_v37 = vmul.f32 %v5001_v39, %v1467_v57  ;;  %v1476_v61 = vmul.f32 %v5004_v53, %v1467_v57  ;;  %v1477_v38 = vmul.f32 %v5008_v54, %v1467_v57  ;;  %v1478_v19 = vmul.f32 %v5011_v60, %v1467_v57 }
 0x156   : > { %v1479_v10 = vmul.f32 %v5014_v49, %v1467_v57  ;;  %v1480_v35 = vmul.f32 %v7020_v58, %v1467_v57  ;;  %v1481_v11 = vmul.f32 %v7021_v21, %v1467_v57  ;;  %v1482_v41 = vmul.f32 %v5024_v8, %v1467_v57 }
 0x157   : > { %v1483_v48 = vmul.f32 %v5027_v18, %v1467_v57  ;;  %v5044_v3 = vadd.f32 %v1468_v0, %v1424_v25  ;;  %v5046_v13 = vadd.f32 %v1469_v17, %v1425_v36  ;;  %v5048_v24 = vadd.f32 %v1470_v32, %v1426_v16  ;;  %v5066_v25 = vld [vmem:[%s3912_s23 + $0x58] sm:$0xf]  ;;  %v5069_v36 = vld [vmem:[%s3912_s23 + $0x70] sm:$0xf] }
 0x158   : > { %v5050_v40 = vadd.f32 %v1471_v20, %v1427_v42  ;;  %v5052_v55 = vadd.f32 %v1472_v26, %v1428_v50  ;;  %v5057_v9 = vadd.f32 %v1473_v22, %v1429_v45  ;;  %v5059_v52 = vadd.f32 %v1474_v4, %v1430_v43  ;;  %7035 = vst [vmem:[#allocation27_spill] sm:$0xff] %v5066_v25  ;;  %v5080_v42 = vld [vmem:[%s3912_s23 + $0x88] sm:$0xf]  ;;  %v5113_v32 = vld [vmem:[%s3912_s23 + $0xd0] sm:$0xf] }
 0x159   : > { %v5061_v63 = vadd.f32 %v1475_v37, %v1431_v2  ;;  %v5063_v51 = vadd.f32 %v1476_v61, %v1432_v28  ;;  %7036 = vst [vmem:[#allocation31_spill] sm:$0xff] %v5069_v36  ;;  %v5071_v15 = vadd.f32 %v1477_v38, %v1433_v31  ;;  %v5073_v62 = vadd.f32 %v1478_v19, %v1434_v12  ;;  %v5091_v28 = vld [vmem:[%s3912_s23 + $0xa0] sm:$0xf]  ;;  %v5124_v37 = vld [vmem:[%s3912_s23 + $0xe8] sm:$0xf] }
 0x15a   : > { %v5075_v16 = vadd.f32 %v1479_v10, %v1435_v23  ;;  %v5077_v57 = vadd.f32 %v1480_v35, %v1436_v46  ;;  %7037 = vst [vmem:[#allocation32_spill] sm:$0xff] %v5080_v42  ;;  %v5082_v50 = vadd.f32 %v1481_v11, %v1437_v44  ;;  %v5084_v45 = vadd.f32 %v1482_v41, %v1438_v14  ;;  %v5102_v44 = vld [vmem:[%s3912_s23 + $0xb8] sm:$0xf] }
 0x15b   : > { %v1501_v43 = vmul.f32 %v4972_v6, %v5018_v1  ;;  %v1502_v2 = vmul.f32 %v4975_v30, %v5018_v1  ;;  %7038 = vst [vmem:[#allocation30_spill] sm:$0xff] %v5091_v28  ;;  %v5093_v31 = vadd.f32 %v1483_v48, %v1439_v59  ;;  %v1503_v12 = vmul.f32 %v5055_v56, %v5018_v1 }
 0x15c   : > { %v1504_v23 = vmul.f32 %v4978_v47, %v5018_v1  ;;  %v1505_v46 = vmul.f32 %v4985_v7, %v5018_v1  ;;  %7039 = vst [vmem:[#allocation34_spill] sm:$0xff] %v5102_v44  ;;  %v1506_v14 = vmul.f32 %v5066_v25, %v5018_v1  ;;  %v1507_v0 = vmul.f32 %v4988_v27, %v5018_v1 }
 0x15d   : > { %v1508_v59 = vmul.f32 %v4991_v29, %v5018_v1  ;;  %v1509_v17 = vmul.f32 %v5069_v36, %v5018_v1  ;;  %7040 = vst [vmem:[#allocation35_spill] sm:$0xff] %v5113_v32  ;;  %v1510_v20 = vmul.f32 %v4998_v34, %v5018_v1  ;;  %v1511_v26 = vmul.f32 %v5001_v39, %v5018_v1 }
 0x15e   : > { %v1512_v22 = vmul.f32 %v5080_v42, %v5018_v1  ;;  %v1513_v4 = vmul.f32 %v5004_v53, %v5018_v1  ;;  %7041 = vst [vmem:[#allocation33_spill] sm:$0xff] %v5124_v37  ;;  %v1514_v61 = vmul.f32 %v5008_v54, %v5018_v1  ;;  %v1515_v38 = vmul.f32 %v5091_v28, %v5018_v1 }
 0x15f   : > { %v1549_v19 = vrot.slane %v1501_v43, 1  ;;  %v1550_v10 = vrot.slane %v1502_v2, 1  ;;  %v1516_v35 = vmul.f32 %v5011_v60, %v5018_v1  ;;  %v1517_v11 = vmul.f32 %v5014_v49, %v5018_v1 }
 0x160   : > { %v1518_v41 = vmul.f32 %v5102_v44, %v5018_v1  ;;  %v1519_v48 = vmul.f32 %v7020_v58, %v5018_v1  ;;  %v1520_v33 = vmul.f32 %v7021_v21, %v5018_v1  ;;  %v1521_v28 = vmul.f32 %v5113_v32, %v5018_v1 }
 0x161   : > { %v1522_v43 = vmul.f32 %v5024_v8, %v5018_v1  ;;  %v1523_v2 = vmul.f32 %v5027_v18, %v5018_v1  ;;  %v1524_v49 = vmul.f32 %v5124_v37, %v5018_v1  ;;  %v1552_v60 = vrot.slane %v1503_v12, 1 }
 0x162   : > { %v1554_v44 = vrot.slane %v1504_v23, 1  ;;  %v1555_v54 = vrot.slane %v1505_v46, 1  ;;  %v1551_v58 = vsel %vm457_vm0, %v1549_v19, %v1550_v10  ;;  %v1557_v53 = vrot.slane %v1506_v14, 1 }
 0x163   : > { %v1559_v42 = vrot.slane %v1507_v0, 1  ;;  %v1560_v21 = vrot.slane %v1508_v59, 1  ;;  %v1562_v39 = vrot.slane %v1509_v17, 1  ;;  %v1564_v34 = vrot.slane %v1510_v20, 1 }
 0x164   : > { %v1565_v32 = vrot.slane %v1511_v26, 1  ;;  %v1567_v36 = vrot.slane %v1512_v22, 1  ;;  %v1569_v29 = vrot.slane %v1513_v4, 1  ;;  %v1570_v8 = vrot.slane %v1514_v61, 1  ;;  %v7046_v61 = vld [vmem:[#allocation20_spill] sm:$0xff] }
 0x165   : > { %v1572_v27 = vrot.slane %v1515_v38, 1  ;;  %v1574_v25 = vrot.slane %v1516_v35, 1  ;;  %v1575_v18 = vrot.slane %v1517_v11, 1  ;;  %v1577_v7 = vrot.slane %v1518_v41, 1  ;;  %v7047_v38 = vld [vmem:[#allocation31_spill] sm:$0xff]  ;;  %v7048_v35 = vld [vmem:[#allocation22_spill] sm:$0xff] }
 0x166   : > { %v1579_v47 = vrot.slane %v1519_v48, 1  ;;  %v1580_v1 = vrot.slane %v1520_v33, 1  ;;  %v1553_v12 = vsel %vm457_vm0, %v1550_v10, %v1552_v60  ;;  %v1582_v23 = vrot.slane %v1521_v28, 1  ;;  %v7049_v41 = vld [vmem:[#allocation23_spill] sm:$0xff] }
 0x167   : > { %v1584_v46 = vrot.slane %v1522_v43, 1  ;;  %v1585_v19 = vrot.slane %v1523_v2, 1  ;;  %v1556_v14 = vsel %vm457_vm0, %v1554_v44, %v1555_v54  ;;  %v1558_v0 = vsel %vm457_vm0, %v1555_v54, %v1557_v53  ;;  %v7050_v43 = vld [vmem:[#allocation32_spill] sm:$0xff] }
 0x168   : > { %v1561_v59 = vsel %vm457_vm0, %v1559_v42, %v1560_v21  ;;  %v1587_v17 = vrot.slane %v1524_v49, 1  ;;  %v1563_v20 = vsel %vm457_vm0, %v1560_v21, %v1562_v39  ;;  %v1566_v26 = vsel %vm457_vm0, %v1564_v34, %v1565_v32  ;;  %v7044_v42 = vld [vmem:[#allocation27_spill] sm:$0xff] }
 0x169   : > { %v1568_v22 = vsel %vm457_vm0, %v1565_v32, %v1567_v36  ;;  %v1571_v33 = vsel %vm457_vm0, %v1569_v29, %v1570_v8  ;;  %v1573_v60 = vsel %vm457_vm0, %v1570_v8, %v1572_v27  ;;  %v1576_v28 = vsel %vm457_vm0, %v1574_v25, %v1575_v18 }
 0x16a   : > { %v1578_v4 = vsel %vm457_vm0, %v1575_v18, %v1577_v7  ;;  %v1581_v44 = vsel %vm457_vm0, %v1579_v47, %v1580_v1  ;;  %v1583_v53 = vsel %vm457_vm0, %v1580_v1, %v1582_v23  ;;  %v1586_v54 = vsel %vm457_vm0, %v1584_v46, %v1585_v19  ;;  %v7052_v1 = vld [vmem:[#allocation25_spill] sm:$0xff]  ;;  %v7053_v23 = vld [vmem:[#allocation30_spill] sm:$0xff] }
 0x16b   : > { %v5164_v39 = vadd.f32 %v1551_v58, %v5044_v3  ;;  %v5167_v34 = vadd.f32 %v1553_v12, %v5046_v13  ;;  %v1588_v29 = vsel %vm457_vm0, %v1585_v19, %v1587_v17  ;;  %v5171_v27 = vadd.f32 %v1556_v14, %v5048_v24  ;;  %v7051_v58 = vld [vmem:[#allocation21_spill] sm:$0xff]  ;;  %v7055_v17 = vld [vmem:[#allocation24_spill] sm:$0xff] }
 0x16c   : > { %v5174_v49 = vadd.f32 %v1558_v0, %v5050_v40  ;;  %v5177_v47 = vadd.f32 %v1561_v59, %v5052_v55  ;;  %v5180_v7 = vadd.f32 %v1563_v20, %v5057_v9  ;;  %v5183_v8 = vadd.f32 %v1566_v26, %v5059_v52  ;;  %v7054_v0 = vld [vmem:[#allocation26_spill] sm:$0xff] }
 0x16d   : > { %v5186_v18 = vadd.f32 %v1568_v22, %v5061_v63  ;;  %v5189_v3 = vadd.f32 %v1571_v33, %v5063_v51  ;;  %v5192_v13 = vadd.f32 %v1573_v60, %v5071_v15  ;;  %v5195_v24 = vadd.f32 %v1576_v28, %v5073_v62  ;;  %v7042_v15 = vld [vmem:[#allocation37_spill] sm:$0xff]  ;;  %v7056_v26 = vld [vmem:[#allocation34_spill] sm:$0xff]  ;;  %v5254_v28 = vld [vmem:[%s3912_s23 + $0xc8] sm:$0xff] }
 0x16e   : > { %v5198_v40 = vadd.f32 %v1578_v4, %v5075_v16  ;;  %v5201_v55 = vadd.f32 %v1581_v44, %v5077_v57  ;;  %v5204_v9 = vadd.f32 %v1583_v53, %v5082_v50  ;;  %v5207_v52 = vadd.f32 %v1586_v54, %v5084_v45  ;;  %v7043_v16 = vld [vmem:[#allocation38_spill] sm:$0xff]  ;;  %7058 = vst [vmem:[#allocation19_spill] sm:$0xff] %v5254_v28  ;;  %v7059_v44 = vld [vmem:[#allocation35_spill] sm:$0xff]  ;;  %v7060_v54 = vld [vmem:[#allocation28_spill] sm:$0xff] }
 0x16f   : > { %v1622_v63 = vmul.f32 %v4972_v6, %v5021_v5  ;;  %v1623_v51 = vmul.f32 %v4975_v30, %v5021_v5  ;;  %v5214_v25 = vadd.f32 %v1588_v29, %v5093_v31  ;;  %v1624_v36 = vmul.f32 %v5055_v56, %v5021_v5  ;;  %v7045_v45 = vld [vmem:[#allocation18_spill] sm:$0xff] }
 0x170   : > { %v1625_v62 = vmul.f32 %v7042_v15, %v5021_v5  ;;  %v1626_v57 = vmul.f32 %v7043_v16, %v5021_v5  ;;  %v1627_v50 = vmul.f32 %v7044_v42, %v5021_v5  ;;  %v1628_v32 = vmul.f32 %v7045_v45, %v5021_v5  ;;  %v5249_v33 = vld [vmem:[%s3912_s23 + $0xc0] sm:$0xff] }
 0x171   : > { %v1629_v31 = vmul.f32 %v7046_v61, %v5021_v5  ;;  %v1630_v10 = vmul.f32 %v7047_v38, %v5021_v5  ;;  %v1631_v11 = vmul.f32 %v7048_v35, %v5021_v5  ;;  %v1632_v48 = vmul.f32 %v7049_v41, %v5021_v5  ;;  %7057 = vst [vmem:[#allocation39_spill] sm:$0xff] %v5249_v33 }
 0x172   : > { %v1633_v2 = vmul.f32 %v7050_v43, %v5021_v5  ;;  %v1634_v21 = vmul.f32 %v7051_v58, %v5021_v5  ;;  %v1635_v12 = vmul.f32 %v7052_v1, %v5021_v5  ;;  %v1636_v46 = vmul.f32 %v7053_v23, %v5021_v5 }
 0x173   : > { %v1670_v19 = vrot.slane %v1622_v63, 2  ;;  %v1671_v14 = vrot.slane %v1623_v51, 2  ;;  %v1637_v59 = vmul.f32 %v7054_v0, %v5021_v5  ;;  %v1638_v20 = vmul.f32 %v7055_v17, %v5021_v5  ;;  %v7061_v63 = vld [vmem:[#allocation29_spill] sm:$0xff] }
 0x174   : > { %v1639_v22 = vmul.f32 %v7056_v26, %v5021_v5  ;;  %v1640_v60 = vmul.f32 %v5249_v33, %v5021_v5  ;;  %v1641_v4 = vmul.f32 %v5254_v28, %v5021_v5  ;;  %v1642_v53 = vmul.f32 %v7059_v44, %v5021_v5 }
 0x175   : > { %v1643_v29 = vmul.f32 %v7060_v54, %v5021_v5  ;;  %v1644_v51 = vmul.f32 %v7061_v63, %v5021_v5  ;;  %v1645_v26 = vmul.f32 %v5124_v37, %v5021_v5  ;;  %v1673_v17 = vrot.slane %v1624_v36, 2 }
 0x176   : > { %v1675_v0 = vrot.slane %v1625_v62, 2  ;;  %v1676_v33 = vrot.slane %v1626_v57, 2  ;;  %v1672_v23 = vsel %vm579_vm1, %v1670_v19, %v1671_v14  ;;  %v1678_v1 = vrot.slane %v1627_v50, 2 }
 0x177   : > { %v1680_v58 = vrot.slane %v1628_v32, 2  ;;  %v1681_v28 = vrot.slane %v1629_v31, 2  ;;  %v1683_v43 = vrot.slane %v1630_v10, 2  ;;  %v1685_v41 = vrot.slane %v1631_v11, 2 }
 0x178   : > { %v1686_v44 = vrot.slane %v1632_v48, 2  ;;  %v1688_v35 = vrot.slane %v1633_v2, 2  ;;  %v1690_v38 = vrot.slane %v1634_v21, 2  ;;  %v1691_v54 = vrot.slane %v1635_v12, 2 }
 0x179   : > { %v1693_v61 = vrot.slane %v1636_v46, 2  ;;  %v1695_v45 = vrot.slane %v1637_v59, 2  ;;  %v1696_v63 = vrot.slane %v1638_v20, 2  ;;  %v1698_v42 = vrot.slane %v1639_v22, 2  ;;  %v7063_v20 = vld [vmem:[#allocation38_spill] sm:$0xff] }
 0x17a   : > { %v1700_v16 = vrot.slane %v1640_v60, 2  ;;  %v1701_v5 = vrot.slane %v1641_v4, 2  ;;  %v1674_v36 = vsel %vm579_vm1, %v1671_v14, %v1673_v17  ;;  %v1703_v62 = vrot.slane %v1642_v53, 2  ;;  %v7066_v60 = vld [vmem:[#allocation20_spill] sm:$0xff] }
 0x17b   : > { %v1705_v57 = vrot.slane %v1643_v29, 2  ;;  %v1706_v19 = vrot.slane %v1644_v51, 2  ;;  %v1677_v50 = vsel %vm579_vm1, %v1675_v0, %v1676_v33  ;;  %v1679_v32 = vsel %vm579_vm1, %v1676_v33, %v1678_v1 }
 0x17c   : > { %v1682_v31 = vsel %vm579_vm1, %v1680_v58, %v1681_v28  ;;  %v1708_v10 = vrot.slane %v1645_v26, 2  ;;  %v1684_v11 = vsel %vm579_vm1, %v1681_v28, %v1683_v43  ;;  %v1687_v48 = vsel %vm579_vm1, %v1685_v41, %v1686_v44  ;;  %v7064_v26 = vld [vmem:[#allocation27_spill] sm:$0xff] }
 0x17d   : > { %v1689_v2 = vsel %vm579_vm1, %v1686_v44, %v1688_v35  ;;  %v1692_v21 = vsel %vm579_vm1, %v1690_v38, %v1691_v54  ;;  %v1694_v12 = vsel %vm579_vm1, %v1691_v54, %v1693_v61  ;;  %v1697_v46 = vsel %vm579_vm1, %v1695_v45, %v1696_v63  ;;  %v7067_v28 = vld [vmem:[#allocation31_spill] sm:$0xff]  ;;  %v7068_v44 = vld [vmem:[#allocation22_spill] sm:$0xff] }
 0x17e   : > { %v1699_v14 = vsel %vm579_vm1, %v1696_v63, %v1698_v42  ;;  %v1702_v0 = vsel %vm579_vm1, %v1700_v16, %v1701_v5  ;;  %v1704_v1 = vsel %vm579_vm1, %v1701_v5, %v1703_v62  ;;  %v1707_v58 = vsel %vm579_vm1, %v1705_v57, %v1706_v19  ;;  %v7062_v42 = vld [vmem:[#allocation36_spill] sm:$0xff]  ;;  %v7069_v54 = vld [vmem:[#allocation23_spill] sm:$0xff]  ;;  %v7071_v5 = vld [vmem:[#allocation21_spill] sm:$0xff] }
 0x17f   : > { %v5282_v43 = vadd.f32 %v1672_v23, %v5164_v39  ;;  %v5285_v41 = vadd.f32 %v1674_v36, %v5167_v34  ;;  %v1709_v38 = vsel %vm579_vm1, %v1706_v19, %v1708_v10  ;;  %v5289_v61 = vadd.f32 %v1677_v50, %v5171_v27  ;;  %v7070_v63 = vld [vmem:[#allocation32_spill] sm:$0xff]  ;;  %v7072_v62 = vld [vmem:[#allocation25_spill] sm:$0xff]  ;;  %v7073_v19 = vld [vmem:[#allocation30_spill] sm:$0xff] }
 0x180   : > { %v5292_v45 = vadd.f32 %v1679_v32, %v5174_v49  ;;  %v1742_v16 = vperm.slane %v7062_v42, 5  ;;  %v5296_v35 = vadd.f32 %v1682_v31, %v5177_v47  ;;  %v5299_v59 = vadd.f32 %v1684_v11, %v5180_v7  ;;  %v7074_v32 = vld [vmem:[#allocation26_spill] sm:$0xff] }
 0x181   : > { %v5302_v39 = vadd.f32 %v1687_v48, %v5183_v8  ;;  %v5305_v34 = vadd.f32 %v1689_v2, %v5186_v18  ;;  %v5308_v27 = vadd.f32 %v1692_v21, %v5189_v3  ;;  %v5311_v49 = vadd.f32 %v1694_v12, %v5192_v13  ;;  %v7075_v2 = vld [vmem:[#allocation24_spill] sm:$0xff]  ;;  %v7076_v12 = vld [vmem:[#allocation34_spill] sm:$0xff] }
 0x182   : > { %v5314_v23 = vadd.f32 %v1697_v46, %v5195_v24  ;;  %v5317_v47 = vadd.f32 %v1699_v14, %v5198_v40  ;;  %v5320_v7 = vadd.f32 %v1702_v0, %v5201_v55  ;;  %v5323_v8 = vadd.f32 %v1704_v1, %v5204_v9  ;;  %v7077_v14 = vld [vmem:[#allocation39_spill] sm:$0xff] }
 0x183   : > { %v5326_v18 = vadd.f32 %v1707_v58, %v5207_v52  ;;  %v5329_v3 = vadd.f32 %v1709_v38, %v5214_v25  ;;  %v1743_v13 = vmul.f32 %v4972_v6, %v1742_v16  ;;  %v1744_v24 = vmul.f32 %v4975_v30, %v1742_v16  ;;  %v7065_v52 = vld [vmem:[#allocation18_spill] sm:$0xff]  ;;  %v7078_v1 = vld [vmem:[#allocation19_spill] sm:$0xff] }
 0x184   : > { %v1745_v17 = vmul.f32 %v5055_v56, %v1742_v16  ;;  %v5335_v40 = vperm.slane %v7062_v42, 6  ;;  %v1746_v55 = vmul.f32 %v7042_v15, %v1742_v16  ;;  %v1747_v9 = vmul.f32 %v7063_v20, %v1742_v16  ;;  %v7079_v38 = vld [vmem:[#allocation35_spill] sm:$0xff] }
 0x185   : > { %v1748_v22 = vmul.f32 %v7064_v26, %v1742_v16  ;;  %v1749_v33 = vmul.f32 %v7065_v52, %v1742_v16  ;;  %v1750_v25 = vmul.f32 %v7066_v60, %v1742_v16  ;;  %v1751_v4 = vmul.f32 %v7067_v28, %v1742_v16 }
 0x186   : > { %v1752_v53 = vmul.f32 %v7068_v44, %v1742_v16  ;;  %v1753_v29 = vmul.f32 %v7069_v54, %v1742_v16  ;;  %v1754_v51 = vmul.f32 %v7070_v63, %v1742_v16  ;;  %v1755_v36 = vmul.f32 %v7071_v5, %v1742_v16  ;;  %v7080_v5 = vld [vmem:[#allocation28_spill] sm:$0xff] }
 0x187   : > { %v1756_v57 = vmul.f32 %v7072_v62, %v1742_v16  ;;  %v1757_v50 = vmul.f32 %v7073_v19, %v1742_v16  ;;  %v1758_v31 = vmul.f32 %v7074_v32, %v1742_v16  ;;  %v1791_v10 = vrot.slane %v1743_v13, 3  ;;  %v7081_v62 = vld [vmem:[#allocation29_spill] sm:$0xff] }
 0x188   : > { %v1792_v11 = vrot.slane %v1744_v24, 3  ;;  %v1794_v48 = vrot.slane %v1745_v17, 3  ;;  %v1759_v21 = vmul.f32 %v7075_v2, %v1742_v16  ;;  %v1760_v46 = vmul.f32 %v7076_v12, %v1742_v16 }
 0x189   : > { %v1761_v0 = vmul.f32 %v7077_v14, %v1742_v16  ;;  %v1762_v58 = vmul.f32 %v7078_v1, %v1742_v16  ;;  %v1763_v42 = vmul.f32 %v7079_v38, %v1742_v16  ;;  %v1764_v63 = vmul.f32 %v7080_v5, %v1742_v16 }
 0x18a   : > { %v1765_v54 = vmul.f32 %v7081_v62, %v1742_v16  ;;  %v1766_v19 = vmul.f32 %v5124_v37, %v1742_v16  ;;  %v1796_v32 = vrot.slane %v1746_v55, 3  ;;  %v1797_v13 = vrot.slane %v1747_v9, 3 }
 0x18b   : > { %v1799_v24 = vrot.slane %v1748_v22, 3  ;;  %v1801_v17 = vrot.slane %v1749_v33, 3  ;;  %v1793_v2 = vsel %vm701_vm2, %v1791_v10, %v1792_v11  ;;  %v1795_v12 = vsel %vm701_vm2, %v1792_v11, %v1794_v48 }
 0x18c   : > { %v1802_v44 = vrot.slane %v1750_v25, 3  ;;  %v1804_v14 = vrot.slane %v1751_v4, 3  ;;  %v1806_v28 = vrot.slane %v1752_v53, 3  ;;  %v1807_v1 = vrot.slane %v1753_v29, 3 }
 0x18d   : > { %v1809_v60 = vrot.slane %v1754_v51, 3  ;;  %v1811_v38 = vrot.slane %v1755_v36, 3  ;;  %v1812_v52 = vrot.slane %v1756_v57, 3  ;;  %v1814_v5 = vrot.slane %v1757_v50, 3 }
 0x18e   : > { %v1816_v26 = vrot.slane %v1758_v31, 3  ;;  %v1817_v62 = vrot.slane %v1759_v21, 3  ;;  %v1819_v20 = vrot.slane %v1760_v46, 3  ;;  %v1821_v16 = vrot.slane %v1761_v0, 3 }
 0x18f   : > { %v1822_v55 = vrot.slane %v1762_v58, 3  ;;  %v1824_v9 = vrot.slane %v1763_v42, 3  ;;  %v1798_v22 = vsel %vm701_vm2, %v1796_v32, %v1797_v13  ;;  %v1826_v33 = vrot.slane %v1764_v63, 3 }
 0x190   : > { %v1827_v10 = vrot.slane %v1765_v54, 3  ;;  %v1829_v37 = vrot.slane %v1766_v19, 3  ;;  %v1800_v25 = vsel %vm701_vm2, %v1797_v13, %v1799_v24  ;;  %v1803_v4 = vsel %vm701_vm2, %v1801_v17, %v1802_v44  ;;  %v7092_v13 = vld [vmem:[#allocation30_spill] sm:$0xff] }
 0x191   : > { %v1805_v53 = vsel %vm701_vm2, %v1802_v44, %v1804_v14  ;;  %v1808_v29 = vsel %vm701_vm2, %v1806_v28, %v1807_v1  ;;  %v1810_v51 = vsel %vm701_vm2, %v1807_v1, %v1809_v60  ;;  %v1813_v36 = vsel %vm701_vm2, %v1811_v38, %v1812_v52  ;;  %v7089_v14 = vld [vmem:[#allocation32_spill] sm:$0xff]  ;;  %v7090_v1 = vld [vmem:[#allocation21_spill] sm:$0xff]  ;;  %v7093_v17 = vld [vmem:[#allocation26_spill] sm:$0xff] }
 0x192   : > { %v1815_v57 = vsel %vm701_vm2, %v1812_v52, %v1814_v5  ;;  %v1818_v50 = vsel %vm701_vm2, %v1816_v26, %v1817_v62  ;;  %v1820_v63 = vsel %vm701_vm2, %v1817_v62, %v1819_v20  ;;  %v1823_v54 = vsel %vm701_vm2, %v1821_v16, %v1822_v55  ;;  %v7091_v38 = vld [vmem:[#allocation25_spill] sm:$0xff] }
 0x193   : > { %v1825_v19 = vsel %vm701_vm2, %v1822_v55, %v1824_v9  ;;  %v5373_v32 = vadd.f32 %v1793_v2, %v5282_v43  ;;  %v1828_v44 = vsel %vm701_vm2, %v1826_v33, %v1827_v10  ;;  %v1830_v28 = vsel %vm701_vm2, %v1827_v10, %v1829_v37  ;;  %v7094_v33 = vld [vmem:[#allocation24_spill] sm:$0xff] }
 0x194   : > { %v5378_v60 = vadd.f32 %v1795_v12, %v5285_v41  ;;  %v5381_v52 = vadd.f32 %v1798_v22, %v5289_v61  ;;  %v5384_v26 = vadd.f32 %v1800_v25, %v5292_v45  ;;  %v5387_v20 = vadd.f32 %v1803_v4, %v5296_v35  ;;  %v7088_v12 = vld [vmem:[#allocation23_spill] sm:$0xff]  ;;  %v7095_v25 = vld [vmem:[#allocation34_spill] sm:$0xff] }
 0x195   : > { %v5390_v5 = vadd.f32 %v1805_v53, %v5299_v59  ;;  %v5393_v43 = vadd.f32 %v1808_v29, %v5302_v39  ;;  %v5396_v37 = vadd.f32 %v1810_v51, %v5305_v34  ;;  %v5399_v41 = vadd.f32 %v1813_v36, %v5308_v27  ;;  %v7096_v53 = vld [vmem:[#allocation39_spill] sm:$0xff] }
 0x196   : > { %v5402_v61 = vadd.f32 %v1815_v57, %v5311_v49  ;;  %v5405_v45 = vadd.f32 %v1818_v50, %v5314_v23  ;;  %v5408_v35 = vadd.f32 %v1820_v63, %v5317_v47  ;;  %v5411_v59 = vadd.f32 %v1823_v54, %v5320_v7  ;;  %v7097_v51 = vld [vmem:[#allocation19_spill] sm:$0xff]  ;;  %v7099_v63 = vld [vmem:[#allocation28_spill] sm:$0xff] }
 0x197   : > { %v5414_v39 = vadd.f32 %v1825_v19, %v5323_v8  ;;  %v5417_v34 = vadd.f32 %v1828_v44, %v5326_v18  ;;  %v5420_v27 = vadd.f32 %v1830_v28, %v5329_v3  ;;  %v1864_v49 = vmul.f32 %v4972_v6, %v5335_v40  ;;  %v7082_v8 = vld [vmem:[#allocation38_spill] sm:$0xff]  ;;  %v7083_v18 = vld [vmem:[#allocation27_spill] sm:$0xff]  ;;  %v7085_v6 = vld [vmem:[#allocation20_spill] sm:$0xff] }
 0x198   : > { %v1865_v23 = vmul.f32 %v4975_v30, %v5335_v40  ;;  %v1866_v47 = vmul.f32 %v5055_v56, %v5335_v40  ;;  %v1867_v7 = vmul.f32 %v7042_v15, %v5335_v40  ;;  %v1868_v62 = vmul.f32 %v7082_v8, %v5335_v40  ;;  %v7084_v3 = vld [vmem:[#allocation18_spill] sm:$0xff]  ;;  %v7086_v30 = vld [vmem:[#allocation31_spill] sm:$0xff]  ;;  %v7100_v19 = vld [vmem:[#allocation29_spill] sm:$0xff] }
 0x199   : > { %v1869_v31 = vmul.f32 %v7083_v18, %v5335_v40  ;;  %v1870_v11 = vmul.f32 %v7084_v3, %v5335_v40  ;;  %v1871_v48 = vmul.f32 %v7085_v6, %v5335_v40  ;;  %v1872_v2 = vmul.f32 %v7086_v30, %v5335_v40  ;;  %v7087_v56 = vld [vmem:[#allocation22_spill] sm:$0xff]  ;;  %v7098_v57 = vld [vmem:[#allocation35_spill] sm:$0xff]  ;;  %v7101_v28 = vld [vmem:[#allocation33_spill] sm:$0xff] }
 0x19a   : > { %v1873_v21 = vmul.f32 %v7087_v56, %v5335_v40  ;;  %v1874_v46 = vmul.f32 %v7088_v12, %v5335_v40  ;;  %v1875_v0 = vmul.f32 %v7089_v14, %v5335_v40  ;;  %v1876_v58 = vmul.f32 %v7090_v1, %v5335_v40 }
 0x19b   : > { %v1877_v42 = vmul.f32 %v7091_v38, %v5335_v40  ;;  %v1878_v24 = vmul.f32 %v7092_v13, %v5335_v40  ;;  %v1879_v16 = vmul.f32 %v7093_v17, %v5335_v40  ;;  %v1912_v55 = vrot.slane %v1864_v49, 4 }
 0x19c   : > { %v1913_v9 = vrot.slane %v1865_v23, 4  ;;  %v1915_v22 = vrot.slane %v1866_v47, 4  ;;  %v1880_v10 = vmul.f32 %v7094_v33, %v5335_v40  ;;  %v1881_v4 = vmul.f32 %v7095_v25, %v5335_v40 }
 0x19d   : > { %v1882_v29 = vmul.f32 %v7096_v53, %v5335_v40  ;;  %v1883_v36 = vmul.f32 %v7097_v51, %v5335_v40  ;;  %v1884_v50 = vmul.f32 %v7098_v57, %v5335_v40  ;;  %v1885_v54 = vmul.f32 %v7099_v63, %v5335_v40 }
 0x19e   : > { %v1886_v44 = vmul.f32 %v7100_v19, %v5335_v40  ;;  %v1887_v49 = vmul.f32 %v7101_v28, %v5335_v40  ;;  %v1917_v23 = vrot.slane %v1867_v7, 4  ;;  %v1918_v47 = vrot.slane %v1868_v62, 4 }
 0x19f   : > { %v1920_v18 = vrot.slane %v1869_v31, 4  ;;  %v1922_v30 = vrot.slane %v1870_v11, 4  ;;  %v1914_v14 = vsel %vm823_vm3, %v1912_v55, %v1913_v9  ;;  %v1916_v13 = vsel %vm823_vm3, %v1913_v9, %v1915_v22 }
 0x1a0   : > { %v1923_v25 = vrot.slane %v1871_v48, 4  ;;  %v1925_v53 = vrot.slane %v1872_v2, 4  ;;  %v1927_v51 = vrot.slane %v1873_v21, 4  ;;  %v1928_v57 = vrot.slane %v1874_v46, 4 }
 0x1a1   : > { %v1930_v33 = vrot.slane %v1875_v0, 4  ;;  %v1932_v63 = vrot.slane %v1876_v58, 4  ;;  %v1933_v17 = vrot.slane %v1877_v42, 4  ;;  %v1935_v38 = vrot.slane %v1878_v24, 4 }
 0x1a2   : > { %v1937_v19 = vrot.slane %v1879_v16, 4  ;;  %v1938_v1 = vrot.slane %v1880_v10, 4  ;;  %v1940_v12 = vrot.slane %v1881_v4, 4  ;;  %v1942_v40 = vrot.slane %v1882_v29, 4 }
 0x1a3   : > { %v1943_v7 = vrot.slane %v1883_v36, 4  ;;  %v1945_v62 = vrot.slane %v1884_v50, 4  ;;  %v1919_v31 = vsel %vm823_vm3, %v1917_v23, %v1918_v47  ;;  %v1947_v11 = vrot.slane %v1885_v54, 4  ;;  %v5489_v50 = vld [vmem:[#allocation6 + $0x10] sm:$0xff]  ;;  %v5505_v23 = vld [vmem:[%s3912_s23 + $0xc0] sm:$0xff] }
 0x1a4   : > { %v1948_v55 = vrot.slane %v1886_v44, 4  ;;  %v1950_v28 = vrot.slane %v1887_v49, 4  ;;  %v1921_v48 = vsel %vm823_vm3, %v1918_v47, %v1920_v18  ;;  %v1924_v2 = vsel %vm823_vm3, %v1922_v30, %v1923_v25  ;;  %7102 = vst [vmem:[#allocation37_spill] sm:$0xff] %v5489_v50  ;;  %v7107_v47 = vld [vmem:[#allocation23_spill] sm:$0xff]  ;;  %v7108_v30 = vld [vmem:[#allocation21_spill] sm:$0xff] }
 0x1a5   : > { %v1926_v21 = vsel %vm823_vm3, %v1923_v25, %v1925_v53  ;;  %v1929_v46 = vsel %vm823_vm3, %v1927_v51, %v1928_v57  ;;  %v1931_v0 = vsel %vm823_vm3, %v1928_v57, %v1930_v33  ;;  %v1934_v58 = vsel %vm823_vm3, %v1932_v63, %v1933_v17  ;;  %7103 = vst [vmem:[#allocation36_spill] sm:$0xff] %v5505_v23  ;;  %v7110_v53 = vld [vmem:[#allocation26_spill] sm:$0xff]  ;;  %v7111_v57 = vld [vmem:[#allocation24_spill] sm:$0xff] }
 0x1a6   : > { %v1936_v42 = vsel %vm823_vm3, %v1933_v17, %v1935_v38  ;;  %v1939_v24 = vsel %vm823_vm3, %v1937_v19, %v1938_v1  ;;  %v1941_v16 = vsel %vm823_vm3, %v1938_v1, %v1940_v12  ;;  %v1944_v9 = vsel %vm823_vm3, %v1942_v40, %v1943_v7  ;;  %v3494_v17 = vld [vmem:[#allocation6 + $0x8] sm:$0xff] }
 0x1a7   : > { %v1946_v22 = vsel %vm823_vm3, %v1943_v7, %v1945_v62  ;;  %v1968_v10 = vadd.f32 %v1914_v14, %v5373_v32  ;;  %v1949_v4 = vsel %vm823_vm3, %v1947_v11, %v1948_v55  ;;  %v1951_v29 = vsel %vm823_vm3, %v1948_v55, %v1950_v28  ;;  %v7113_v55 = vld [vmem:[#allocation29_spill] sm:$0xff] }
 0x1a8   : > { %v1969_v33 = vadd.f32 %v1916_v13, %v5378_v60  ;;  %v1970_v36 = vadd.f32 %v1919_v31, %v5381_v52  ;;  %v1971_v38 = vadd.f32 %v1921_v48, %v5384_v26  ;;  %v1972_v12 = vadd.f32 %v1924_v2, %v5387_v20  ;;  %v7109_v13 = vld [vmem:[#allocation25_spill] sm:$0xff]  ;;  %v7112_v31 = vld [vmem:[#allocation28_spill] sm:$0xff] }
 0x1a9   : > { %v1973_v1 = vadd.f32 %v1926_v21, %v5390_v5  ;;  %v2011_v32 = vperm.slane %v3494_v17, 7  ;;  %v1974_v63 = vadd.f32 %v1929_v46, %v5393_v43  ;;  %v1975_v60 = vadd.f32 %v1931_v0, %v5396_v37  ;;  %v5508_v43 = vld [vmem:[%s3912_s23 + $0xc8] sm:$0xff] }
 0x1aa   : > { %v1976_v52 = vadd.f32 %v1934_v58, %v5399_v41  ;;  %v1977_v54 = vadd.f32 %v1936_v42, %v5402_v61  ;;  %v1978_v19 = vadd.f32 %v1939_v24, %v5405_v45  ;;  %v1979_v26 = vadd.f32 %v1941_v16, %v5408_v35  ;;  %7104 = vst [vmem:[#allocation38_spill] sm:$0xff] %v5508_v43  ;;  %v5517_v61 = vld [vmem:[%s3912_s23 + $0xf0] sm:$0xff]  ;;  %v5520_v45 = vld [vmem:[%s3912_s23 + $0xf8] sm:$0xff] }
 0x1ab   : > { %v1980_v20 = vadd.f32 %v1944_v9, %v5411_v59  ;;  %v1981_v5 = vadd.f32 %v1946_v22, %v5414_v39  ;;  %v1982_v44 = vadd.f32 %v1949_v4, %v5417_v34  ;;  %v1983_v49 = vadd.f32 %v1951_v29, %v5420_v27  ;;  %7105 = vst [vmem:[#allocation27_spill] sm:$0xff] %v5517_v61  ;;  %v5547_v42 = vld [vmem:[%s3912_s23 + $0x58] sm:$0xf]  ;;  %v5558_v4 = vld [vmem:[%s3912_s23 + $0x70] sm:$0xf] }
 0x1ac   : > { %v5511_v37 = vperm.slane %v5489_v50, 0  ;;  %v5514_v41 = vperm.slane %v5489_v50, 1  ;;  %7106 = vst [vmem:[#allocation18_spill] sm:$0xff] %v5520_v45  ;;  %v2012_v35 = vmul.f32 %v7042_v15, %v2011_v32  ;;  %v2013_v59 = vmul.f32 %v7082_v8, %v2011_v32 }
 0x1ad   : > { %v2014_v39 = vmul.f32 %v7084_v3, %v2011_v32  ;;  %v2015_v34 = vmul.f32 %v7085_v6, %v2011_v32  ;;  %v2016_v27 = vmul.f32 %v7087_v56, %v2011_v32  ;;  %v2017_v18 = vmul.f32 %v7107_v47, %v2011_v32  ;;  %7114 = vst [vmem:[#allocation20_spill] sm:$0xff] %v5558_v4 }
 0x1ae   : > { %v2018_v14 = vmul.f32 %v7108_v30, %v2011_v32  ;;  %v2019_v25 = vmul.f32 %v7109_v13, %v2011_v32  ;;  %v2020_v51 = vmul.f32 %v7110_v53, %v2011_v32  ;;  %v2021_v40 = vmul.f32 %v7111_v57, %v2011_v32 }
 0x1af   : > { %v2022_v7 = vmul.f32 %v5505_v23, %v2011_v32  ;;  %v2023_v62 = vmul.f32 %v5508_v43, %v2011_v32  ;;  %v2024_v11 = vmul.f32 %v7112_v31, %v2011_v32  ;;  %v2025_v28 = vmul.f32 %v7113_v55, %v2011_v32 }
 0x1b0   : > { %v2026_v48 = vmul.f32 %v5517_v61, %v2011_v32  ;;  %v2027_v2 = vmul.f32 %v5520_v45, %v2011_v32  ;;  %v5538_v21 = vadd.f32 %v2012_v35, %v1968_v10  ;;  %v5540_v46 = vadd.f32 %v2013_v59, %v1969_v33  ;;  %v5605_v35 = vld [vmem:[%s3912_s23 + $0xe8] sm:$0xf] }
 0x1b1   : > { %v5542_v0 = vadd.f32 %v2014_v39, %v1970_v36  ;;  %v5544_v58 = vadd.f32 %v2015_v34, %v1971_v38  ;;  %v5549_v24 = vadd.f32 %v2016_v27, %v1972_v12  ;;  %v5551_v16 = vadd.f32 %v2017_v18, %v1973_v1  ;;  %v5569_v38 = vld [vmem:[%s3912_s23 + $0x88] sm:$0xf]  ;;  %v5572_v12 = vld [vmem:[%s3912_s23 + $0xa0] sm:$0xf]  ;;  %7119 = vst [vmem:[#allocation39_spill] sm:$0xff] %v5605_v35 }
 0x1b2   : > { %v5553_v9 = vadd.f32 %v2018_v14, %v1974_v63  ;;  %v5555_v22 = vadd.f32 %v2019_v25, %v1975_v60  ;;  %v5560_v10 = vadd.f32 %v2020_v51, %v1976_v52  ;;  %v5562_v29 = vadd.f32 %v2021_v40, %v1977_v54  ;;  %7115 = vst [vmem:[#allocation31_spill] sm:$0xff] %v5569_v38  ;;  %v5583_v60 = vld [vmem:[%s3912_s23 + $0xb8] sm:$0xf]  ;;  %v5616_v18 = vld [vmem:[%s3912_s23 + $0x100] sm:$0xf] }
 0x1b3   : > { %v5564_v33 = vadd.f32 %v2022_v7, %v1978_v19  ;;  %v5566_v36 = vadd.f32 %v2023_v62, %v1979_v26  ;;  %7116 = vst [vmem:[#allocation32_spill] sm:$0xff] %v5572_v12  ;;  %v5574_v1 = vadd.f32 %v2024_v11, %v1980_v20  ;;  %v5576_v17 = vadd.f32 %v2025_v28, %v1981_v5 }
 0x1b4   : > { %v5578_v32 = vadd.f32 %v2026_v48, %v1982_v44  ;;  %v5580_v63 = vadd.f32 %v2027_v2, %v1983_v49  ;;  %7117 = vst [vmem:[#allocation30_spill] sm:$0xff] %v5583_v60  ;;  %v2045_v52 = vmul.f32 %v7042_v15, %v5511_v37  ;;  %v2046_v54 = vmul.f32 %v7082_v8, %v5511_v37  ;;  %v5602_v49 = vld [vmem:[%s3912_s23 + $0xd0] sm:$0xf] }
 0x1b5   : > { %v2047_v19 = vmul.f32 %v5547_v42, %v5511_v37  ;;  %v2048_v26 = vmul.f32 %v7084_v3, %v5511_v37  ;;  %v2049_v20 = vmul.f32 %v7085_v6, %v5511_v37  ;;  %v2050_v5 = vmul.f32 %v5558_v4, %v5511_v37  ;;  %7118 = vst [vmem:[#allocation34_spill] sm:$0xff] %v5602_v49 }
 0x1b6   : > { %v2051_v44 = vmul.f32 %v7087_v56, %v5511_v37  ;;  %v2052_v15 = vmul.f32 %v7107_v47, %v5511_v37  ;;  %v2053_v59 = vmul.f32 %v5569_v38, %v5511_v37  ;;  %v2054_v39 = vmul.f32 %v7108_v30, %v5511_v37 }
 0x1b7   : > { %v2055_v34 = vmul.f32 %v7109_v13, %v5511_v37  ;;  %v2056_v27 = vmul.f32 %v5572_v12, %v5511_v37  ;;  %v2057_v14 = vmul.f32 %v7110_v53, %v5511_v37  ;;  %v2058_v25 = vmul.f32 %v7111_v57, %v5511_v37 }
 0x1b8   : > { %v2059_v51 = vmul.f32 %v5583_v60, %v5511_v37  ;;  %v2060_v40 = vmul.f32 %v5505_v23, %v5511_v37  ;;  %v2061_v7 = vmul.f32 %v5508_v43, %v5511_v37  ;;  %v2093_v62 = vrot.slane %v2045_v52, 1 }
 0x1b9   : > { %v2094_v11 = vrot.slane %v2046_v54, 1  ;;  %v2096_v28 = vrot.slane %v2047_v19, 1  ;;  %v2062_v48 = vmul.f32 %v5602_v49, %v5511_v37  ;;  %v2063_v2 = vmul.f32 %v7112_v31, %v5511_v37 }
 0x1ba   : > { %v2064_v50 = vmul.f32 %v7113_v55, %v5511_v37  ;;  %v2065_v60 = vmul.f32 %v5605_v35, %v5511_v37  ;;  %v2066_v23 = vmul.f32 %v5517_v61, %v5511_v37  ;;  %v2067_v52 = vmul.f32 %v5520_v45, %v5511_v37 }
 0x1bb   : > { %v2068_v54 = vmul.f32 %v5616_v18, %v5511_v37  ;;  %v2098_v19 = vrot.slane %v2048_v26, 1  ;;  %v2099_v49 = vrot.slane %v2049_v20, 1  ;;  %v2101_v43 = vrot.slane %v2050_v5, 1 }
 0x1bc   : > { %v2103_v57 = vrot.slane %v2051_v44, 1  ;;  %v2104_v31 = vrot.slane %v2052_v15, 1  ;;  %v2095_v53 = vsel %vm457_vm0, %v2093_v62, %v2094_v11  ;;  %v2097_v55 = vsel %vm457_vm0, %v2094_v11, %v2096_v28  ;;  %v7125_v28 = vld [vmem:[#allocation25_spill] sm:$0xff] }
 0x1bd   : > { %v2106_v12 = vrot.slane %v2053_v59, 1  ;;  %v2108_v35 = vrot.slane %v2054_v39, 1  ;;  %v2109_v13 = vrot.slane %v2055_v34, 1  ;;  %v2111_v30 = vrot.slane %v2056_v27, 1 }
 0x1be   : > { %v2113_v61 = vrot.slane %v2057_v14, 1  ;;  %v2114_v38 = vrot.slane %v2058_v25, 1  ;;  %v2116_v47 = vrot.slane %v2059_v51, 1  ;;  %v2118_v45 = vrot.slane %v2060_v40, 1 }
 0x1bf   : > { %v2119_v56 = vrot.slane %v2061_v7, 1  ;;  %v2121_v4 = vrot.slane %v2062_v48, 1  ;;  %v2100_v37 = vsel %vm457_vm0, %v2098_v19, %v2099_v49  ;;  %v2123_v26 = vrot.slane %v2063_v2, 1  ;;  %v7124_v7 = vld [vmem:[#allocation21_spill] sm:$0xff]  ;;  %v7126_v48 = vld [vmem:[#allocation32_spill] sm:$0xff] }
 0x1c0   : > { %v2124_v20 = vrot.slane %v2064_v50, 1  ;;  %v2126_v5 = vrot.slane %v2065_v60, 1  ;;  %v2102_v44 = vsel %vm457_vm0, %v2099_v49, %v2101_v43  ;;  %v2128_v15 = vrot.slane %v2066_v23, 1  ;;  %v7128_v19 = vld [vmem:[#allocation24_spill] sm:$0xff] }
 0x1c1   : > { %v2129_v62 = vrot.slane %v2067_v52, 1  ;;  %v2131_v11 = vrot.slane %v2068_v54, 1  ;;  %v2105_v59 = vsel %vm457_vm0, %v2103_v57, %v2104_v31  ;;  %v2107_v39 = vsel %vm457_vm0, %v2104_v31, %v2106_v12  ;;  %v7127_v52 = vld [vmem:[#allocation26_spill] sm:$0xff] }
 0x1c2   : > { %v2110_v34 = vsel %vm457_vm0, %v2108_v35, %v2109_v13  ;;  %v2112_v27 = vsel %vm457_vm0, %v2109_v13, %v2111_v30  ;;  %v2115_v14 = vsel %vm457_vm0, %v2113_v61, %v2114_v38  ;;  %v2117_v25 = vsel %vm457_vm0, %v2114_v38, %v2116_v47  ;;  %v7122_v35 = vld [vmem:[#allocation23_spill] sm:$0xff] }
 0x1c3   : > { %v2120_v50 = vsel %vm457_vm0, %v2118_v45, %v2119_v56  ;;  %v2122_v60 = vsel %vm457_vm0, %v2119_v56, %v2121_v4  ;;  %v2125_v23 = vsel %vm457_vm0, %v2123_v26, %v2124_v20  ;;  %v2127_v43 = vsel %vm457_vm0, %v2124_v20, %v2126_v5  ;;  %v7130_v26 = vld [vmem:[#allocation36_spill] sm:$0xff]  ;;  %v7131_v5 = vld [vmem:[#allocation38_spill] sm:$0xff] }
 0x1c4   : > { %v5657_v57 = vadd.f32 %v2095_v53, %v5538_v21  ;;  %v5660_v12 = vadd.f32 %v2097_v55, %v5540_v46  ;;  %v2130_v30 = vsel %vm457_vm0, %v2128_v15, %v2129_v62  ;;  %v2132_v61 = vsel %vm457_vm0, %v2129_v62, %v2131_v11  ;;  %v7129_v55 = vld [vmem:[#allocation30_spill] sm:$0xff] }
 0x1c5   : > { %v5665_v47 = vadd.f32 %v2100_v37, %v5542_v0  ;;  %v5668_v56 = vadd.f32 %v2102_v44, %v5544_v58  ;;  %v5671_v45 = vadd.f32 %v2105_v59, %v5549_v24  ;;  %v5674_v13 = vadd.f32 %v2107_v39, %v5551_v16  ;;  %v7132_v59 = vld [vmem:[#allocation34_spill] sm:$0xff] }
 0x1c6   : > { %v5677_v53 = vadd.f32 %v2110_v34, %v5553_v9  ;;  %v5680_v21 = vadd.f32 %v2112_v27, %v5555_v22  ;;  %v5683_v46 = vadd.f32 %v2115_v14, %v5560_v10  ;;  %v5686_v0 = vadd.f32 %v2117_v25, %v5562_v29  ;;  %v5707_v10 = vld [vmem:[%s3912_s23 + $0x48] sm:$0xff]  ;;  %v5746_v34 = vld [vmem:[%s3912_s23 + $0xd8] sm:$0xff]  ;;  %v5751_v14 = vld [vmem:[%s3912_s23 + $0xe0] sm:$0xff] }
 0x1c7   : > { %v5689_v58 = vadd.f32 %v2120_v50, %v5564_v33  ;;  %v5692_v24 = vadd.f32 %v2122_v60, %v5566_v36  ;;  %v5695_v16 = vadd.f32 %v2125_v23, %v5574_v1  ;;  %v5698_v9 = vadd.f32 %v2127_v43, %v5576_v17  ;;  %v7120_v17 = vld [vmem:[#allocation20_spill] sm:$0xff]  ;;  %7133 = vst [vmem:[#allocation19_spill] sm:$0xff] %v5746_v34  ;;  %v7135_v50 = vld [vmem:[#allocation39_spill] sm:$0xff] }
 0x1c8   : > { %v5701_v22 = vadd.f32 %v2130_v30, %v5578_v32  ;;  %v5704_v4 = vadd.f32 %v2132_v61, %v5580_v63  ;;  %v2166_v29 = vmul.f32 %v5707_v10, %v5514_v41  ;;  %v2167_v33 = vmul.f32 %v7082_v8, %v5514_v41  ;;  %v7121_v63 = vld [vmem:[#allocation22_spill] sm:$0xff]  ;;  %v7123_v8 = vld [vmem:[#allocation31_spill] sm:$0xff]  ;;  %7134 = vst [vmem:[#allocation35_spill] sm:$0xff] %v5751_v14 }
 0x1c9   : > { %v2168_v36 = vmul.f32 %v5547_v42, %v5514_v41  ;;  %v2169_v38 = vmul.f32 %v7084_v3, %v5514_v41  ;;  %v2170_v1 = vmul.f32 %v7085_v6, %v5514_v41  ;;  %v2171_v32 = vmul.f32 %v7120_v17, %v5514_v41  ;;  %v7136_v23 = vld [vmem:[#allocation27_spill] sm:$0xff]  ;;  %v7137_v30 = vld [vmem:[#allocation18_spill] sm:$0xff] }
 0x1ca   : > { %v2172_v49 = vmul.f32 %v7121_v63, %v5514_v41  ;;  %v2173_v51 = vmul.f32 %v7122_v35, %v5514_v41  ;;  %v2174_v40 = vmul.f32 %v7123_v8, %v5514_v41  ;;  %v2175_v3 = vmul.f32 %v7124_v7, %v5514_v41 }
 0x1cb   : > { %v2176_v6 = vmul.f32 %v7125_v28, %v5514_v41  ;;  %v2177_v2 = vmul.f32 %v7126_v48, %v5514_v41  ;;  %v2178_v54 = vmul.f32 %v7127_v52, %v5514_v41  ;;  %v2179_v31 = vmul.f32 %v7128_v19, %v5514_v41 }
 0x1cc   : > { %v2180_v37 = vmul.f32 %v7129_v55, %v5514_v41  ;;  %v2181_v20 = vmul.f32 %v7130_v26, %v5514_v41  ;;  %v2182_v44 = vmul.f32 %v7131_v5, %v5514_v41  ;;  %v2214_v15 = vrot.slane %v2166_v29, 2 }
 0x1cd   : > { %v2215_v62 = vrot.slane %v2167_v33, 2  ;;  %v2217_v11 = vrot.slane %v2168_v36, 2  ;;  %v2183_v39 = vmul.f32 %v7132_v59, %v5514_v41  ;;  %v2184_v27 = vmul.f32 %v5746_v34, %v5514_v41 }
 0x1ce   : > { %v2185_v25 = vmul.f32 %v5751_v14, %v5514_v41  ;;  %v2186_v60 = vmul.f32 %v7135_v50, %v5514_v41  ;;  %v2187_v43 = vmul.f32 %v7136_v23, %v5514_v41  ;;  %v2188_v61 = vmul.f32 %v7137_v30, %v5514_v41 }
 0x1cf   : > { %v2189_v29 = vmul.f32 %v5616_v18, %v5514_v41  ;;  %v2219_v33 = vrot.slane %v2169_v38, 2  ;;  %v2220_v36 = vrot.slane %v2170_v1, 2  ;;  %v2222_v63 = vrot.slane %v2171_v32, 2 }
 0x1d0   : > { %v2224_v35 = vrot.slane %v2172_v49, 2  ;;  %v2225_v7 = vrot.slane %v2173_v51, 2  ;;  %v2216_v28 = vsel %vm579_vm1, %v2214_v15, %v2215_v62  ;;  %v2218_v52 = vsel %vm579_vm1, %v2215_v62, %v2217_v11 }
 0x1d1   : > { %v2227_v19 = vrot.slane %v2174_v40, 2  ;;  %v2229_v50 = vrot.slane %v2175_v3, 2  ;;  %v2230_v14 = vrot.slane %v2176_v6, 2  ;;  %v2232_v34 = vrot.slane %v2177_v2, 2 }
 0x1d2   : > { %v2234_v23 = vrot.slane %v2178_v54, 2  ;;  %v2235_v59 = vrot.slane %v2179_v31, 2  ;;  %v2237_v5 = vrot.slane %v2180_v37, 2  ;;  %v2239_v30 = vrot.slane %v2181_v20, 2 }
 0x1d3   : > { %v2240_v26 = vrot.slane %v2182_v44, 2  ;;  %v2242_v55 = vrot.slane %v2183_v39, 2  ;;  %v2221_v41 = vsel %vm579_vm1, %v2219_v33, %v2220_v36  ;;  %v2244_v38 = vrot.slane %v2184_v27, 2  ;;  %v5851_v33 = vld [vmem:[%s3912_s23 + $0x80] sm:$0xff] }
 0x1d4   : > { %v2245_v1 = vrot.slane %v2185_v25, 2  ;;  %v2247_v32 = vrot.slane %v2186_v60, 2  ;;  %v2223_v49 = vsel %vm579_vm1, %v2220_v36, %v2222_v63  ;;  %v2249_v51 = vrot.slane %v2187_v43, 2  ;;  %v5830_v60 = vld [vmem:[%s3912_s23 + $0x50] sm:$0xff]  ;;  %7142 = vst [vmem:[#allocation22_spill] sm:$0xff] %v5851_v33 }
 0x1d5   : > { %v2250_v15 = vrot.slane %v2188_v61, 2  ;;  %v2252_v62 = vrot.slane %v2189_v29, 2  ;;  %v2226_v40 = vsel %vm579_vm1, %v2224_v35, %v2225_v7  ;;  %v2228_v3 = vsel %vm579_vm1, %v2225_v7, %v2227_v19  ;;  %v5847_v61 = vld [vmem:[%s3912_s23 + $0x78] sm:$0xff]  ;;  %v5856_v35 = vld [vmem:[%s3912_s23 + $0x90] sm:$0xff] }
 0x1d6   : > { %v2231_v6 = vsel %vm579_vm1, %v2229_v50, %v2230_v14  ;;  %v2233_v2 = vsel %vm579_vm1, %v2230_v14, %v2232_v34  ;;  %v2236_v54 = vsel %vm579_vm1, %v2234_v23, %v2235_v59  ;;  %v2238_v31 = vsel %vm579_vm1, %v2235_v59, %v2237_v5  ;;  %v7138_v59 = vld [vmem:[#allocation37_spill] sm:$0xff]  ;;  %v5838_v23 = vld [vmem:[%s3912_s23 + $0x60] sm:$0xff]  ;;  %7141 = vst [vmem:[#allocation29_spill] sm:$0xff] %v5847_v61 }
 0x1d7   : > { %v2241_v37 = vsel %vm579_vm1, %v2239_v30, %v2240_v26  ;;  %v2243_v20 = vsel %vm579_vm1, %v2240_v26, %v2242_v55  ;;  %v2246_v44 = vsel %vm579_vm1, %v2244_v38, %v2245_v1  ;;  %v2248_v11 = vsel %vm579_vm1, %v2245_v1, %v2247_v32  ;;  %7139 = vst [vmem:[#allocation33_spill] sm:$0xff] %v5838_v23  ;;  %v5869_v1 = vld [vmem:[%s3912_s23 + $0xb0] sm:$0xff] }
 0x1d8   : > { %v5778_v39 = vadd.f32 %v2216_v28, %v5657_v57  ;;  %v5781_v27 = vadd.f32 %v2218_v52, %v5660_v12  ;;  %v2251_v34 = vsel %vm579_vm1, %v2249_v51, %v2250_v15  ;;  %v2253_v14 = vsel %vm579_vm1, %v2250_v15, %v2252_v62  ;;  %7143 = vst [vmem:[#allocation23_spill] sm:$0xff] %v5856_v35  ;;  %v5860_v28 = vld [vmem:[%s3912_s23 + $0x98] sm:$0xff]  ;;  %v7148_v15 = vld [vmem:[#allocation36_spill] sm:$0xff] }
 0x1d9   : > { %v5786_v5 = vadd.f32 %v2221_v41, %v5665_v47  ;;  %v2286_v55 = vperm.slane %v7138_v59, 2  ;;  %v5790_v26 = vadd.f32 %v2223_v49, %v5668_v56  ;;  %v5793_v25 = vadd.f32 %v2226_v40, %v5671_v45  ;;  %7144 = vst [vmem:[#allocation21_spill] sm:$0xff] %v5860_v28  ;;  %v5865_v41 = vld [vmem:[%s3912_s23 + $0xa8] sm:$0xff]  ;;  %v7147_v49 = vld [vmem:[#allocation30_spill] sm:$0xff] }
 0x1da   : > { %v5796_v57 = vadd.f32 %v2228_v3, %v5674_v13  ;;  %v5799_v12 = vadd.f32 %v2231_v6, %v5677_v53  ;;  %v5802_v50 = vadd.f32 %v2233_v2, %v5680_v21  ;;  %v5805_v47 = vadd.f32 %v2236_v54, %v5683_v46  ;;  %7145 = vst [vmem:[#allocation25_spill] sm:$0xff] %v5865_v41  ;;  %v7149_v6 = vld [vmem:[#allocation38_spill] sm:$0xff] }
 0x1db   : > { %v5808_v56 = vadd.f32 %v2238_v31, %v5686_v0  ;;  %v5811_v45 = vadd.f32 %v2241_v37, %v5689_v58  ;;  %v5814_v13 = vadd.f32 %v2243_v20, %v5692_v24  ;;  %v5817_v53 = vadd.f32 %v2246_v44, %v5695_v16  ;;  %7146 = vst [vmem:[#allocation26_spill] sm:$0xff] %v5869_v1  ;;  %v7150_v54 = vld [vmem:[#allocation34_spill] sm:$0xff]  ;;  %v7151_v37 = vld [vmem:[#allocation19_spill] sm:$0xff] }
 0x1dc   : > { %v5820_v21 = vadd.f32 %v2248_v11, %v5698_v9  ;;  %v5823_v46 = vadd.f32 %v2251_v34, %v5701_v22  ;;  %v5826_v0 = vadd.f32 %v2253_v14, %v5704_v4  ;;  %v2287_v58 = vmul.f32 %v5707_v10, %v2286_v55  ;;  %v5842_v4 = vld [vmem:[%s3912_s23 + $0x68] sm:$0xff] }
 0x1dd   : > { %v2288_v24 = vmul.f32 %v5830_v60, %v2286_v55  ;;  %v5834_v16 = vperm.slane %v7138_v59, 3  ;;  %v2289_v9 = vmul.f32 %v5547_v42, %v2286_v55  ;;  %v2290_v22 = vmul.f32 %v5838_v23, %v2286_v55  ;;  %7140 = vst [vmem:[#allocation28_spill] sm:$0xff] %v5842_v4  ;;  %v7152_v44 = vld [vmem:[#allocation35_spill] sm:$0xff] }
 0x1de   : > { %v2291_v43 = vmul.f32 %v5842_v4, %v2286_v55  ;;  %v2292_v30 = vmul.f32 %v7120_v17, %v2286_v55  ;;  %v2293_v29 = vmul.f32 %v5847_v61, %v2286_v55  ;;  %v2294_v36 = vmul.f32 %v5851_v33, %v2286_v55  ;;  %v7153_v34 = vld [vmem:[#allocation39_spill] sm:$0xff] }
 0x1df   : > { %v2295_v63 = vmul.f32 %v7123_v8, %v2286_v55  ;;  %v2296_v7 = vmul.f32 %v5856_v35, %v2286_v55  ;;  %v2297_v52 = vmul.f32 %v5860_v28, %v2286_v55  ;;  %v2298_v19 = vmul.f32 %v7126_v48, %v2286_v55  ;;  %v7154_v59 = vld [vmem:[#allocation27_spill] sm:$0xff]  ;;  %v7155_v48 = vld [vmem:[#allocation18_spill] sm:$0xff] }
 0x1e0   : > { %v2299_v38 = vmul.f32 %v5865_v41, %v2286_v55  ;;  %v2300_v32 = vmul.f32 %v5869_v1, %v2286_v55  ;;  %v2301_v51 = vmul.f32 %v7147_v49, %v2286_v55  ;;  %v2302_v62 = vmul.f32 %v7148_v15, %v2286_v55 }
 0x1e1   : > { %v2335_v40 = vrot.slane %v2287_v58, 3  ;;  %v2336_v3 = vrot.slane %v2288_v24, 3  ;;  %v2303_v2 = vmul.f32 %v7149_v6, %v2286_v55  ;;  %v2304_v31 = vmul.f32 %v7150_v54, %v2286_v55 }
 0x1e2   : > { %v2305_v20 = vmul.f32 %v7151_v37, %v2286_v55  ;;  %v2306_v11 = vmul.f32 %v7152_v44, %v2286_v55  ;;  %v2307_v14 = vmul.f32 %v7153_v34, %v2286_v55  ;;  %v2308_v41 = vmul.f32 %v7154_v59, %v2286_v55 }
 0x1e3   : > { %v2309_v1 = vmul.f32 %v7155_v48, %v2286_v55  ;;  %v2310_v49 = vmul.f32 %v5616_v18, %v2286_v55  ;;  %v2338_v28 = vrot.slane %v2289_v9, 3  ;;  %v2340_v15 = vrot.slane %v2290_v22, 3 }
 0x1e4   : > { %v2341_v58 = vrot.slane %v2291_v43, 3  ;;  %v2343_v24 = vrot.slane %v2292_v30, 3  ;;  %v2337_v6 = vsel %vm701_vm2, %v2335_v40, %v2336_v3  ;;  %v2345_v35 = vrot.slane %v2293_v29, 3 }
 0x1e5   : > { %v2346_v54 = vrot.slane %v2294_v36, 3  ;;  %v2348_v8 = vrot.slane %v2295_v63, 3  ;;  %v2350_v37 = vrot.slane %v2296_v7, 3  ;;  %v2351_v33 = vrot.slane %v2297_v52, 3 }
 0x1e6   : > { %v2353_v44 = vrot.slane %v2298_v19, 3  ;;  %v2355_v61 = vrot.slane %v2299_v38, 3  ;;  %v2356_v34 = vrot.slane %v2300_v32, 3  ;;  %v2358_v17 = vrot.slane %v2301_v51, 3 }
 0x1e7   : > { %v2360_v59 = vrot.slane %v2302_v62, 3  ;;  %v2361_v4 = vrot.slane %v2303_v2, 3  ;;  %v2363_v48 = vrot.slane %v2304_v31, 3  ;;  %v2365_v23 = vrot.slane %v2305_v20, 3  ;;  %v7163_v31 = vld [vmem:[#allocation21_spill] sm:$0xff]  ;;  %v7164_v20 = vld [vmem:[#allocation32_spill] sm:$0xff] }
 0x1e8   : > { %v2366_v55 = vrot.slane %v2306_v11, 3  ;;  %v2368_v9 = vrot.slane %v2307_v14, 3  ;;  %v2339_v22 = vsel %vm701_vm2, %v2336_v3, %v2338_v28  ;;  %v2370_v43 = vrot.slane %v2308_v41, 3  ;;  %v7165_v11 = vld [vmem:[#allocation25_spill] sm:$0xff]  ;;  %v7166_v14 = vld [vmem:[#allocation26_spill] sm:$0xff] }
 0x1e9   : > { %v2371_v30 = vrot.slane %v2309_v1, 3  ;;  %v2373_v40 = vrot.slane %v2310_v49, 3  ;;  %v2342_v29 = vsel %vm701_vm2, %v2340_v15, %v2341_v58  ;;  %v2344_v36 = vsel %vm701_vm2, %v2341_v58, %v2343_v24  ;;  %v7167_v24 = vld [vmem:[#allocation30_spill] sm:$0xff] }
 0x1ea   : > { %v2347_v63 = vsel %vm701_vm2, %v2345_v35, %v2346_v54  ;;  %v2349_v7 = vsel %vm701_vm2, %v2346_v54, %v2348_v8  ;;  %v2352_v52 = vsel %vm701_vm2, %v2350_v37, %v2351_v33  ;;  %v2354_v19 = vsel %vm701_vm2, %v2351_v33, %v2353_v44 }
 0x1eb   : > { %v2357_v38 = vsel %vm701_vm2, %v2355_v61, %v2356_v34  ;;  %v2359_v32 = vsel %vm701_vm2, %v2356_v34, %v2358_v17  ;;  %v2362_v28 = vsel %vm701_vm2, %v2360_v59, %v2361_v4  ;;  %v2364_v41 = vsel %vm701_vm2, %v2361_v4, %v2363_v48 }
 0x1ec   : > { %v2367_v1 = vsel %vm701_vm2, %v2365_v23, %v2366_v55  ;;  %v2369_v49 = vsel %vm701_vm2, %v2366_v55, %v2368_v9  ;;  %v2372_v35 = vsel %vm701_vm2, %v2370_v43, %v2371_v30  ;;  %v2374_v8 = vsel %vm701_vm2, %v2371_v30, %v2373_v40  ;;  %v7168_v9 = vld [vmem:[#allocation36_spill] sm:$0xff]  ;;  %v7169_v40 = vld [vmem:[#allocation38_spill] sm:$0xff] }
 0x1ed   : > { %v5899_v51 = vadd.f32 %v2337_v6, %v5778_v39  ;;  %v5902_v33 = vadd.f32 %v2339_v22, %v5781_v27  ;;  %v5905_v17 = vadd.f32 %v2342_v29, %v5786_v5  ;;  %v5908_v59 = vadd.f32 %v2344_v36, %v5790_v26  ;;  %v7170_v36 = vld [vmem:[#allocation34_spill] sm:$0xff] }
 0x1ee   : > { %v5911_v48 = vadd.f32 %v2347_v63, %v5793_v25  ;;  %v5914_v23 = vadd.f32 %v2349_v7, %v5796_v57  ;;  %v5917_v4 = vadd.f32 %v2352_v52, %v5799_v12  ;;  %v5920_v39 = vadd.f32 %v2354_v19, %v5802_v50  ;;  %v7171_v7 = vld [vmem:[#allocation19_spill] sm:$0xff] }
 0x1ef   : > { %v5923_v27 = vadd.f32 %v2357_v38, %v5805_v47  ;;  %v5926_v5 = vadd.f32 %v2359_v32, %v5808_v56  ;;  %v5929_v26 = vadd.f32 %v2362_v28, %v5811_v45  ;;  %v5932_v25 = vadd.f32 %v2364_v41, %v5814_v13  ;;  %v7172_v19 = vld [vmem:[#allocation35_spill] sm:$0xff] }
 0x1f0   : > { %v5935_v57 = vadd.f32 %v2367_v1, %v5817_v53  ;;  %v5938_v12 = vadd.f32 %v2369_v49, %v5820_v21  ;;  %v5941_v50 = vadd.f32 %v2372_v35, %v5823_v46  ;;  %v5944_v47 = vadd.f32 %v2374_v8, %v5826_v0  ;;  %v7156_v53 = vld [vmem:[#allocation33_spill] sm:$0xff]  ;;  %v7157_v21 = vld [vmem:[#allocation28_spill] sm:$0xff]  ;;  %v7173_v32 = vld [vmem:[#allocation39_spill] sm:$0xff] }
 0x1f1   : > { %v2408_v56 = vmul.f32 %v5707_v10, %v5834_v16  ;;  %v2409_v45 = vmul.f32 %v5830_v60, %v5834_v16  ;;  %v2410_v13 = vmul.f32 %v5547_v42, %v5834_v16  ;;  %v2411_v61 = vmul.f32 %v7156_v53, %v5834_v16  ;;  %v7158_v46 = vld [vmem:[#allocation20_spill] sm:$0xff]  ;;  %v7159_v0 = vld [vmem:[#allocation29_spill] sm:$0xff]  ;;  %v7160_v10 = vld [vmem:[#allocation22_spill] sm:$0xff] }
 0x1f2   : > { %v2412_v15 = vmul.f32 %v7157_v21, %v5834_v16  ;;  %v2413_v62 = vmul.f32 %v7158_v46, %v5834_v16  ;;  %v2414_v3 = vmul.f32 %v7159_v0, %v5834_v16  ;;  %v2415_v6 = vmul.f32 %v7160_v10, %v5834_v16  ;;  %v7161_v60 = vld [vmem:[#allocation31_spill] sm:$0xff]  ;;  %v7175_v49 = vld [vmem:[#allocation18_spill] sm:$0xff] }
 0x1f3   : > { %v2416_v2 = vmul.f32 %v7161_v60, %v5834_v16  ;;  %v7162_v42 = vld [vmem:[#allocation23_spill] sm:$0xff]  ;;  %v2418_v37 = vmul.f32 %v7163_v31, %v5834_v16  ;;  %v2419_v44 = vmul.f32 %v7164_v20, %v5834_v16  ;;  %v2420_v34 = vmul.f32 %v7165_v11, %v5834_v16 }
 0x1f4   : > { %v2417_v54 = vmul.f32 %v7162_v42, %v5834_v16  ;;  %v2421_v58 = vmul.f32 %v7166_v14, %v5834_v16  ;;  %v2422_v55 = vmul.f32 %v7167_v24, %v5834_v16  ;;  %v2423_v22 = vmul.f32 %v7168_v9, %v5834_v16  ;;  %v7174_v41 = vld [vmem:[#allocation27_spill] sm:$0xff] }
 0x1f5   : > { %v2456_v43 = vrot.slane %v2408_v56, 4  ;;  %v2457_v30 = vrot.slane %v2409_v45, 4  ;;  %v2424_v29 = vmul.f32 %v7169_v40, %v5834_v16  ;;  %v2425_v63 = vmul.f32 %v7170_v36, %v5834_v16 }
 0x1f6   : > { %v2426_v52 = vmul.f32 %v7171_v7, %v5834_v16  ;;  %v2427_v38 = vmul.f32 %v7172_v19, %v5834_v16  ;;  %v2428_v28 = vmul.f32 %v7173_v32, %v5834_v16  ;;  %v2429_v1 = vmul.f32 %v7174_v41, %v5834_v16 }
 0x1f7   : > { %v2430_v35 = vmul.f32 %v7175_v49, %v5834_v16  ;;  %v2431_v8 = vmul.f32 %v5616_v18, %v5834_v16  ;;  %v2459_v56 = vrot.slane %v2410_v13, 4  ;;  %v2461_v45 = vrot.slane %v2411_v61, 4 }
 0x1f8   : > { %v2462_v53 = vrot.slane %v2412_v15, 4  ;;  %v2464_v21 = vrot.slane %v2413_v62, 4  ;;  %v2458_v46 = vsel %vm823_vm3, %v2456_v43, %v2457_v30  ;;  %v2466_v0 = vrot.slane %v2414_v3, 4 }
 0x1f9   : > { %v2467_v10 = vrot.slane %v2415_v6, 4  ;;  %v2469_v60 = vrot.slane %v2416_v2, 4  ;;  %v2471_v42 = vrot.slane %v2417_v54, 4  ;;  %v2472_v31 = vrot.slane %v2418_v37, 4 }
 0x1fa   : > { %v2474_v20 = vrot.slane %v2419_v44, 4  ;;  %v2476_v11 = vrot.slane %v2420_v34, 4  ;;  %v2477_v14 = vrot.slane %v2421_v58, 4  ;;  %v2479_v24 = vrot.slane %v2422_v55, 4 }
 0x1fb   : > { %v2481_v36 = vrot.slane %v2423_v22, 4  ;;  %v2482_v7 = vrot.slane %v2424_v29, 4  ;;  %v2484_v19 = vrot.slane %v2425_v63, 4  ;;  %v2486_v32 = vrot.slane %v2426_v52, 4 }
 0x1fc   : > { %v2487_v18 = vrot.slane %v2427_v38, 4  ;;  %v2489_v16 = vrot.slane %v2428_v28, 4  ;;  %v2460_v13 = vsel %vm823_vm3, %v2457_v30, %v2459_v56  ;;  %v2491_v61 = vrot.slane %v2429_v1, 4  ;;  %v7176_v56 = vld [vmem:[#allocation37_spill] sm:$0xff] }
 0x1fd   : > { %v2492_v15 = vrot.slane %v2430_v35, 4  ;;  %v2494_v62 = vrot.slane %v2431_v8, 4  ;;  %v2463_v3 = vsel %vm823_vm3, %v2461_v45, %v2462_v53  ;;  %v2465_v6 = vsel %vm823_vm3, %v2462_v53, %v2464_v21  ;;  %v6016_v8 = vld [vmem:[%s3912_s23 + $0x60] sm:$0xff] }
 0x1fe   : > { %v2468_v2 = vsel %vm823_vm3, %v2466_v0, %v2467_v10  ;;  %v2470_v54 = vsel %vm823_vm3, %v2467_v10, %v2469_v60  ;;  %v2473_v37 = vsel %vm823_vm3, %v2471_v42, %v2472_v31  ;;  %v2475_v44 = vsel %vm823_vm3, %v2472_v31, %v2474_v20  ;;  %v6043_v10 = vld [vmem:[%s3912_s23 + $0xa8] sm:$0xff] }
 0x1ff   : > { %v2478_v34 = vsel %vm823_vm3, %v2476_v11, %v2477_v14  ;;  %v2480_v58 = vsel %vm823_vm3, %v2477_v14, %v2479_v24  ;;  %v2483_v55 = vsel %vm823_vm3, %v2481_v36, %v2482_v7  ;;  %v2485_v22 = vsel %vm823_vm3, %v2482_v7, %v2484_v19  ;;  %7180 = vst [vmem:[#allocation20_spill] sm:$0xff] %v6043_v10  ;;  %v6061_v20 = vld [vmem:[%s3912_s23 + $0x108] sm:$0xff] }
 0x200   : > { %v2488_v43 = vsel %vm823_vm3, %v2486_v32, %v2487_v18  ;;  %v2490_v30 = vsel %vm823_vm3, %v2487_v18, %v2489_v16  ;;  %v2493_v29 = vsel %vm823_vm3, %v2491_v61, %v2492_v15  ;;  %v2495_v63 = vsel %vm823_vm3, %v2492_v15, %v2494_v62  ;;  %7184 = vst [vmem:[#allocation23_spill] sm:$0xff] %v6061_v20 }
 0x201   : > { %v2512_v52 = vadd.f32 %v2458_v46, %v5899_v51  ;;  %v2513_v38 = vadd.f32 %v2460_v13, %v5902_v33  ;;  %v2514_v28 = vadd.f32 %v2463_v3, %v5905_v17  ;;  %v2515_v1 = vadd.f32 %v2465_v6, %v5908_v59  ;;  %v6024_v17 = vld [vmem:[%s3912_s23 + $0x68] sm:$0xff]  ;;  %v6027_v59 = vld [vmem:[%s3912_s23 + $0x78] sm:$0xff] }
 0x202   : > { %v2516_v35 = vadd.f32 %v2468_v2, %v5911_v48  ;;  %v2555_v45 = vperm.slane %v7176_v56, 4  ;;  %v2517_v53 = vadd.f32 %v2470_v54, %v5914_v23  ;;  %v2518_v21 = vadd.f32 %v2473_v37, %v5917_v4  ;;  %v6030_v48 = vld [vmem:[%s3912_s23 + $0x80] sm:$0xff] }
 0x203   : > { %v2519_v51 = vadd.f32 %v2475_v44, %v5920_v39  ;;  %v2520_v33 = vadd.f32 %v2478_v34, %v5923_v27  ;;  %7177 = vst [vmem:[#allocation24_spill] sm:$0xff] %v6030_v48  ;;  %v2521_v46 = vadd.f32 %v2480_v58, %v5926_v5  ;;  %v2522_v23 = vadd.f32 %v2483_v55, %v5929_v26  ;;  %v6037_v39 = vld [vmem:[%s3912_s23 + $0x90] sm:$0xff]  ;;  %v6040_v27 = vld [vmem:[%s3912_s23 + $0x98] sm:$0xff] }
 0x204   : > { %v2523_v4 = vadd.f32 %v2485_v22, %v5932_v25  ;;  %v2524_v0 = vadd.f32 %v2488_v43, %v5935_v57  ;;  %7178 = vst [vmem:[#allocation33_spill] sm:$0xff] %v6037_v39  ;;  %v2525_v60 = vadd.f32 %v2490_v30, %v5938_v12  ;;  %v2526_v42 = vadd.f32 %v2493_v29, %v5941_v50  ;;  %v6049_v5 = vld [vmem:[%s3912_s23 + $0xb0] sm:$0xff]  ;;  %v6052_v26 = vld [vmem:[%s3912_s23 + $0xd8] sm:$0xff]  ;;  %v6058_v57 = vld [vmem:[%s3912_s23 + $0xe0] sm:$0xff] }
 0x205   : > { %7179 = vst [vmem:[#allocation28_spill] sm:$0xff] %v6040_v27  ;;  %v2527_v31 = vadd.f32 %v2495_v63, %v5944_v47  ;;  %v6055_v25 = vperm.slane %v7176_v56, 5  ;;  %v2556_v11 = vmul.f32 %v6016_v8, %v2555_v45  ;;  %v2557_v14 = vmul.f32 %v6024_v17, %v2555_v45  ;;  %v6070_v47 = vld [vmem:[%s3912_s23 + $0x110] sm:$0xff]  ;;  %v6103_v43 = vld [vmem:[%s3912_s23 + $0x88] sm:$0xf] }
 0x206   : > { %7181 = vst [vmem:[#allocation29_spill] sm:$0xff] %v6049_v5  ;;  %v2558_v12 = vmul.f32 %v6027_v59, %v2555_v45  ;;  %v6067_v50 = vperm.slane %v7176_v56, 6  ;;  %v2559_v24 = vmul.f32 %v6030_v48, %v2555_v45  ;;  %v2560_v36 = vmul.f32 %v6037_v39, %v2555_v45  ;;  %v6092_v44 = vld [vmem:[%s3912_s23 + $0x70] sm:$0xf] }
 0x207   : > { %7182 = vst [vmem:[#allocation22_spill] sm:$0xff] %v6052_v26  ;;  %v2561_v7 = vmul.f32 %v6040_v27, %v2555_v45  ;;  %v2562_v19 = vmul.f32 %v6043_v10, %v2555_v45  ;;  %v2563_v32 = vmul.f32 %v6049_v5, %v2555_v45  ;;  %v2564_v18 = vmul.f32 %v7168_v9, %v2555_v45 }
 0x208   : > { %7183 = vst [vmem:[#allocation31_spill] sm:$0xff] %v6058_v57  ;;  %v2565_v16 = vmul.f32 %v7169_v40, %v2555_v45  ;;  %v2566_v13 = vmul.f32 %v6052_v26, %v2555_v45  ;;  %v2567_v61 = vmul.f32 %v6058_v57, %v2555_v45  ;;  %v2568_v15 = vmul.f32 %v7174_v41, %v2555_v45 }
 0x209   : > { %7185 = vst [vmem:[#allocation21_spill] sm:$0xff] %v6070_v47  ;;  %v2569_v62 = vmul.f32 %v7175_v49, %v2555_v45  ;;  %v2570_v3 = vmul.f32 %v6061_v20, %v2555_v45  ;;  %v2571_v6 = vmul.f32 %v6070_v47, %v2555_v45  ;;  %v6085_v2 = vadd.f32 %v2556_v11, %v2512_v52  ;;  %v6125_v45 = vld [vmem:[%s3912_s23 + $0xb8] sm:$0xf] }
 0x20a   : > { %v6087_v54 = vadd.f32 %v2557_v14, %v2513_v38  ;;  %v6089_v37 = vadd.f32 %v2558_v12, %v2514_v28  ;;  %v6094_v34 = vadd.f32 %v2559_v24, %v2515_v1  ;;  %v6096_v58 = vadd.f32 %v2560_v36, %v2516_v35  ;;  %7186 = vst [vmem:[#allocation32_spill] sm:$0xff] %v6103_v43  ;;  %v6114_v38 = vld [vmem:[%s3912_s23 + $0xa0] sm:$0xf]  ;;  %v6161_v36 = vld [vmem:[%s3912_s23 + $0x118] sm:$0xf] }
 0x20b   : > { %v6098_v55 = vadd.f32 %v2561_v7, %v2517_v53  ;;  %v6100_v22 = vadd.f32 %v2562_v19, %v2518_v21  ;;  %v6105_v30 = vadd.f32 %v2563_v32, %v2519_v51  ;;  %v6107_v29 = vadd.f32 %v2564_v18, %v2520_v33  ;;  %7187 = vst [vmem:[#allocation25_spill] sm:$0xff] %v6114_v38  ;;  %v6128_v53 = vld [vmem:[%s3912_s23 + $0xd0] sm:$0xf]  ;;  %v6158_v24 = vld [vmem:[%s3912_s23 + $0x100] sm:$0xf] }
 0x20c   : > { %v6109_v63 = vadd.f32 %v2565_v16, %v2521_v46  ;;  %v6111_v52 = vadd.f32 %v2566_v13, %v2522_v23  ;;  %v6116_v28 = vadd.f32 %v2567_v61, %v2523_v4  ;;  %v6118_v1 = vadd.f32 %v2568_v15, %v2524_v0  ;;  %7188 = vst [vmem:[#allocation26_spill] sm:$0xff] %v6125_v45 }
 0x20d   : > { %v6120_v35 = vadd.f32 %v2569_v62, %v2525_v60  ;;  %v6122_v56 = vadd.f32 %v2570_v3, %v2526_v42  ;;  %7189 = vst [vmem:[#allocation30_spill] sm:$0xff] %v6128_v53  ;;  %v6130_v21 = vadd.f32 %v2571_v6, %v2527_v31  ;;  %v2589_v51 = vmul.f32 %v6016_v8, %v6055_v25  ;;  %v6147_v42 = vld [vmem:[%s3912_s23 + $0xe8] sm:$0xf] }
 0x20e   : > { %v2590_v33 = vmul.f32 %v6024_v17, %v6055_v25  ;;  %v2591_v46 = vmul.f32 %v6092_v44, %v6055_v25  ;;  %v2592_v23 = vmul.f32 %v6027_v59, %v6055_v25  ;;  %v2593_v4 = vmul.f32 %v6030_v48, %v6055_v25  ;;  %7190 = vst [vmem:[#allocation36_spill] sm:$0xff] %v6147_v42 }
 0x20f   : > { %v2594_v0 = vmul.f32 %v6103_v43, %v6055_v25  ;;  %v2595_v60 = vmul.f32 %v6037_v39, %v6055_v25  ;;  %v2596_v31 = vmul.f32 %v6040_v27, %v6055_v25  ;;  %v2597_v11 = vmul.f32 %v6114_v38, %v6055_v25  ;;  %7191 = vst [vmem:[#allocation38_spill] sm:$0xff] %v6158_v24 }
 0x210   : > { %v2598_v14 = vmul.f32 %v6043_v10, %v6055_v25  ;;  %v2599_v12 = vmul.f32 %v6049_v5, %v6055_v25  ;;  %7192 = vst [vmem:[#allocation34_spill] sm:$0xff] %v6161_v36  ;;  %v2600_v7 = vmul.f32 %v6125_v45, %v6055_v25  ;;  %v2601_v19 = vmul.f32 %v7168_v9, %v6055_v25 }
 0x211   : > { %v2602_v32 = vmul.f32 %v7169_v40, %v6055_v25  ;;  %v2603_v18 = vmul.f32 %v6128_v53, %v6055_v25  ;;  %v2604_v16 = vmul.f32 %v6052_v26, %v6055_v25  ;;  %v2637_v13 = vrot.slane %v2589_v51, 1 }
 0x212   : > { %v2638_v61 = vrot.slane %v2590_v33, 1  ;;  %v2640_v15 = vrot.slane %v2591_v46, 1  ;;  %v2605_v62 = vmul.f32 %v6058_v57, %v6055_v25  ;;  %v2606_v3 = vmul.f32 %v6147_v42, %v6055_v25 }
 0x213   : > { %v2607_v9 = vmul.f32 %v7174_v41, %v6055_v25  ;;  %v2608_v40 = vmul.f32 %v7175_v49, %v6055_v25  ;;  %v2609_v6 = vmul.f32 %v6158_v24, %v6055_v25  ;;  %v2610_v51 = vmul.f32 %v6061_v20, %v6055_v25 }
 0x214   : > { %v2611_v33 = vmul.f32 %v6070_v47, %v6055_v25  ;;  %v2612_v46 = vmul.f32 %v6161_v36, %v6055_v25  ;;  %v2642_v57 = vrot.slane %v2592_v23, 1  ;;  %v2643_v42 = vrot.slane %v2593_v4, 1 }
 0x215   : > { %v2645_v26 = vrot.slane %v2594_v0, 1  ;;  %v2647_v53 = vrot.slane %v2595_v60, 1  ;;  %v2639_v41 = vsel %vm457_vm0, %v2637_v13, %v2638_v61  ;;  %v2641_v49 = vsel %vm457_vm0, %v2638_v61, %v2640_v15  ;;  %v7197_v61 = vld [vmem:[#allocation25_spill] sm:$0xff] }
 0x216   : > { %v2648_v45 = vrot.slane %v2596_v31, 1  ;;  %v2650_v5 = vrot.slane %v2597_v11, 1  ;;  %v2652_v24 = vrot.slane %v2598_v14, 1  ;;  %v2653_v10 = vrot.slane %v2599_v12, 1 }
 0x217   : > { %v2655_v38 = vrot.slane %v2600_v7, 1  ;;  %v2657_v20 = vrot.slane %v2601_v19, 1  ;;  %v2658_v27 = vrot.slane %v2602_v32, 1  ;;  %v2660_v39 = vrot.slane %v2603_v18, 1 }
 0x218   : > { %v2662_v47 = vrot.slane %v2604_v16, 1  ;;  %v2663_v43 = vrot.slane %v2605_v62, 1  ;;  %v2665_v48 = vrot.slane %v2606_v3, 1  ;;  %v2667_v25 = vrot.slane %v2607_v9, 1  ;;  %v7198_v62 = vld [vmem:[#allocation20_spill] sm:$0xff]  ;;  %v7199_v9 = vld [vmem:[#allocation29_spill] sm:$0xff] }
 0x219   : > { %v2668_v23 = vrot.slane %v2608_v40, 1  ;;  %v2670_v4 = vrot.slane %v2609_v6, 1  ;;  %v2644_v0 = vsel %vm457_vm0, %v2642_v57, %v2643_v42  ;;  %v2672_v60 = vrot.slane %v2610_v51, 1  ;;  %v7200_v6 = vld [vmem:[#allocation26_spill] sm:$0xff] }
 0x21a   : > { %v2673_v13 = vrot.slane %v2611_v33, 1  ;;  %v2675_v36 = vrot.slane %v2612_v46, 1  ;;  %v2646_v31 = vsel %vm457_vm0, %v2643_v42, %v2645_v26  ;;  %v2649_v11 = vsel %vm457_vm0, %v2647_v53, %v2648_v45  ;;  %v6278_v33 = vld [vmem:[%s3912_s23 + $0xc0] sm:$0xff] }
 0x21b   : > { %v2651_v14 = vsel %vm457_vm0, %v2648_v45, %v2650_v5  ;;  %v2654_v12 = vsel %vm457_vm0, %v2652_v24, %v2653_v10  ;;  %v2656_v7 = vsel %vm457_vm0, %v2653_v10, %v2655_v38  ;;  %v2659_v19 = vsel %vm457_vm0, %v2657_v20, %v2658_v27  ;;  %v7196_v24 = vld [vmem:[#allocation28_spill] sm:$0xff]  ;;  %7201 = vst [vmem:[#allocation19_spill] sm:$0xff] %v6278_v33 }
 0x21c   : > { %v2661_v32 = vsel %vm457_vm0, %v2658_v27, %v2660_v39  ;;  %v2664_v18 = vsel %vm457_vm0, %v2662_v47, %v2663_v43  ;;  %v2666_v57 = vsel %vm457_vm0, %v2663_v43, %v2665_v48  ;;  %v2669_v16 = vsel %vm457_vm0, %v2667_v25, %v2668_v23  ;;  %v7203_v25 = vld [vmem:[#allocation30_spill] sm:$0xff] }
 0x21d   : > { %v2671_v26 = vsel %vm457_vm0, %v2668_v23, %v2670_v4  ;;  %v6204_v53 = vadd.f32 %v2639_v41, %v6085_v2  ;;  %v2674_v5 = vsel %vm457_vm0, %v2672_v60, %v2673_v13  ;;  %v2676_v45 = vsel %vm457_vm0, %v2673_v13, %v2675_v36  ;;  %v6283_v41 = vld [vmem:[%s3912_s23 + $0xc8] sm:$0xff]  ;;  %v7204_v4 = vld [vmem:[#allocation22_spill] sm:$0xff] }
 0x21e   : > { %v6209_v10 = vadd.f32 %v2641_v49, %v6087_v54  ;;  %v6212_v39 = vadd.f32 %v2644_v0, %v6089_v37  ;;  %v6215_v27 = vadd.f32 %v2646_v31, %v6094_v34  ;;  %v6218_v48 = vadd.f32 %v2649_v11, %v6096_v58  ;;  %7202 = vst [vmem:[#allocation35_spill] sm:$0xff] %v6283_v41  ;;  %v7205_v11 = vld [vmem:[#allocation31_spill] sm:$0xff] }
 0x21f   : > { %v6221_v20 = vadd.f32 %v2651_v14, %v6098_v55  ;;  %v6224_v47 = vadd.f32 %v2654_v12, %v6100_v22  ;;  %v6227_v2 = vadd.f32 %v2656_v7, %v6105_v30  ;;  %v6230_v54 = vadd.f32 %v2659_v19, %v6107_v29  ;;  %v7206_v12 = vld [vmem:[#allocation36_spill] sm:$0xff] }
 0x220   : > { %v6233_v37 = vadd.f32 %v2661_v32, %v6109_v63  ;;  %v6236_v34 = vadd.f32 %v2664_v18, %v6111_v52  ;;  %v6239_v58 = vadd.f32 %v2666_v57, %v6116_v28  ;;  %v6242_v55 = vadd.f32 %v2669_v16, %v6118_v1  ;;  %v7193_v28 = vld [vmem:[#allocation24_spill] sm:$0xff]  ;;  %v6301_v18 = vld [vmem:[%s3912_s23 + $0xf8] sm:$0xff]  ;;  %v7209_v16 = vld [vmem:[#allocation38_spill] sm:$0xff] }
 0x221   : > { %v6245_v22 = vadd.f32 %v2671_v26, %v6120_v35  ;;  %v6248_v43 = vadd.f32 %v2674_v5, %v6122_v56  ;;  %v6251_v30 = vadd.f32 %v2676_v45, %v6130_v21  ;;  %v2710_v29 = vmul.f32 %v6016_v8, %v6067_v50  ;;  %v7194_v35 = vld [vmem:[#allocation32_spill] sm:$0xff]  ;;  %v7195_v21 = vld [vmem:[#allocation33_spill] sm:$0xff]  ;;  %7208 = vst [vmem:[#allocation27_spill] sm:$0xff] %v6301_v18  ;;  %v7210_v5 = vld [vmem:[#allocation23_spill] sm:$0xff] }
 0x222   : > { %v2711_v63 = vmul.f32 %v6024_v17, %v6067_v50  ;;  %v2712_v52 = vmul.f32 %v6092_v44, %v6067_v50  ;;  %v2713_v38 = vmul.f32 %v6027_v59, %v6067_v50  ;;  %v2714_v1 = vmul.f32 %v7193_v28, %v6067_v50  ;;  %v6296_v19 = vld [vmem:[%s3912_s23 + $0xf0] sm:$0xff] }
 0x223   : > { %v2715_v56 = vmul.f32 %v7194_v35, %v6067_v50  ;;  %v2716_v42 = vmul.f32 %v7195_v21, %v6067_v50  ;;  %v2717_v36 = vmul.f32 %v7196_v24, %v6067_v50  ;;  %v2718_v15 = vmul.f32 %v7197_v61, %v6067_v50  ;;  %7207 = vst [vmem:[#allocation39_spill] sm:$0xff] %v6296_v19 }
 0x224   : > { %v2719_v3 = vmul.f32 %v7198_v62, %v6067_v50  ;;  %v2720_v40 = vmul.f32 %v7199_v9, %v6067_v50  ;;  %v2721_v51 = vmul.f32 %v7200_v6, %v6067_v50  ;;  %v2722_v46 = vmul.f32 %v6278_v33, %v6067_v50 }
 0x225   : > { %v2723_v49 = vmul.f32 %v6283_v41, %v6067_v50  ;;  %v2724_v23 = vmul.f32 %v7203_v25, %v6067_v50  ;;  %v2725_v0 = vmul.f32 %v7204_v4, %v6067_v50  ;;  %v2758_v60 = vrot.slane %v2710_v29, 2  ;;  %v7211_v29 = vld [vmem:[#allocation21_spill] sm:$0xff] }
 0x226   : > { %v2759_v13 = vrot.slane %v2711_v63, 2  ;;  %v2761_v31 = vrot.slane %v2712_v52, 2  ;;  %v2726_v14 = vmul.f32 %v7205_v11, %v6067_v50  ;;  %v2727_v7 = vmul.f32 %v7206_v12, %v6067_v50  ;;  %v7212_v52 = vld [vmem:[#allocation34_spill] sm:$0xff] }
 0x227   : > { %v2728_v32 = vmul.f32 %v6296_v19, %v6067_v50  ;;  %v2729_v57 = vmul.f32 %v6301_v18, %v6067_v50  ;;  %v2730_v26 = vmul.f32 %v7209_v16, %v6067_v50  ;;  %v2731_v45 = vmul.f32 %v7210_v5, %v6067_v50 }
 0x228   : > { %v2732_v63 = vmul.f32 %v7211_v29, %v6067_v50  ;;  %v2733_v12 = vmul.f32 %v7212_v52, %v6067_v50  ;;  %v2763_v11 = vrot.slane %v2713_v38, 2  ;;  %v2764_v4 = vrot.slane %v2714_v1, 2 }
 0x229   : > { %v2766_v19 = vrot.slane %v2715_v56, 2  ;;  %v2768_v25 = vrot.slane %v2716_v42, 2  ;;  %v2760_v41 = vsel %vm579_vm1, %v2758_v60, %v2759_v13  ;;  %v2762_v18 = vsel %vm579_vm1, %v2759_v13, %v2761_v31 }
 0x22a   : > { %v2769_v33 = vrot.slane %v2717_v36, 2  ;;  %v2771_v6 = vrot.slane %v2718_v15, 2  ;;  %v2773_v16 = vrot.slane %v2719_v3, 2  ;;  %v2774_v9 = vrot.slane %v2720_v40, 2 }
 0x22b   : > { %v2776_v62 = vrot.slane %v2721_v51, 2  ;;  %v2778_v5 = vrot.slane %v2722_v46, 2  ;;  %v2779_v61 = vrot.slane %v2723_v49, 2  ;;  %v2781_v24 = vrot.slane %v2724_v23, 2 }
 0x22c   : > { %v2783_v29 = vrot.slane %v2725_v0, 2  ;;  %v2784_v21 = vrot.slane %v2726_v14, 2  ;;  %v2786_v35 = vrot.slane %v2727_v7, 2  ;;  %v2788_v50 = vrot.slane %v2728_v32, 2 }
 0x22d   : > { %v2789_v38 = vrot.slane %v2729_v57, 2  ;;  %v2791_v1 = vrot.slane %v2730_v26, 2  ;;  %v2765_v56 = vsel %vm579_vm1, %v2763_v11, %v2764_v4  ;;  %v2793_v42 = vrot.slane %v2731_v45, 2 }
 0x22e   : > { %v2794_v60 = vrot.slane %v2732_v63, 2  ;;  %v2796_v52 = vrot.slane %v2733_v12, 2  ;;  %v2767_v36 = vsel %vm579_vm1, %v2764_v4, %v2766_v19  ;;  %v2770_v15 = vsel %vm579_vm1, %v2768_v25, %v2769_v33  ;;  %v7225_v19 = vld [vmem:[#allocation33_spill] sm:$0xff]  ;;  %v7229_v63 = vld [vmem:[#allocation20_spill] sm:$0xff] }
 0x22f   : > { %v2772_v3 = vsel %vm579_vm1, %v2769_v33, %v2771_v6  ;;  %v2775_v40 = vsel %vm579_vm1, %v2773_v16, %v2774_v9  ;;  %v2777_v51 = vsel %vm579_vm1, %v2774_v9, %v2776_v62  ;;  %v2780_v46 = vsel %vm579_vm1, %v2778_v5, %v2779_v61  ;;  %v7227_v5 = vld [vmem:[#allocation28_spill] sm:$0xff] }
 0x230   : > { %v2782_v49 = vsel %vm579_vm1, %v2779_v61, %v2781_v24  ;;  %v2785_v23 = vsel %vm579_vm1, %v2783_v29, %v2784_v21  ;;  %v2787_v0 = vsel %vm579_vm1, %v2784_v21, %v2786_v35  ;;  %v2790_v13 = vsel %vm579_vm1, %v2788_v50, %v2789_v38  ;;  %v6338_v61 = vld [vmem:[#allocation6 + $0x18] ss:$0 sm:$0xff]  ;;  %v7231_v50 = vld [vmem:[#allocation26_spill] sm:$0xff] }
 0x231   : > { %v2792_v4 = vsel %vm579_vm1, %v2789_v38, %v2791_v1  ;;  %v6328_v25 = vadd.f32 %v2760_v41, %v6204_v53  ;;  %v2795_v6 = vsel %vm579_vm1, %v2793_v42, %v2794_v60  ;;  %v2797_v33 = vsel %vm579_vm1, %v2794_v60, %v2796_v52  ;;  %v7228_v29 = vld [vmem:[#allocation25_spill] sm:$0xff]  ;;  %v7232_v1 = vld [vmem:[#allocation19_spill] sm:$0xff]  ;;  %v7234_v60 = vld [vmem:[#allocation30_spill] sm:$0xff] }
 0x232   : > { %v6333_v62 = vadd.f32 %v2762_v18, %v6209_v10  ;;  %v6336_v24 = vadd.f32 %v2765_v56, %v6212_v39  ;;  %v6341_v35 = vadd.f32 %v2767_v36, %v6215_v27  ;;  %v6344_v21 = vadd.f32 %v2770_v15, %v6218_v48  ;;  %v3511_v27 = vld [vmem:[#allocation6 + $0x10] sm:$0xff]  ;;  %v7230_v52 = vld [vmem:[#allocation29_spill] sm:$0xff]  ;;  %v7233_v42 = vld [vmem:[#allocation35_spill] sm:$0xff] }
 0x233   : > { %v6347_v53 = vadd.f32 %v2772_v3, %v6221_v20  ;;  %v6350_v9 = vadd.f32 %v2775_v40, %v6224_v47  ;;  %v6353_v10 = vadd.f32 %v2777_v51, %v6227_v2  ;;  %v6356_v39 = vadd.f32 %v2780_v46, %v6230_v54  ;;  %v7235_v36 = vld [vmem:[#allocation22_spill] sm:$0xff]  ;;  %v7236_v46 = vld [vmem:[#allocation31_spill] sm:$0xff] }
 0x234   : > { %v6359_v41 = vadd.f32 %v2782_v49, %v6233_v37  ;;  %v2830_v31 = vperm.slane %v3511_v27, 7  ;;  %v6362_v48 = vadd.f32 %v2785_v23, %v6236_v34  ;;  %v6365_v20 = vadd.f32 %v2787_v0, %v6239_v58  ;;  %v7237_v23 = vld [vmem:[#allocation36_spill] sm:$0xff]  ;;  %v7240_v27 = vld [vmem:[#allocation38_spill] sm:$0xff] }
 0x235   : > { %v6368_v47 = vadd.f32 %v2790_v13, %v6242_v55  ;;  %v6371_v2 = vadd.f32 %v2792_v4, %v6245_v22  ;;  %v6374_v54 = vadd.f32 %v2795_v6, %v6248_v43  ;;  %v6377_v37 = vadd.f32 %v2797_v33, %v6251_v30  ;;  %v7223_v43 = vld [vmem:[#allocation32_spill] sm:$0xff]  ;;  %v7238_v13 = vld [vmem:[#allocation39_spill] sm:$0xff] }
 0x236   : > { %7213 = vst [vmem:[#allocation18_spill] sm:$0xff] %v6365_v20  ;;  %v6381_v11 = vmul.f32 %v6338_v61, %v6016_v8  ;;  %v6385_v34 = vmul.f32 %v6338_v61, %v6024_v17  ;;  %v6389_v58 = vmul.f32 %v6338_v61, %v6092_v44  ;;  %v6393_v55 = vmul.f32 %v6338_v61, %v6027_v59  ;;  %v7239_v6 = vld [vmem:[#allocation27_spill] sm:$0xff] }
 0x237   : > { %7214 = vst [vmem:[#allocation37_spill] sm:$0xff] %v6368_v47  ;;  %v6397_v22 = vmul.f32 %v6338_v61, %v7193_v28  ;;  %v6401_v30 = vmul.f32 %v6338_v61, %v7223_v43  ;;  %v2831_v14 = vmul.f32 %v6016_v8, %v2830_v31  ;;  %v2832_v12 = vmul.f32 %v6024_v17, %v2830_v31  ;;  %v7243_v47 = vld [vmem:[#allocation34_spill] sm:$0xff] }
 0x238   : > { %7215 = vst [vmem:[#allocation24_spill] sm:$0xff] %v6371_v2  ;;  %v2833_v7 = vmul.f32 %v6092_v44, %v2830_v31  ;;  %v6408_v32 = vmul.f32 %v6338_v61, %v7225_v19  ;;  %v2834_v18 = vmul.f32 %v6027_v59, %v2830_v31  ;;  %v2835_v57 = vmul.f32 %v7193_v28, %v2830_v31 }
 0x239   : > { %7216 = vst [vmem:[#allocation40_spill] sm:$0xff] %v6374_v54  ;;  %v2836_v16 = vmul.f32 %v7223_v43, %v2830_v31  ;;  %v2837_v26 = vmul.f32 %v7225_v19, %v2830_v31  ;;  %v2838_v45 = vmul.f32 %v7227_v5, %v2830_v31  ;;  %v2839_v8 = vmul.f32 %v7228_v29, %v2830_v31  ;;  %v7241_v19 = vld [vmem:[#allocation23_spill] sm:$0xff]  ;;  %v7242_v54 = vld [vmem:[#allocation21_spill] sm:$0xff] }
 0x23a   : > { %7217 = vst [vmem:[#allocation41_spill] sm:$0xff] %v6377_v37  ;;  %v2840_v17 = vmul.f32 %v7229_v63, %v2830_v31  ;;  %v2841_v44 = vmul.f32 %v7230_v52, %v2830_v31  ;;  %v2842_v38 = vmul.f32 %v7231_v50, %v2830_v31  ;;  %v2843_v56 = vmul.f32 %v7232_v1, %v2830_v31 }
 0x23b   : > { %7218 = vst [vmem:[#allocation42_spill] sm:$0xff] %v6381_v11  ;;  %v2844_v59 = vmul.f32 %v7233_v42, %v2830_v31  ;;  %v2845_v28 = vmul.f32 %v7234_v60, %v2830_v31  ;;  %v2846_v15 = vmul.f32 %v7235_v36, %v2830_v31  ;;  %v2879_v3 = vrot.slane %v2831_v14, 3 }
 0x23c   : > { %7219 = vst [vmem:[#allocation43_spill] sm:$0xff] %v6385_v34  ;;  %v2880_v40 = vrot.slane %v2832_v12, 3  ;;  %v2882_v51 = vrot.slane %v2833_v7, 3  ;;  %v2847_v49 = vmul.f32 %v7236_v46, %v2830_v31  ;;  %v2848_v0 = vmul.f32 %v7237_v23, %v2830_v31 }
 0x23d   : > { %7220 = vst [vmem:[#allocation44_spill] sm:$0xff] %v6389_v58  ;;  %v2849_v4 = vmul.f32 %v7238_v13, %v2830_v31  ;;  %v2850_v33 = vmul.f32 %v7239_v6, %v2830_v31  ;;  %v2851_v43 = vmul.f32 %v7240_v27, %v2830_v31  ;;  %v2852_v37 = vmul.f32 %v7241_v19, %v2830_v31 }
 0x23e   : > { %7221 = vst [vmem:[#allocation45_spill] sm:$0xff] %v6393_v55  ;;  %v2853_v2 = vmul.f32 %v7242_v54, %v2830_v31  ;;  %v2854_v20 = vmul.f32 %v7243_v47, %v2830_v31  ;;  %v2885_v14 = vrot.slane %v2835_v57, 3  ;;  %v2887_v12 = vrot.slane %v2836_v16, 3 }
 0x23f   : > { %7222 = vst [vmem:[#allocation46_spill] sm:$0xff] %v6397_v22  ;;  %v2889_v7 = vrot.slane %v2837_v26, 3  ;;  %v2883_v23 = vsel %vm701_vm2, %v2880_v40, %v2882_v51  ;;  %v2890_v22 = vrot.slane %v2838_v45, 3  ;;  %v2892_v13 = vrot.slane %v2839_v8, 3 }
 0x240   : > { %7224 = vst [vmem:[#allocation32_spill] sm:$0xff] %v6401_v30  ;;  %v2881_v30 = vsel %vm701_vm2, %v2879_v3, %v2880_v40  ;;  %v2894_v55 = vrot.slane %v2840_v17, 3  ;;  %v2895_v6 = vrot.slane %v2841_v44, 3  ;;  %v2897_v58 = vrot.slane %v2842_v38, 3 }
 0x241   : > { %7226 = vst [vmem:[#allocation33_spill] sm:$0xff] %v6408_v32  ;;  %v2884_v32 = vrot.slane %v2834_v18, 3  ;;  %v2899_v27 = vrot.slane %v2843_v56, 3  ;;  %v2900_v34 = vrot.slane %v2844_v59, 3  ;;  %v2902_v19 = vrot.slane %v2845_v28, 3 }
 0x242   : > { %v2904_v11 = vrot.slane %v2846_v15, 3  ;;  %v2905_v54 = vrot.slane %v2847_v49, 3  ;;  %v2907_v46 = vrot.slane %v2848_v0, 3  ;;  %v2909_v31 = vrot.slane %v2849_v4, 3 }
 0x243   : > { %v2910_v18 = vrot.slane %v2850_v33, 3  ;;  %v2912_v57 = vrot.slane %v2851_v43, 3  ;;  %v2886_v16 = vsel %vm701_vm2, %v2884_v32, %v2885_v14  ;;  %v2914_v26 = vrot.slane %v2852_v37, 3  ;;  %v7246_v51 = vld [vmem:[#allocation43_spill] sm:$0xff] }
 0x244   : > { %v2915_v3 = vrot.slane %v2853_v2, 3  ;;  %v2917_v47 = vrot.slane %v2854_v20, 3  ;;  %v2888_v45 = vsel %vm701_vm2, %v2885_v14, %v2887_v12  ;;  %v2891_v8 = vsel %vm701_vm2, %v2889_v7, %v2890_v22  ;;  %v7254_v12 = vld [vmem:[#allocation27_spill] sm:$0xff] }
 0x245   : > { %v2893_v17 = vsel %vm701_vm2, %v2890_v22, %v2892_v13  ;;  %v2896_v44 = vsel %vm701_vm2, %v2894_v55, %v2895_v6  ;;  %v2898_v38 = vsel %vm701_vm2, %v2895_v6, %v2897_v58  ;;  %v2901_v56 = vsel %vm701_vm2, %v2899_v27, %v2900_v34  ;;  %v7251_v6 = vld [vmem:[#allocation36_spill] sm:$0xff] }
 0x246   : > { %v2903_v59 = vsel %vm701_vm2, %v2900_v34, %v2902_v19  ;;  %v2906_v28 = vsel %vm701_vm2, %v2904_v11, %v2905_v54  ;;  %v6443_v37 = vsel %vm701_vm2, %v2905_v54, %v2907_v46  ;;  %v6446_v20 = vsel %vm701_vm2, %v2909_v31, %v2910_v18  ;;  %v7249_v0 = vld [vmem:[#allocation46_spill] sm:$0xff]  ;;  %v7253_v19 = vld [vmem:[#allocation39_spill] sm:$0xff] }
 0x247   : > { %v6449_v2 = vsel %vm701_vm2, %v2910_v18, %v2912_v57  ;;  %v2935_v22 = vadd.f32 %v2881_v30, %v6328_v25  ;;  %v6453_v55 = vsel %vm701_vm2, %v2914_v26, %v2915_v3  ;;  %v6456_v58 = vsel %vm701_vm2, %v2915_v3, %v2917_v47  ;;  %v7255_v57 = vld [vmem:[#allocation38_spill] sm:$0xff]  ;;  %v7256_v26 = vld [vmem:[#allocation23_spill] sm:$0xff] }
 0x248   : > { %v2936_v34 = vadd.f32 %v2883_v23, %v6333_v62  ;;  %v2937_v11 = vadd.f32 %v2886_v16, %v6336_v24  ;;  %v2938_v54 = vadd.f32 %v2888_v45, %v6341_v35  ;;  %v2939_v32 = vadd.f32 %v2891_v8, %v6344_v21  ;;  %v7248_v23 = vld [vmem:[#allocation45_spill] sm:$0xff] }
 0x249   : > { %v2940_v15 = vadd.f32 %v2893_v17, %v6347_v53  ;;  %v6464_v40 = vadd.f32 %v2896_v44, %v6350_v9  ;;  %v6467_v25 = vadd.f32 %v2898_v38, %v6353_v10  ;;  %v6470_v30 = vadd.f32 %v2901_v56, %v6356_v39  ;;  %v7252_v33 = vld [vmem:[#allocation33_spill] sm:$0xff] }
 0x24a   : > { %v6473_v47 = vadd.f32 %v2903_v59, %v6359_v41  ;;  %v6476_v62 = vadd.f32 %v2906_v28, %v6362_v48  ;;  %v2959_v24 = vmul.f32 %v6338_v61, %v7227_v5  ;;  %v2960_v35 = vmul.f32 %v6338_v61, %v7228_v29  ;;  %v7244_v5 = vld [vmem:[#allocation31_spill] sm:$0xff]  ;;  %v7257_v45 = vld [vmem:[#allocation21_spill] sm:$0xff] }
 0x24b   : > { %v2961_v21 = vmul.f32 %v6338_v61, %v7229_v63  ;;  %v2962_v53 = vmul.f32 %v6338_v61, %v7230_v52  ;;  %v2963_v9 = vmul.f32 %v6338_v61, %v7231_v50  ;;  %v2964_v10 = vmul.f32 %v7232_v1, %v6338_v61  ;;  %v7245_v63 = vld [vmem:[#allocation42_spill] sm:$0xff]  ;;  %v7247_v50 = vld [vmem:[#allocation44_spill] sm:$0xff] }
 0x24c   : > { %v2965_v39 = vmul.f32 %v7233_v42, %v6338_v61  ;;  %v2966_v41 = vmul.f32 %v6338_v61, %v7234_v60  ;;  %v2967_v48 = vmul.f32 %v6338_v61, %v7235_v36  ;;  %v2968_v29 = vmul.f32 %v6338_v61, %v7244_v5  ;;  %v7250_v42 = vld [vmem:[#allocation32_spill] sm:$0xff] }
 0x24d   : > { %v3000_v52 = vrot.slane %v7245_v63, 4  ;;  %v3001_v46 = vrot.slane %v7246_v51, 4  ;;  %v3003_v49 = vrot.slane %v7247_v50, 4  ;;  %v3005_v1 = vrot.slane %v7248_v23, 4 }
 0x24e   : > { %v3006_v13 = vrot.slane %v7249_v0, 4  ;;  %v3008_v4 = vrot.slane %v7250_v42, 4  ;;  %v2969_v60 = vmul.f32 %v6338_v61, %v7251_v6  ;;  %v3010_v36 = vrot.slane %v7252_v33, 4 }
 0x24f   : > { %v3011_v27 = vrot.slane %v2959_v24, 4  ;;  %v3013_v43 = vrot.slane %v2960_v35, 4  ;;  %v2970_v14 = vmul.f32 %v7253_v19, %v6338_v61  ;;  %v2971_v7 = vmul.f32 %v7254_v12, %v6338_v61 }
 0x250   : > { %v3015_v31 = vrot.slane %v2961_v21, 4  ;;  %v3016_v18 = vrot.slane %v2962_v53, 4  ;;  %v2972_v16 = vmul.f32 %v6338_v61, %v7255_v57  ;;  %v2973_v3 = vmul.f32 %v6338_v61, %v7256_v26 }
 0x251   : > { %v2974_v8 = vmul.f32 %v6338_v61, %v7257_v45  ;;  %v3002_v17 = vsel %vm823_vm3, %v3000_v52, %v3001_v46  ;;  %v3004_v44 = vsel %vm823_vm3, %v3001_v46, %v3003_v49  ;;  %v3007_v38 = vsel %vm823_vm3, %v3005_v1, %v3006_v13 }
 0x252   : > { %v3009_v56 = vsel %vm823_vm3, %v3006_v13, %v3008_v4  ;;  %v3018_v59 = vrot.slane %v2963_v9, 4  ;;  %v3012_v28 = vsel %vm823_vm3, %v3010_v36, %v3011_v27  ;;  %v3014_v24 = vsel %vm823_vm3, %v3011_v27, %v3013_v43  ;;  %v7258_v9 = vld [vmem:[#allocation34_spill] sm:$0xff]  ;;  %v7260_v4 = vld [vmem:[#allocation37_spill] sm:$0xff] }
 0x253   : > { %v3020_v35 = vrot.slane %v2964_v10, 4  ;;  %v3021_v21 = vrot.slane %v2965_v39, 4  ;;  %v3017_v53 = vsel %vm823_vm3, %v3015_v31, %v3016_v18  ;;  %v3023_v5 = vrot.slane %v2966_v41, 4 }
 0x254   : > { %v3025_v63 = vrot.slane %v2967_v48, 4  ;;  %v3056_v51 = vadd.f32 %v3002_v17, %v2935_v22  ;;  %v3026_v52 = vrot.slane %v2968_v29, 4  ;;  %v3057_v46 = vadd.f32 %v3004_v44, %v2936_v34  ;;  %v7259_v34 = vld [vmem:[#allocation18_spill] sm:$0xff] }
 0x255   : > { %v3058_v50 = vadd.f32 %v3007_v38, %v2937_v11  ;;  %v3059_v49 = vadd.f32 %v3009_v56, %v2938_v54  ;;  %v2975_v23 = vmul.f32 %v6338_v61, %v7258_v9  ;;  %v3019_v10 = vsel %vm823_vm3, %v3016_v18, %v3018_v59 }
 0x256   : > { %v3028_v1 = vrot.slane %v2969_v60, 4  ;;  %v3060_v39 = vadd.f32 %v3012_v28, %v2939_v32  ;;  %3072 = vst [vmem:[%s3870_s24] sm:$0xff] %v3056_v51  ;;  %v3022_v41 = vsel %vm823_vm3, %v3020_v35, %v3021_v21  ;;  %v3030_v22 = vrot.slane %v2970_v14, 4  ;;  %v7263_v14 = vld [vmem:[#allocation41_spill] sm:$0xff] }
 0x257   : > { %v3031_v48 = vrot.slane %v2971_v7, 4  ;;  %v3061_v0 = vadd.f32 %v3014_v24, %v2940_v15  ;;  %3073 = vst [vmem:[%s3870_s24 + $0x8] sm:$0xff] %v3057_v46  ;;  %v2946_v11 = vadd.f32 %v6443_v37, %v7259_v34  ;;  %v3024_v61 = vsel %vm823_vm3, %v3021_v21, %v3023_v5 }
 0x258   : > { %v3033_v54 = vrot.slane %v2972_v16, 4  ;;  %v3062_v32 = vadd.f32 %v3017_v53, %v6464_v40  ;;  %3074 = vst [vmem:[%s3870_s24 + $0x10] sm:$0xff] %v3058_v50  ;;  %v3027_v29 = vsel %vm823_vm3, %v3025_v63, %v3026_v52  ;;  %v3035_v13 = vrot.slane %v2973_v3, 4  ;;  %v7261_v40 = vld [vmem:[#allocation24_spill] sm:$0xff] }
 0x259   : > { %v3036_v42 = vrot.slane %v2974_v8, 4  ;;  %v3063_v15 = vadd.f32 %v3019_v10, %v6467_v25  ;;  %3075 = vst [vmem:[%s3870_s24 + $0x18] sm:$0xff] %v3059_v49  ;;  %v2947_v6 = vadd.f32 %v6446_v20, %v7260_v4  ;;  %v3029_v37 = vsel %vm823_vm3, %v3026_v52, %v3028_v1  ;;  %v7262_v20 = vld [vmem:[#allocation40_spill] sm:$0xff] }
 0x25a   : > { %v3038_v60 = vrot.slane %v2975_v23, 4  ;;  %v3064_v33 = vadd.f32 %v3022_v41, %v6470_v30  ;;  %3076 = vst [vmem:[%s3870_s24 + $0x20] sm:$0xff] %v3060_v39  ;;  %v2948_v36 = vadd.f32 %v6449_v2, %v7261_v40  ;;  %v3032_v27 = vsel %vm823_vm3, %v3030_v22, %v3031_v48 }
 0x25b   : > { %v3065_v25 = vadd.f32 %v3024_v61, %v6473_v47  ;;  %3077 = vst [vmem:[%s3870_s24 + $0x28] sm:$0xff] %v3061_v0  ;;  %v2949_v43 = vadd.f32 %v6453_v55, %v7262_v20  ;;  %v3034_v19 = vsel %vm823_vm3, %v3031_v48, %v3033_v54  ;;  %v3066_v30 = vadd.f32 %v3027_v29, %v6476_v62 }
 0x25c   : > { %3078 = vst [vmem:[%s3870_s24 + $0x30] sm:$0xff] %v3062_v32  ;;  %v2950_v2 = vadd.f32 %v6456_v58, %v7263_v14  ;;  %v3037_v12 = vsel %vm823_vm3, %v3035_v13, %v3036_v42  ;;  %v3067_v7 = vadd.f32 %v3029_v37, %v2946_v11  ;;  %v3039_v55 = vsel %vm823_vm3, %v3036_v42, %v3038_v60 }
 0x25d   : > { %3079 = vst [vmem:[%s3870_s24 + $0x38] sm:$0xff] %v3063_v15  ;;  %v3068_v47 = vadd.f32 %v3032_v27, %v2947_v6  ;;  %v3069_v62 = vadd.f32 %v3034_v19, %v2948_v36  ;;  %v3070_v58 = vadd.f32 %v3037_v12, %v2949_v43 }
 0x25e   : > { %3080 = vst [vmem:[%s3870_s24 + $0x40] sm:$0xff] %v3064_v33  ;;  %v3071_v31 = vadd.f32 %v3039_v55, %v2950_v2 }
 0x25f   : > { %3081 = vst [vmem:[%s3870_s24 + $0x48] sm:$0xff] %v3065_v25 }
 0x260   : > { %3082 = vst [vmem:[%s3870_s24 + $0x50] sm:$0xff] %v3066_v30 }
 0x261   : > { %3083 = vst [vmem:[%s3870_s24 + $0x58] sm:$0xff] %v3067_v7 }
 0x262   : > { %3084 = vst [vmem:[%s3870_s24 + $0x60] sm:$0xff] %v3068_v47 }
 0x263   : > { %3085 = vst [vmem:[%s3870_s24 + $0x68] sm:$0xff] %v3069_v62 }
 0x264   : > { %3086 = vst [vmem:[%s3870_s24 + $0x70] sm:$0xff] %v3070_v58 }
 0x265   : > { %3087 = vst [vmem:[%s3870_s24 + $0x78] sm:$0xff] %v3071_v31 }
 0x266   : > { %3599 = shalt.err (!%p3596_p7)
}
 0x267   : > { %s3704_s9 = smov 128   ;;  %s3705_s24 = smov 8  }
 0x268   : > { %3365 = dma.vmem_to_hbm [thread:$0]  (%p3791_p6), %s3106_s28, 2048, %s3108_s3, %s3089_s20, %s3704_s9, %s3704_s9, %s3705_s24  }
 0x269 PF: > { %s7265_s23 = sld [smem:[#allocation12_spill]]  ;;  %p3382_p8 = scmp.ge.s32.totalorder %s3698_s19, 2 }
 0x26b   : > { %p3376_p9 = pnand %p3382_p8, %p3797_p10 }
 0x26d   : > { %p3377_p12 = pneg %p3376_p9 }
 0x26f   : > { %s3122_s7 = sand.u32 1, %s7265_s23  }
 0x270   : > { %s3123_s15 = scalar_lea.sflag [#allocation5], %s3122_s7 }
 0x271   : > { %3653 = dma.done.wait (%p3377_p12), %s3123_s15, 2048  }
 0x272   : > { %3655 = vsyncadd (%p3377_p12), %s3123_s15, 4294965248  ;;  %s19_s19 = sadd.s32 1, %s3698_s19   ;;  %s7267_s15 = sld [smem:[#allocation13_spill]] }
 0x273   : > { %p16_p13 = scmp.ge.s32.totalorder %s19_s19, 6   ;;  %s7268_s17 = sld [smem:[#allocation16_spill]] }
 0x274   : > { %s7269_s21 = sld [smem:[#allocation17_spill]]  ;;  %s7270_s9 = smov %s3662_s10 }
 0x275   : > { %s7271_s10 = smov %s3666_s11  ;;  %s7272_s11 = smov %s3842_s5 }
 0x276   : > { %s7273_s12 = smov %s3674_s13  ;;  %s7274_s13 = smov %s3678_s14 }
 0x277   : > { %s7275_s14 = smov %s3839_s4  ;;  %s7276_s16 = smov %s3694_s18 }
 0x278   :  { %18 = sbr.rel (!%p16_p13) target bundleno = 12 (0xc), region = 88 }
 0x27a   : > { %s7277_s18 = smov %s7269_s21 }
 0x27d   :  { %3129 = vsyncpa [#allocation4], 1 }
 0x27e   :  { %3131 = vsyncpa [#allocation4 + $0x1], 1 }
 0x27f   :  { %3132 = vsyncpa [#allocation7], 1 }
 0x280   :  { %3133 = vsyncpa [#allocation5], 1 }
 0x281   :  { %3135 = vsyncpa [#allocation5 + $0x1], 1 }

</bundles_post_ra>
